<compile_context>
chip_gen: v7x
topology: tpu7x:2x2x1
jax: 0.10.0
libtpu: 0.0.40
codegen_flags: <defaults>
</compile_context>

<pallas_src>
import numpy as np
import jax
import jax.numpy as jnp
from jax.experimental import pallas as pl
from jax.experimental.pallas import tpu as pltpu

# ---------------------------------------------------------------------------
# Network constants (CIFAR-sized input implied by Linear(16*5*5, 120))
# ---------------------------------------------------------------------------
C1, H1, W1 = 3, 32, 32
OC1, K1 = 6, 5
OH1, OW1 = H1 - K1 + 1, W1 - K1 + 1          # 28, 28
PH1, PW1 = OH1 // 2, OW1 // 2                # 14, 14
OC2, K2 = 16, 5
OH2, OW2 = PH1 - K2 + 1, PW1 - K2 + 1        # 10, 10
PH2, PW2 = OH2 // 2, OW2 // 2                # 5, 5
LANE = 128                                   # lane-dense padding unit
FC1_OUT, FC2_OUT, FC3_OUT = 120, 84, 10


# ---------------------------------------------------------------------------
# Fused kernel: conv1+ReLU+pool + conv2+ReLU+pool + fc1+ReLU + fc2+ReLU + fc3
# (one image per grid step)
# ---------------------------------------------------------------------------
def _net_kernel(x_ref, w1_ref, b1_ref, w2_ref, b2_ref,
                fw1_ref, fb1_ref, fw2_ref, fb2_ref, fw3_ref, fb3_ref,
                o_ref, p1_ref):
    # x_ref  : (1, 32, 96)    rows grouped by (h % 4) [8 rows/group], cols = c*32 + w
    # w1_ref : (5, 96, 256)   conv1 mats, out col = (ow%2)*128 + oc*14 + ow//2
    # b1_ref : (1, 128)       conv1 bias in pooled col layout (oc*14 + owp)
    # w2_ref : (5, 128, 256)  conv2 mats, row = c*14 + w, out col = (ow%2)*128 + oc*5 + ow//2
    # b2_ref : (1, 128)       conv2 bias in pooled col layout (oc*5 + owp)
    # fw1_ref: (5, 128, 128)  fc1 weights split per pooled row h (flatten perm folded in)
    # fb*/fw*: fc biases / fc2, fc3 weights, lane padded to 128
    # o_ref  : (1, 1, 128)    logits (cols >= 10 are zero)
    # p1_ref : (2, 7, 128)    VMEM scratch: pool1 output grouped by (pooled row % 2)

    # ---- conv1: output rows produced in 4 groups by (oh % 4) -----------------
    og = []
    for q in range(4):
        acc = None
        for i in range(K1):                              # kernel row (tap)
            g = (q + i) % 4
            s = g * 8 + (q + i) // 4
            t = jnp.dot(x_ref[0, s:s + 7, :], w1_ref[i],
                        preferred_element_type=jnp.float32)
            acc = t if acc is None else acc + t
        og.append(acc)                                   # (7, 256)
    # 2x2 max-pool: rows via group max, cols via half max (bias/ReLU commute with max)
    pa = jnp.maximum(og[0], og[1])                       # pooled rows 0,2,...,12
    pb = jnp.maximum(og[2], og[3])                       # pooled rows 1,3,...,13
    p1_ref[0] = jnp.maximum(
        jnp.maximum(pa[:, :LANE], pa[:, LANE:]) + b1_ref[...], 0.0)
    p1_ref[1] = jnp.maximum(
        jnp.maximum(pb[:, :LANE], pb[:, LANE:]) + b1_ref[...], 0.0)

    # ---- conv2: output rows produced in 2 groups by (oh2 % 2) ----------------
    ev = od = None
    for i in range(K2):
        te = jnp.dot(p1_ref[i % 2, i // 2:i // 2 + 5, :], w2_ref[i],
                     preferred_element_type=jnp.float32)
        ev = te if ev is None else ev + te
        to = jnp.dot(p1_ref[(i + 1) % 2, (i + 1) // 2:(i + 1) // 2 + 5, :], w2_ref[i],
                     preferred_element_type=jnp.float32)
        od = to if od is None else od + to
    pr = jnp.maximum(ev, od)                             # (5, 256) row-pooled
    p2 = jnp.maximum(jnp.maximum(pr[:, :LANE], pr[:, LANE:]) + b2_ref[...], 0.0)
    # p2: (5, 128), col = oc*5 + owp (cols >= 80 are zero)

    # ---- fc1 (+ReLU): flatten permutation folded into per-row weight blocks --
    a1 = fb1_ref[...]                                    # (1, 128)
    for h in range(PH2):
        a1 = a1 + jnp.dot(p2[h:h + 1, :], fw1_ref[h],
                          preferred_element_type=jnp.float32)
    a1 = jnp.maximum(a1, 0.0)

    # ---- fc2 (+ReLU) + fc3 ----------------------------------------------------
    a2 = jnp.maximum(
        jnp.dot(a1, fw2_ref[...], preferred_element_type=jnp.float32)
        + fb2_ref[...], 0.0)
    o_ref[0] = (jnp.dot(a2, fw3_ref[...], preferred_element_type=jnp.float32)
                + fb3_ref[...]).astype(o_ref.dtype)


def net_pallas(x_packed, cp):
    b = x_packed.shape[0]
    return pl.pallas_call(
        _net_kernel,
        out_shape=jax.ShapeDtypeStruct((b, 1, LANE), jnp.float32),
        grid_spec=pltpu.PrefetchScalarGridSpec(
            num_scalar_prefetch=0,
            grid=(b,),
            in_specs=[
                pl.BlockSpec((1, H1, C1 * W1), lambda i: (i, 0, 0)),
                pl.BlockSpec((K1, C1 * W1, 2 * LANE), lambda i: (0, 0, 0)),
                pl.BlockSpec((1, LANE), lambda i: (0, 0)),
                pl.BlockSpec((K2, LANE, 2 * LANE), lambda i: (0, 0, 0)),
                pl.BlockSpec((1, LANE), lambda i: (0, 0)),
                pl.BlockSpec((PH2, LANE, LANE), lambda i: (0, 0, 0)),
                pl.BlockSpec((1, LANE), lambda i: (0, 0)),
                pl.BlockSpec((LANE, LANE), lambda i: (0, 0)),
                pl.BlockSpec((1, LANE), lambda i: (0, 0)),
                pl.BlockSpec((LANE, LANE), lambda i: (0, 0)),
                pl.BlockSpec((1, LANE), lambda i: (0, 0)),
            ],
            out_specs=pl.BlockSpec((1, 1, LANE), lambda i: (i, 0, 0)),
            scratch_shapes=[pltpu.VMEM((2, 7, LANE), jnp.float32)],
        ),
        compiler_params=pltpu.CompilerParams(dimension_semantics=("parallel",)),
    )(x_packed, cp["w1"], cp["b1"], cp["w2"], cp["b2"],
      cp["fc1_w"], cp["fc1_b"], cp["fc2_w"], cp["fc2_b"],
      cp["fc3_w"], cp["fc3_b"])


# ---------------------------------------------------------------------------
# Host-side (one-time) parameter packing
# ---------------------------------------------------------------------------
def _conv_struct_mats(w_oihw, w_in, rows_pad, half):
    """Per-kernel-row matrices for a VALID stride-1 conv on (H, c*w_in + w) packed rows.

    Row index    : c*w_in + w
    Column index : (ow % 2) * half + oc * (OW//2) + ow//2   (even/odd ow separated
                   so the width pool is max(cols[:half], cols[half:]))
    """
    w = np.asarray(w_oihw, np.float32)
    oc_n, c_n, kh, kw = w.shape
    ow_n = w_in - kw + 1
    owp = ow_n // 2
    out = np.zeros((kh, rows_pad, 2 * half), np.float32)
    for i in range(kh):
        for oc in range(oc_n):
            for c in range(c_n):
                for ow in range(ow_n):
                    col = (ow % 2) * half + oc * owp + ow // 2
                    for j in range(kw):
                        out[i, c * w_in + ow + j, col] = w[oc, c, i, j]
    return jnp.asarray(out)


def pack_params(p):
    cp = {}
    cp["w1"] = _conv_struct_mats(p["conv1_w"], W1, C1 * W1, LANE)   # (5, 96, 256)
    cp["w2"] = _conv_struct_mats(p["conv2_w"], PW1, LANE, LANE)     # (5, 128, 256)

    b1 = np.zeros((1, LANE), np.float32)
    b1[0, :OC1 * PW1] = np.repeat(np.asarray(p["conv1_b"], np.float32), PW1)
    cp["b1"] = jnp.asarray(b1)
    b2 = np.zeros((1, LANE), np.float32)
    b2[0, :OC2 * PW2] = np.repeat(np.asarray(p["conv2_b"], np.float32), PW2)
    cp["b2"] = jnp.asarray(b2)

    # fc1: fold torch.flatten(NCHW) permutation + lane padding into per-row blocks.
    fw = np.asarray(p["fc1_w"], np.float32)                         # (400, 120)
    w1fc = np.zeros((PH2, LANE, LANE), np.float32)                  # (5, 128, 128)
    for h in range(PH2):
        for c in range(OC2):
            for w in range(PW2):
                w1fc[h, c * PW2 + w, :FC1_OUT] = fw[c * PH2 * PW2 + h * PW2 + w, :]
    cp["fc1_w"] = jnp.asarray(w1fc)
    b = np.zeros((1, LANE), np.float32); b[0, :FC1_OUT] = np.asarray(p["fc1_b"], np.float32)
    cp["fc1_b"] = jnp.asarray(b)

    w2fc = np.zeros((LANE, LANE), np.float32)
    w2fc[:FC1_OUT, :FC2_OUT] = np.asarray(p["fc2_w"], np.float32)
    cp["fc2_w"] = jnp.asarray(w2fc)
    b = np.zeros((1, LANE), np.float32); b[0, :FC2_OUT] = np.asarray(p["fc2_b"], np.float32)
    cp["fc2_b"] = jnp.asarray(b)

    w3fc = np.zeros((LANE, LANE), np.float32)
    w3fc[:FC2_OUT, :FC3_OUT] = np.asarray(p["fc3_w"], np.float32)
    cp["fc3_w"] = jnp.asarray(w3fc)
    b = np.zeros((1, LANE), np.float32); b[0, :FC3_OUT] = np.asarray(p["fc3_b"], np.float32)
    cp["fc3_b"] = jnp.asarray(b)
    return cp


# ---------------------------------------------------------------------------
# Parameters (deterministic, PyTorch-style uniform(-1/sqrt(fan_in), 1/sqrt(fan_in)))
# ---------------------------------------------------------------------------
def init_params(key):
    def unif(k, shape, fan_in):
        bound = 1.0 / jnp.sqrt(jnp.float32(fan_in))
        return jax.random.uniform(k, shape, jnp.float32, -bound, bound)

    ks = jax.random.split(key, 10)
    return {
        "conv1_w": unif(ks[0], (6, 3, 5, 5), 3 * 5 * 5),
        "conv1_b": unif(ks[1], (6,), 3 * 5 * 5),
        "conv2_w": unif(ks[2], (16, 6, 5, 5), 6 * 5 * 5),
        "conv2_b": unif(ks[3], (16,), 6 * 5 * 5),
        "fc1_w": unif(ks[4], (400, 120), 400),   # stored (in, out)
        "fc1_b": unif(ks[5], (120,), 400),
        "fc2_w": unif(ks[6], (120, 84), 120),
        "fc2_b": unif(ks[7], (84,), 120),
        "fc3_w": unif(ks[8], (84, 10), 84),
        "fc3_b": unif(ks[9], (10,), 84),
    }


# ---------------------------------------------------------------------------
# Forward pass (mirrors Net.forward)
# ---------------------------------------------------------------------------
def _pack_input(x_nchw):
    b = x_nchw.shape[0]
    x = jnp.transpose(x_nchw, (0, 2, 1, 3)).reshape(b, H1, C1 * W1)    # cols = c*32 + w
    # group rows by (h % 4): packed row = (h % 4) * 8 + h // 4
    x = x.reshape(b, H1 // 4, 4, C1 * W1).transpose(0, 2, 1, 3)
    return x.reshape(b, H1, C1 * W1)


@jax.jit
def net_forward(cp, x_nchw):
    xp = _pack_input(x_nchw.astype(jnp.float32))
    out = net_pallas(xp, cp)                      # (b, 1, 128)
    return out[:, 0, :FC3_OUT]


# ---------------------------------------------------------------------------
# Pure-JAX reference (for correctness check only)
# ---------------------------------------------------------------------------
def net_reference(p, x):
    dn = ("NCHW", "OIHW", "NCHW")
    y = jax.lax.conv_general_dilated(x, p["conv1_w"], (1, 1), "VALID",
                                     dimension_numbers=dn)
    y = jax.nn.relu(y + p["conv1_b"][None, :, None, None])
    y = jax.lax.reduce_window(y, -jnp.inf, jax.lax.max,
                              (1, 1, 2, 2), (1, 1, 2, 2), "VALID")
    y = jax.lax.conv_general_dilated(y, p["conv2_w"], (1, 1), "VALID",
                                     dimension_numbers=dn)
    y = jax.nn.relu(y + p["conv2_b"][None, :, None, None])
    y = jax.lax.reduce_window(y, -jnp.inf, jax.lax.max,
                              (1, 1, 2, 2), (1, 1, 2, 2), "VALID")
    y = y.reshape(y.shape[0], -1)                 # torch.flatten(x, 1) (NCHW order)
    y = jax.nn.relu(y @ p["fc1_w"] + p["fc1_b"])
    y = jax.nn.relu(y @ p["fc2_w"] + p["fc2_b"])
    return y @ p["fc3_w"] + p["fc3_b"]


if __name__ == "__main__":
    key = jax.random.PRNGKey(0)
    pkey, xkey = jax.random.split(key)
    params = init_params(pkey)
    packed = pack_params(params)
    x = jax.random.normal(xkey, (2, 3, 32, 32), dtype=jnp.float32)

    out = net_forward(packed, x)
    jax.block_until_ready(out)
    assert out.shape == (2, 10) and out.dtype == jnp.float32

    ref = net_reference(params, x)
    err = float(jnp.max(jnp.abs(out - ref)))
    assert err < 3e-2, f"mismatch vs pure-JAX reference: max |diff| = {err}"
    print("KERNEL_OK")
</pallas_src>

<mosaic_0001>
module attributes {stable_mosaic.version = 11 : i64} {
  func.func @_net_kernel(%arg0: i32, %arg1: memref<1x32x96xf32, #tpu.memory_space<vmem>>, %arg2: memref<5x96x256xf32, #tpu.memory_space<vmem>>, %arg3: memref<1x128xf32, #tpu.memory_space<vmem>>, %arg4: memref<5x128x256xf32, #tpu.memory_space<vmem>>, %arg5: memref<1x128xf32, #tpu.memory_space<vmem>>, %arg6: memref<5x128x128xf32, #tpu.memory_space<vmem>>, %arg7: memref<1x128xf32, #tpu.memory_space<vmem>>, %arg8: memref<128x128xf32, #tpu.memory_space<vmem>>, %arg9: memref<1x128xf32, #tpu.memory_space<vmem>>, %arg10: memref<128x128xf32, #tpu.memory_space<vmem>>, %arg11: memref<1x128xf32, #tpu.memory_space<vmem>>, %arg12: memref<1x1x128xf32, #tpu.memory_space<vmem>>, %arg13: memref<2x7x128xf32, #tpu.memory_space<vmem>>) attributes {dimension_semantics = [#tpu.dimension_semantics<parallel>], iteration_bounds = array<i64: 2>, scalar_prefetch = 0 : i64, scratch_operands = 1 : i64, tpu.core_type = #tpu.core_type<tc>, window_params = [{transform_indices = @transform_0, window_bounds = array<i64: 1, 32, 96>}, {pipeline_mode = #tpu.pipeline_mode<synchronous>, transform_indices = @transform_1, window_bounds = array<i64: 5, 96, 256>}, {pipeline_mode = #tpu.pipeline_mode<synchronous>, transform_indices = @transform_2, window_bounds = array<i64: 1, 128>}, {pipeline_mode = #tpu.pipeline_mode<synchronous>, transform_indices = @transform_3, window_bounds = array<i64: 5, 128, 256>}, {pipeline_mode = #tpu.pipeline_mode<synchronous>, transform_indices = @transform_4, window_bounds = array<i64: 1, 128>}, {pipeline_mode = #tpu.pipeline_mode<synchronous>, transform_indices = @transform_5, window_bounds = array<i64: 5, 128, 128>}, {pipeline_mode = #tpu.pipeline_mode<synchronous>, transform_indices = @transform_6, window_bounds = array<i64: 1, 128>}, {pipeline_mode = #tpu.pipeline_mode<synchronous>, transform_indices = @transform_7, window_bounds = array<i64: 128, 128>}, {pipeline_mode = #tpu.pipeline_mode<synchronous>, transform_indices = @transform_8, window_bounds = array<i64: 1, 128>}, {pipeline_mode = #tpu.pipeline_mode<synchronous>, transform_indices = @transform_9, window_bounds = array<i64: 128, 128>}, {pipeline_mode = #tpu.pipeline_mode<synchronous>, transform_indices = @transform_10, window_bounds = array<i64: 1, 128>}, {transform_indices = @transform_11, window_bounds = array<i64: 1, 1, 128>}]} {
    %c0 = arith.constant 0 : index
    %c0_0 = arith.constant 0 : index
    %c0_1 = arith.constant 0 : index
    %0 = vector.load %arg1[%c0, %c0_0, %c0_1] : memref<1x32x96xf32, #tpu.memory_space<vmem>>, vector<1x7x96xf32>
    %1 = vector.shape_cast %0 : vector<1x7x96xf32> to vector<7x96xf32>
    %c0_2 = arith.constant 0 : index
    %c0_3 = arith.constant 0 : index
    %c0_4 = arith.constant 0 : index
    %2 = vector.load %arg2[%c0_2, %c0_3, %c0_4] : memref<5x96x256xf32, #tpu.memory_space<vmem>>, vector<1x96x256xf32>
    %3 = vector.shape_cast %2 : vector<1x96x256xf32> to vector<96x256xf32>
    %cst = arith.constant dense<0.000000e+00> : vector<7x256xf32>
    %4 = tpu.matmul %1, %3, %cst {dimension_numbers = #tpu.dot_dimension_numbers<[1], [0], [0], [1], [0, 0, 1, 1], [], []>} : vector<7x96xf32>, vector<96x256xf32>, vector<7x256xf32> -> vector<7x256xf32>
    %c0_5 = arith.constant 0 : index
    %c8 = arith.constant 8 : index
    %c0_6 = arith.constant 0 : index
    %5 = vector.load %arg1[%c0_5, %c8, %c0_6] : memref<1x32x96xf32, #tpu.memory_space<vmem>>, vector<1x7x96xf32>
    %6 = vector.shape_cast %5 : vector<1x7x96xf32> to vector<7x96xf32>
    %c1 = arith.constant 1 : index
    %c0_7 = arith.constant 0 : index
    %c0_8 = arith.constant 0 : index
    %7 = vector.load %arg2[%c1, %c0_7, %c0_8] : memref<5x96x256xf32, #tpu.memory_space<vmem>>, vector<1x96x256xf32>
    %8 = vector.shape_cast %7 : vector<1x96x256xf32> to vector<96x256xf32>
    %cst_9 = arith.constant dense<0.000000e+00> : vector<7x256xf32>
    %9 = tpu.matmul %6, %8, %cst_9 {dimension_numbers = #tpu.dot_dimension_numbers<[1], [0], [0], [1], [0, 0, 1, 1], [], []>} : vector<7x96xf32>, vector<96x256xf32>, vector<7x256xf32> -> vector<7x256xf32>
    %10 = arith.addf %4, %9 : vector<7x256xf32>
    %c0_10 = arith.constant 0 : index
    %c16 = arith.constant 16 : index
    %c0_11 = arith.constant 0 : index
    %11 = vector.load %arg1[%c0_10, %c16, %c0_11] : memref<1x32x96xf32, #tpu.memory_space<vmem>>, vector<1x7x96xf32>
    %12 = vector.shape_cast %11 : vector<1x7x96xf32> to vector<7x96xf32>
    %c2 = arith.constant 2 : index
    %c0_12 = arith.constant 0 : index
    %c0_13 = arith.constant 0 : index
    %13 = vector.load %arg2[%c2, %c0_12, %c0_13] : memref<5x96x256xf32, #tpu.memory_space<vmem>>, vector<1x96x256xf32>
    %14 = vector.shape_cast %13 : vector<1x96x256xf32> to vector<96x256xf32>
    %cst_14 = arith.constant dense<0.000000e+00> : vector<7x256xf32>
    %15 = tpu.matmul %12, %14, %cst_14 {dimension_numbers = #tpu.dot_dimension_numbers<[1], [0], [0], [1], [0, 0, 1, 1], [], []>} : vector<7x96xf32>, vector<96x256xf32>, vector<7x256xf32> -> vector<7x256xf32>
    %16 = arith.addf %10, %15 : vector<7x256xf32>
    %c0_15 = arith.constant 0 : index
    %c24 = arith.constant 24 : index
    %c0_16 = arith.constant 0 : index
    %17 = vector.load %arg1[%c0_15, %c24, %c0_16] : memref<1x32x96xf32, #tpu.memory_space<vmem>>, vector<1x7x96xf32>
    %18 = vector.shape_cast %17 : vector<1x7x96xf32> to vector<7x96xf32>
    %c3 = arith.constant 3 : index
    %c0_17 = arith.constant 0 : index
    %c0_18 = arith.constant 0 : index
    %19 = vector.load %arg2[%c3, %c0_17, %c0_18] : memref<5x96x256xf32, #tpu.memory_space<vmem>>, vector<1x96x256xf32>
    %20 = vector.shape_cast %19 : vector<1x96x256xf32> to vector<96x256xf32>
    %cst_19 = arith.constant dense<0.000000e+00> : vector<7x256xf32>
    %21 = tpu.matmul %18, %20, %cst_19 {dimension_numbers = #tpu.dot_dimension_numbers<[1], [0], [0], [1], [0, 0, 1, 1], [], []>} : vector<7x96xf32>, vector<96x256xf32>, vector<7x256xf32> -> vector<7x256xf32>
    %22 = arith.addf %16, %21 : vector<7x256xf32>
    %c0_20 = arith.constant 0 : index
    %c1_21 = arith.constant 1 : index
    %c0_22 = arith.constant 0 : index
    %23 = vector.load %arg1[%c0_20, %c1_21, %c0_22] : memref<1x32x96xf32, #tpu.memory_space<vmem>>, vector<1x7x96xf32>
    %24 = vector.shape_cast %23 : vector<1x7x96xf32> to vector<7x96xf32>
    %c4 = arith.constant 4 : index
    %c0_23 = arith.constant 0 : index
    %c0_24 = arith.constant 0 : index
    %25 = vector.load %arg2[%c4, %c0_23, %c0_24] : memref<5x96x256xf32, #tpu.memory_space<vmem>>, vector<1x96x256xf32>
    %26 = vector.shape_cast %25 : vector<1x96x256xf32> to vector<96x256xf32>
    %cst_25 = arith.constant dense<0.000000e+00> : vector<7x256xf32>
    %27 = tpu.matmul %24, %26, %cst_25 {dimension_numbers = #tpu.dot_dimension_numbers<[1], [0], [0], [1], [0, 0, 1, 1], [], []>} : vector<7x96xf32>, vector<96x256xf32>, vector<7x256xf32> -> vector<7x256xf32>
    %28 = arith.addf %22, %27 : vector<7x256xf32>
    %c0_26 = arith.constant 0 : index
    %c8_27 = arith.constant 8 : index
    %c0_28 = arith.constant 0 : index
    %29 = vector.load %arg1[%c0_26, %c8_27, %c0_28] : memref<1x32x96xf32, #tpu.memory_space<vmem>>, vector<1x7x96xf32>
    %30 = vector.shape_cast %29 : vector<1x7x96xf32> to vector<7x96xf32>
    %c0_29 = arith.constant 0 : index
    %c0_30 = arith.constant 0 : index
    %c0_31 = arith.constant 0 : index
    %31 = vector.load %arg2[%c0_29, %c0_30, %c0_31] : memref<5x96x256xf32, #tpu.memory_space<vmem>>, vector<1x96x256xf32>
    %32 = vector.shape_cast %31 : vector<1x96x256xf32> to vector<96x256xf32>
    %cst_32 = arith.constant dense<0.000000e+00> : vector<7x256xf32>
    %33 = tpu.matmul %30, %32, %cst_32 {dimension_numbers = #tpu.dot_dimension_numbers<[1], [0], [0], [1], [0, 0, 1, 1], [], []>} : vector<7x96xf32>, vector<96x256xf32>, vector<7x256xf32> -> vector<7x256xf32>
    %c0_33 = arith.constant 0 : index
    %c16_34 = arith.constant 16 : index
    %c0_35 = arith.constant 0 : index
    %34 = vector.load %arg1[%c0_33, %c16_34, %c0_35] : memref<1x32x96xf32, #tpu.memory_space<vmem>>, vector<1x7x96xf32>
    %35 = vector.shape_cast %34 : vector<1x7x96xf32> to vector<7x96xf32>
    %c1_36 = arith.constant 1 : index
    %c0_37 = arith.constant 0 : index
    %c0_38 = arith.constant 0 : index
    %36 = vector.load %arg2[%c1_36, %c0_37, %c0_38] : memref<5x96x256xf32, #tpu.memory_space<vmem>>, vector<1x96x256xf32>
    %37 = vector.shape_cast %36 : vector<1x96x256xf32> to vector<96x256xf32>
    %cst_39 = arith.constant dense<0.000000e+00> : vector<7x256xf32>
    %38 = tpu.matmul %35, %37, %cst_39 {dimension_numbers = #tpu.dot_dimension_numbers<[1], [0], [0], [1], [0, 0, 1, 1], [], []>} : vector<7x96xf32>, vector<96x256xf32>, vector<7x256xf32> -> vector<7x256xf32>
    %39 = arith.addf %33, %38 : vector<7x256xf32>
    %c0_40 = arith.constant 0 : index
    %c24_41 = arith.constant 24 : index
    %c0_42 = arith.constant 0 : index
    %40 = vector.load %arg1[%c0_40, %c24_41, %c0_42] : memref<1x32x96xf32, #tpu.memory_space<vmem>>, vector<1x7x96xf32>
    %41 = vector.shape_cast %40 : vector<1x7x96xf32> to vector<7x96xf32>
    %c2_43 = arith.constant 2 : index
    %c0_44 = arith.constant 0 : index
    %c0_45 = arith.constant 0 : index
    %42 = vector.load %arg2[%c2_43, %c0_44, %c0_45] : memref<5x96x256xf32, #tpu.memory_space<vmem>>, vector<1x96x256xf32>
    %43 = vector.shape_cast %42 : vector<1x96x256xf32> to vector<96x256xf32>
    %cst_46 = arith.constant dense<0.000000e+00> : vector<7x256xf32>
    %44 = tpu.matmul %41, %43, %cst_46 {dimension_numbers = #tpu.dot_dimension_numbers<[1], [0], [0], [1], [0, 0, 1, 1], [], []>} : vector<7x96xf32>, vector<96x256xf32>, vector<7x256xf32> -> vector<7x256xf32>
    %45 = arith.addf %39, %44 : vector<7x256xf32>
    %c0_47 = arith.constant 0 : index
    %c1_48 = arith.constant 1 : index
    %c0_49 = arith.constant 0 : index
    %46 = vector.load %arg1[%c0_47, %c1_48, %c0_49] : memref<1x32x96xf32, #tpu.memory_space<vmem>>, vector<1x7x96xf32>
    %47 = vector.shape_cast %46 : vector<1x7x96xf32> to vector<7x96xf32>
    %c3_50 = arith.constant 3 : index
    %c0_51 = arith.constant 0 : index
    %c0_52 = arith.constant 0 : index
    %48 = vector.load %arg2[%c3_50, %c0_51, %c0_52] : memref<5x96x256xf32, #tpu.memory_space<vmem>>, vector<1x96x256xf32>
    %49 = vector.shape_cast %48 : vector<1x96x256xf32> to vector<96x256xf32>
    %cst_53 = arith.constant dense<0.000000e+00> : vector<7x256xf32>
    %50 = tpu.matmul %47, %49, %cst_53 {dimension_numbers = #tpu.dot_dimension_numbers<[1], [0], [0], [1], [0, 0, 1, 1], [], []>} : vector<7x96xf32>, vector<96x256xf32>, vector<7x256xf32> -> vector<7x256xf32>
    %51 = arith.addf %45, %50 : vector<7x256xf32>
    %c0_54 = arith.constant 0 : index
    %c9 = arith.constant 9 : index
    %c0_55 = arith.constant 0 : index
    %52 = vector.load %arg1[%c0_54, %c9, %c0_55] : memref<1x32x96xf32, #tpu.memory_space<vmem>>, vector<1x7x96xf32>
    %53 = vector.shape_cast %52 : vector<1x7x96xf32> to vector<7x96xf32>
    %c4_56 = arith.constant 4 : index
    %c0_57 = arith.constant 0 : index
    %c0_58 = arith.constant 0 : index
    %54 = vector.load %arg2[%c4_56, %c0_57, %c0_58] : memref<5x96x256xf32, #tpu.memory_space<vmem>>, vector<1x96x256xf32>
    %55 = vector.shape_cast %54 : vector<1x96x256xf32> to vector<96x256xf32>
    %cst_59 = arith.constant dense<0.000000e+00> : vector<7x256xf32>
    %56 = tpu.matmul %53, %55, %cst_59 {dimension_numbers = #tpu.dot_dimension_numbers<[1], [0], [0], [1], [0, 0, 1, 1], [], []>} : vector<7x96xf32>, vector<96x256xf32>, vector<7x256xf32> -> vector<7x256xf32>
    %57 = arith.addf %51, %56 : vector<7x256xf32>
    %c0_60 = arith.constant 0 : index
    %c16_61 = arith.constant 16 : index
    %c0_62 = arith.constant 0 : index
    %58 = vector.load %arg1[%c0_60, %c16_61, %c0_62] : memref<1x32x96xf32, #tpu.memory_space<vmem>>, vector<1x7x96xf32>
    %59 = vector.shape_cast %58 : vector<1x7x96xf32> to vector<7x96xf32>
    %c0_63 = arith.constant 0 : index
    %c0_64 = arith.constant 0 : index
    %c0_65 = arith.constant 0 : index
    %60 = vector.load %arg2[%c0_63, %c0_64, %c0_65] : memref<5x96x256xf32, #tpu.memory_space<vmem>>, vector<1x96x256xf32>
    %61 = vector.shape_cast %60 : vector<1x96x256xf32> to vector<96x256xf32>
    %cst_66 = arith.constant dense<0.000000e+00> : vector<7x256xf32>
    %62 = tpu.matmul %59, %61, %cst_66 {dimension_numbers = #tpu.dot_dimension_numbers<[1], [0], [0], [1], [0, 0, 1, 1], [], []>} : vector<7x96xf32>, vector<96x256xf32>, vector<7x256xf32> -> vector<7x256xf32>
    %c0_67 = arith.constant 0 : index
    %c24_68 = arith.constant 24 : index
    %c0_69 = arith.constant 0 : index
    %63 = vector.load %arg1[%c0_67, %c24_68, %c0_69] : memref<1x32x96xf32, #tpu.memory_space<vmem>>, vector<1x7x96xf32>
    %64 = vector.shape_cast %63 : vector<1x7x96xf32> to vector<7x96xf32>
    %c1_70 = arith.constant 1 : index
    %c0_71 = arith.constant 0 : index
    %c0_72 = arith.constant 0 : index
    %65 = vector.load %arg2[%c1_70, %c0_71, %c0_72] : memref<5x96x256xf32, #tpu.memory_space<vmem>>, vector<1x96x256xf32>
    %66 = vector.shape_cast %65 : vector<1x96x256xf32> to vector<96x256xf32>
    %cst_73 = arith.constant dense<0.000000e+00> : vector<7x256xf32>
    %67 = tpu.matmul %64, %66, %cst_73 {dimension_numbers = #tpu.dot_dimension_numbers<[1], [0], [0], [1], [0, 0, 1, 1], [], []>} : vector<7x96xf32>, vector<96x256xf32>, vector<7x256xf32> -> vector<7x256xf32>
    %68 = arith.addf %62, %67 : vector<7x256xf32>
    %c0_74 = arith.constant 0 : index
    %c1_75 = arith.constant 1 : index
    %c0_76 = arith.constant 0 : index
    %69 = vector.load %arg1[%c0_74, %c1_75, %c0_76] : memref<1x32x96xf32, #tpu.memory_space<vmem>>, vector<1x7x96xf32>
    %70 = vector.shape_cast %69 : vector<1x7x96xf32> to vector<7x96xf32>
    %c2_77 = arith.constant 2 : index
    %c0_78 = arith.constant 0 : index
    %c0_79 = arith.constant 0 : index
    %71 = vector.load %arg2[%c2_77, %c0_78, %c0_79] : memref<5x96x256xf32, #tpu.memory_space<vmem>>, vector<1x96x256xf32>
    %72 = vector.shape_cast %71 : vector<1x96x256xf32> to vector<96x256xf32>
    %cst_80 = arith.constant dense<0.000000e+00> : vector<7x256xf32>
    %73 = tpu.matmul %70, %72, %cst_80 {dimension_numbers = #tpu.dot_dimension_numbers<[1], [0], [0], [1], [0, 0, 1, 1], [], []>} : vector<7x96xf32>, vector<96x256xf32>, vector<7x256xf32> -> vector<7x256xf32>
    %74 = arith.addf %68, %73 : vector<7x256xf32>
    %c0_81 = arith.constant 0 : index
    %c9_82 = arith.constant 9 : index
    %c0_83 = arith.constant 0 : index
    %75 = vector.load %arg1[%c0_81, %c9_82, %c0_83] : memref<1x32x96xf32, #tpu.memory_space<vmem>>, vector<1x7x96xf32>
    %76 = vector.shape_cast %75 : vector<1x7x96xf32> to vector<7x96xf32>
    %c3_84 = arith.constant 3 : index
    %c0_85 = arith.constant 0 : index
    %c0_86 = arith.constant 0 : index
    %77 = vector.load %arg2[%c3_84, %c0_85, %c0_86] : memref<5x96x256xf32, #tpu.memory_space<vmem>>, vector<1x96x256xf32>
    %78 = vector.shape_cast %77 : vector<1x96x256xf32> to vector<96x256xf32>
    %cst_87 = arith.constant dense<0.000000e+00> : vector<7x256xf32>
    %79 = tpu.matmul %76, %78, %cst_87 {dimension_numbers = #tpu.dot_dimension_numbers<[1], [0], [0], [1], [0, 0, 1, 1], [], []>} : vector<7x96xf32>, vector<96x256xf32>, vector<7x256xf32> -> vector<7x256xf32>
    %80 = arith.addf %74, %79 : vector<7x256xf32>
    %c0_88 = arith.constant 0 : index
    %c17 = arith.constant 17 : index
    %c0_89 = arith.constant 0 : index
    %81 = vector.load %arg1[%c0_88, %c17, %c0_89] : memref<1x32x96xf32, #tpu.memory_space<vmem>>, vector<1x7x96xf32>
    %82 = vector.shape_cast %81 : vector<1x7x96xf32> to vector<7x96xf32>
    %c4_90 = arith.constant 4 : index
    %c0_91 = arith.constant 0 : index
    %c0_92 = arith.constant 0 : index
    %83 = vector.load %arg2[%c4_90, %c0_91, %c0_92] : memref<5x96x256xf32, #tpu.memory_space<vmem>>, vector<1x96x256xf32>
    %84 = vector.shape_cast %83 : vector<1x96x256xf32> to vector<96x256xf32>
    %cst_93 = arith.constant dense<0.000000e+00> : vector<7x256xf32>
    %85 = tpu.matmul %82, %84, %cst_93 {dimension_numbers = #tpu.dot_dimension_numbers<[1], [0], [0], [1], [0, 0, 1, 1], [], []>} : vector<7x96xf32>, vector<96x256xf32>, vector<7x256xf32> -> vector<7x256xf32>
    %86 = arith.addf %80, %85 : vector<7x256xf32>
    %c0_94 = arith.constant 0 : index
    %c24_95 = arith.constant 24 : index
    %c0_96 = arith.constant 0 : index
    %87 = vector.load %arg1[%c0_94, %c24_95, %c0_96] : memref<1x32x96xf32, #tpu.memory_space<vmem>>, vector<1x7x96xf32>
    %88 = vector.shape_cast %87 : vector<1x7x96xf32> to vector<7x96xf32>
    %c0_97 = arith.constant 0 : index
    %c0_98 = arith.constant 0 : index
    %c0_99 = arith.constant 0 : index
    %89 = vector.load %arg2[%c0_97, %c0_98, %c0_99] : memref<5x96x256xf32, #tpu.memory_space<vmem>>, vector<1x96x256xf32>
    %90 = vector.shape_cast %89 : vector<1x96x256xf32> to vector<96x256xf32>
    %cst_100 = arith.constant dense<0.000000e+00> : vector<7x256xf32>
    %91 = tpu.matmul %88, %90, %cst_100 {dimension_numbers = #tpu.dot_dimension_numbers<[1], [0], [0], [1], [0, 0, 1, 1], [], []>} : vector<7x96xf32>, vector<96x256xf32>, vector<7x256xf32> -> vector<7x256xf32>
    %c0_101 = arith.constant 0 : index
    %c1_102 = arith.constant 1 : index
    %c0_103 = arith.constant 0 : index
    %92 = vector.load %arg1[%c0_101, %c1_102, %c0_103] : memref<1x32x96xf32, #tpu.memory_space<vmem>>, vector<1x7x96xf32>
    %93 = vector.shape_cast %92 : vector<1x7x96xf32> to vector<7x96xf32>
    %c1_104 = arith.constant 1 : index
    %c0_105 = arith.constant 0 : index
    %c0_106 = arith.constant 0 : index
    %94 = vector.load %arg2[%c1_104, %c0_105, %c0_106] : memref<5x96x256xf32, #tpu.memory_space<vmem>>, vector<1x96x256xf32>
    %95 = vector.shape_cast %94 : vector<1x96x256xf32> to vector<96x256xf32>
    %cst_107 = arith.constant dense<0.000000e+00> : vector<7x256xf32>
    %96 = tpu.matmul %93, %95, %cst_107 {dimension_numbers = #tpu.dot_dimension_numbers<[1], [0], [0], [1], [0, 0, 1, 1], [], []>} : vector<7x96xf32>, vector<96x256xf32>, vector<7x256xf32> -> vector<7x256xf32>
    %97 = arith.addf %91, %96 : vector<7x256xf32>
    %c0_108 = arith.constant 0 : index
    %c9_109 = arith.constant 9 : index
    %c0_110 = arith.constant 0 : index
    %98 = vector.load %arg1[%c0_108, %c9_109, %c0_110] : memref<1x32x96xf32, #tpu.memory_space<vmem>>, vector<1x7x96xf32>
    %99 = vector.shape_cast %98 : vector<1x7x96xf32> to vector<7x96xf32>
    %c2_111 = arith.constant 2 : index
    %c0_112 = arith.constant 0 : index
    %c0_113 = arith.constant 0 : index
    %100 = vector.load %arg2[%c2_111, %c0_112, %c0_113] : memref<5x96x256xf32, #tpu.memory_space<vmem>>, vector<1x96x256xf32>
    %101 = vector.shape_cast %100 : vector<1x96x256xf32> to vector<96x256xf32>
    %cst_114 = arith.constant dense<0.000000e+00> : vector<7x256xf32>
    %102 = tpu.matmul %99, %101, %cst_114 {dimension_numbers = #tpu.dot_dimension_numbers<[1], [0], [0], [1], [0, 0, 1, 1], [], []>} : vector<7x96xf32>, vector<96x256xf32>, vector<7x256xf32> -> vector<7x256xf32>
    %103 = arith.addf %97, %102 : vector<7x256xf32>
    %c0_115 = arith.constant 0 : index
    %c17_116 = arith.constant 17 : index
    %c0_117 = arith.constant 0 : index
    %104 = vector.load %arg1[%c0_115, %c17_116, %c0_117] : memref<1x32x96xf32, #tpu.memory_space<vmem>>, vector<1x7x96xf32>
    %105 = vector.shape_cast %104 : vector<1x7x96xf32> to vector<7x96xf32>
    %c3_118 = arith.constant 3 : index
    %c0_119 = arith.constant 0 : index
    %c0_120 = arith.constant 0 : index
    %106 = vector.load %arg2[%c3_118, %c0_119, %c0_120] : memref<5x96x256xf32, #tpu.memory_space<vmem>>, vector<1x96x256xf32>
    %107 = vector.shape_cast %106 : vector<1x96x256xf32> to vector<96x256xf32>
    %cst_121 = arith.constant dense<0.000000e+00> : vector<7x256xf32>
    %108 = tpu.matmul %105, %107, %cst_121 {dimension_numbers = #tpu.dot_dimension_numbers<[1], [0], [0], [1], [0, 0, 1, 1], [], []>} : vector<7x96xf32>, vector<96x256xf32>, vector<7x256xf32> -> vector<7x256xf32>
    %109 = arith.addf %103, %108 : vector<7x256xf32>
    %c0_122 = arith.constant 0 : index
    %c25 = arith.constant 25 : index
    %c0_123 = arith.constant 0 : index
    %110 = vector.load %arg1[%c0_122, %c25, %c0_123] : memref<1x32x96xf32, #tpu.memory_space<vmem>>, vector<1x7x96xf32>
    %111 = vector.shape_cast %110 : vector<1x7x96xf32> to vector<7x96xf32>
    %c4_124 = arith.constant 4 : index
    %c0_125 = arith.constant 0 : index
    %c0_126 = arith.constant 0 : index
    %112 = vector.load %arg2[%c4_124, %c0_125, %c0_126] : memref<5x96x256xf32, #tpu.memory_space<vmem>>, vector<1x96x256xf32>
    %113 = vector.shape_cast %112 : vector<1x96x256xf32> to vector<96x256xf32>
    %cst_127 = arith.constant dense<0.000000e+00> : vector<7x256xf32>
    %114 = tpu.matmul %111, %113, %cst_127 {dimension_numbers = #tpu.dot_dimension_numbers<[1], [0], [0], [1], [0, 0, 1, 1], [], []>} : vector<7x96xf32>, vector<96x256xf32>, vector<7x256xf32> -> vector<7x256xf32>
    %115 = arith.addf %109, %114 : vector<7x256xf32>
    %116 = arith.maximumf %28, %57 : vector<7x256xf32>
    %117 = arith.maximumf %86, %115 : vector<7x256xf32>
    %118 = vector.extract_strided_slice %116 {offsets = [0, 0], sizes = [7, 128], strides = [1, 1]} : vector<7x256xf32> to vector<7x128xf32>
    %119 = vector.extract_strided_slice %116 {offsets = [0, 128], sizes = [7, 128], strides = [1, 1]} : vector<7x256xf32> to vector<7x128xf32>
    %120 = arith.maximumf %118, %119 : vector<7x128xf32>
    %c0_128 = arith.constant 0 : index
    %c0_129 = arith.constant 0 : index
    %121 = vector.load %arg3[%c0_128, %c0_129] : memref<1x128xf32, #tpu.memory_space<vmem>>, vector<1x128xf32>
    %122 = vector.broadcast %121 : vector<1x128xf32> to vector<7x128xf32>
    %123 = arith.addf %120, %122 : vector<7x128xf32>
    %cst_130 = arith.constant 0.000000e+00 : f32
    %124 = vector.broadcast %cst_130 : f32 to vector<7x128xf32>
    %125 = arith.maximumf %123, %124 : vector<7x128xf32>
    %c0_131 = arith.constant 0 : index
    %c0_132 = arith.constant 0 : index
    %c0_133 = arith.constant 0 : index
    %126 = vector.load %arg13[%c0_131, %c0_132, %c0_133] : memref<2x7x128xf32, #tpu.memory_space<vmem>>, vector<1x7x128xf32>
    %127 = vector.shape_cast %126 : vector<1x7x128xf32> to vector<7x128xf32>
    %128 = vector.shape_cast %125 : vector<7x128xf32> to vector<1x7x128xf32>
    tpu.vector_store %arg13[%c0_131, %c0_132, %c0_133], %128 {strides = array<i32>} : memref<2x7x128xf32, #tpu.memory_space<vmem>>, vector<1x7x128xf32>,
    %129 = vector.extract_strided_slice %117 {offsets = [0, 0], sizes = [7, 128], strides = [1, 1]} : vector<7x256xf32> to vector<7x128xf32>
    %130 = vector.extract_strided_slice %117 {offsets = [0, 128], sizes = [7, 128], strides = [1, 1]} : vector<7x256xf32> to vector<7x128xf32>
    %131 = arith.maximumf %129, %130 : vector<7x128xf32>
    %c0_134 = arith.constant 0 : index
    %c0_135 = arith.constant 0 : index
    %132 = vector.load %arg3[%c0_134, %c0_135] : memref<1x128xf32, #tpu.memory_space<vmem>>, vector<1x128xf32>
    %133 = vector.broadcast %132 : vector<1x128xf32> to vector<7x128xf32>
    %134 = arith.addf %131, %133 : vector<7x128xf32>
    %cst_136 = arith.constant 0.000000e+00 : f32
    %135 = vector.broadcast %cst_136 : f32 to vector<7x128xf32>
    %136 = arith.maximumf %134, %135 : vector<7x128xf32>
    %c1_137 = arith.constant 1 : index
    %c0_138 = arith.constant 0 : index
    %c0_139 = arith.constant 0 : index
    %137 = vector.load %arg13[%c1_137, %c0_138, %c0_139] : memref<2x7x128xf32, #tpu.memory_space<vmem>>, vector<1x7x128xf32>
    %138 = vector.shape_cast %137 : vector<1x7x128xf32> to vector<7x128xf32>
    %139 = vector.shape_cast %136 : vector<7x128xf32> to vector<1x7x128xf32>
    tpu.vector_store %arg13[%c1_137, %c0_138, %c0_139], %139 {strides = array<i32>} : memref<2x7x128xf32, #tpu.memory_space<vmem>>, vector<1x7x128xf32>,
    %c0_140 = arith.constant 0 : index
    %c0_141 = arith.constant 0 : index
    %c0_142 = arith.constant 0 : index
    %140 = vector.load %arg13[%c0_140, %c0_141, %c0_142] : memref<2x7x128xf32, #tpu.memory_space<vmem>>, vector<1x5x128xf32>
    %141 = vector.shape_cast %140 : vector<1x5x128xf32> to vector<5x128xf32>
    %c0_143 = arith.constant 0 : index
    %c0_144 = arith.constant 0 : index
    %c0_145 = arith.constant 0 : index
    %142 = vector.load %arg4[%c0_143, %c0_144, %c0_145] : memref<5x128x256xf32, #tpu.memory_space<vmem>>, vector<1x128x256xf32>
    %143 = vector.shape_cast %142 : vector<1x128x256xf32> to vector<128x256xf32>
    %cst_146 = arith.constant dense<0.000000e+00> : vector<5x256xf32>
    %144 = tpu.matmul %141, %143, %cst_146 {dimension_numbers = #tpu.dot_dimension_numbers<[1], [0], [0], [1], [0, 0, 1, 1], [], []>} : vector<5x128xf32>, vector<128x256xf32>, vector<5x256xf32> -> vector<5x256xf32>
    %c1_147 = arith.constant 1 : index
    %c0_148 = arith.constant 0 : index
    %c0_149 = arith.constant 0 : index
    %145 = vector.load %arg13[%c1_147, %c0_148, %c0_149] : memref<2x7x128xf32, #tpu.memory_space<vmem>>, vector<1x5x128xf32>
    %146 = vector.shape_cast %145 : vector<1x5x128xf32> to vector<5x128xf32>
    %c0_150 = arith.constant 0 : index
    %c0_151 = arith.constant 0 : index
    %c0_152 = arith.constant 0 : index
    %147 = vector.load %arg4[%c0_150, %c0_151, %c0_152] : memref<5x128x256xf32, #tpu.memory_space<vmem>>, vector<1x128x256xf32>
    %148 = vector.shape_cast %147 : vector<1x128x256xf32> to vector<128x256xf32>
    %cst_153 = arith.constant dense<0.000000e+00> : vector<5x256xf32>
    %149 = tpu.matmul %146, %148, %cst_153 {dimension_numbers = #tpu.dot_dimension_numbers<[1], [0], [0], [1], [0, 0, 1, 1], [], []>} : vector<5x128xf32>, vector<128x256xf32>, vector<5x256xf32> -> vector<5x256xf32>
    %c1_154 = arith.constant 1 : index
    %c0_155 = arith.constant 0 : index
    %c0_156 = arith.constant 0 : index
    %150 = vector.load %arg13[%c1_154, %c0_155, %c0_156] : memref<2x7x128xf32, #tpu.memory_space<vmem>>, vector<1x5x128xf32>
    %151 = vector.shape_cast %150 : vector<1x5x128xf32> to vector<5x128xf32>
    %c1_157 = arith.constant 1 : index
    %c0_158 = arith.constant 0 : index
    %c0_159 = arith.constant 0 : index
    %152 = vector.load %arg4[%c1_157, %c0_158, %c0_159] : memref<5x128x256xf32, #tpu.memory_space<vmem>>, vector<1x128x256xf32>
    %153 = vector.shape_cast %152 : vector<1x128x256xf32> to vector<128x256xf32>
    %cst_160 = arith.constant dense<0.000000e+00> : vector<5x256xf32>
    %154 = tpu.matmul %151, %153, %cst_160 {dimension_numbers = #tpu.dot_dimension_numbers<[1], [0], [0], [1], [0, 0, 1, 1], [], []>} : vector<5x128xf32>, vector<128x256xf32>, vector<5x256xf32> -> vector<5x256xf32>
    %155 = arith.addf %144, %154 : vector<5x256xf32>
    %c0_161 = arith.constant 0 : index
    %c1_162 = arith.constant 1 : index
    %c0_163 = arith.constant 0 : index
    %156 = vector.load %arg13[%c0_161, %c1_162, %c0_163] : memref<2x7x128xf32, #tpu.memory_space<vmem>>, vector<1x5x128xf32>
    %157 = vector.shape_cast %156 : vector<1x5x128xf32> to vector<5x128xf32>
    %c1_164 = arith.constant 1 : index
    %c0_165 = arith.constant 0 : index
    %c0_166 = arith.constant 0 : index
    %158 = vector.load %arg4[%c1_164, %c0_165, %c0_166] : memref<5x128x256xf32, #tpu.memory_space<vmem>>, vector<1x128x256xf32>
    %159 = vector.shape_cast %158 : vector<1x128x256xf32> to vector<128x256xf32>
    %cst_167 = arith.constant dense<0.000000e+00> : vector<5x256xf32>
    %160 = tpu.matmul %157, %159, %cst_167 {dimension_numbers = #tpu.dot_dimension_numbers<[1], [0], [0], [1], [0, 0, 1, 1], [], []>} : vector<5x128xf32>, vector<128x256xf32>, vector<5x256xf32> -> vector<5x256xf32>
    %161 = arith.addf %149, %160 : vector<5x256xf32>
    %c0_168 = arith.constant 0 : index
    %c1_169 = arith.constant 1 : index
    %c0_170 = arith.constant 0 : index
    %162 = vector.load %arg13[%c0_168, %c1_169, %c0_170] : memref<2x7x128xf32, #tpu.memory_space<vmem>>, vector<1x5x128xf32>
    %163 = vector.shape_cast %162 : vector<1x5x128xf32> to vector<5x128xf32>
    %c2_171 = arith.constant 2 : index
    %c0_172 = arith.constant 0 : index
    %c0_173 = arith.constant 0 : index
    %164 = vector.load %arg4[%c2_171, %c0_172, %c0_173] : memref<5x128x256xf32, #tpu.memory_space<vmem>>, vector<1x128x256xf32>
    %165 = vector.shape_cast %164 : vector<1x128x256xf32> to vector<128x256xf32>
    %cst_174 = arith.constant dense<0.000000e+00> : vector<5x256xf32>
    %166 = tpu.matmul %163, %165, %cst_174 {dimension_numbers = #tpu.dot_dimension_numbers<[1], [0], [0], [1], [0, 0, 1, 1], [], []>} : vector<5x128xf32>, vector<128x256xf32>, vector<5x256xf32> -> vector<5x256xf32>
    %167 = arith.addf %155, %166 : vector<5x256xf32>
    %c1_175 = arith.constant 1 : index
    %c1_176 = arith.constant 1 : index
    %c0_177 = arith.constant 0 : index
    %168 = vector.load %arg13[%c1_175, %c1_176, %c0_177] : memref<2x7x128xf32, #tpu.memory_space<vmem>>, vector<1x5x128xf32>
    %169 = vector.shape_cast %168 : vector<1x5x128xf32> to vector<5x128xf32>
    %c2_178 = arith.constant 2 : index
    %c0_179 = arith.constant 0 : index
    %c0_180 = arith.constant 0 : index
    %170 = vector.load %arg4[%c2_178, %c0_179, %c0_180] : memref<5x128x256xf32, #tpu.memory_space<vmem>>, vector<1x128x256xf32>
    %171 = vector.shape_cast %170 : vector<1x128x256xf32> to vector<128x256xf32>
    %cst_181 = arith.constant dense<0.000000e+00> : vector<5x256xf32>
    %172 = tpu.matmul %169, %171, %cst_181 {dimension_numbers = #tpu.dot_dimension_numbers<[1], [0], [0], [1], [0, 0, 1, 1], [], []>} : vector<5x128xf32>, vector<128x256xf32>, vector<5x256xf32> -> vector<5x256xf32>
    %173 = arith.addf %161, %172 : vector<5x256xf32>
    %c1_182 = arith.constant 1 : index
    %c1_183 = arith.constant 1 : index
    %c0_184 = arith.constant 0 : index
    %174 = vector.load %arg13[%c1_182, %c1_183, %c0_184] : memref<2x7x128xf32, #tpu.memory_space<vmem>>, vector<1x5x128xf32>
    %175 = vector.shape_cast %174 : vector<1x5x128xf32> to vector<5x128xf32>
    %c3_185 = arith.constant 3 : index
    %c0_186 = arith.constant 0 : index
    %c0_187 = arith.constant 0 : index
    %176 = vector.load %arg4[%c3_185, %c0_186, %c0_187] : memref<5x128x256xf32, #tpu.memory_space<vmem>>, vector<1x128x256xf32>
    %177 = vector.shape_cast %176 : vector<1x128x256xf32> to vector<128x256xf32>
    %cst_188 = arith.constant dense<0.000000e+00> : vector<5x256xf32>
    %178 = tpu.matmul %175, %177, %cst_188 {dimension_numbers = #tpu.dot_dimension_numbers<[1], [0], [0], [1], [0, 0, 1, 1], [], []>} : vector<5x128xf32>, vector<128x256xf32>, vector<5x256xf32> -> vector<5x256xf32>
    %179 = arith.addf %167, %178 : vector<5x256xf32>
    %c0_189 = arith.constant 0 : index
    %c2_190 = arith.constant 2 : index
    %c0_191 = arith.constant 0 : index
    %180 = vector.load %arg13[%c0_189, %c2_190, %c0_191] : memref<2x7x128xf32, #tpu.memory_space<vmem>>, vector<1x5x128xf32>
    %181 = vector.shape_cast %180 : vector<1x5x128xf32> to vector<5x128xf32>
    %c3_192 = arith.constant 3 : index
    %c0_193 = arith.constant 0 : index
    %c0_194 = arith.constant 0 : index
    %182 = vector.load %arg4[%c3_192, %c0_193, %c0_194] : memref<5x128x256xf32, #tpu.memory_space<vmem>>, vector<1x128x256xf32>
    %183 = vector.shape_cast %182 : vector<1x128x256xf32> to vector<128x256xf32>
    %cst_195 = arith.constant dense<0.000000e+00> : vector<5x256xf32>
    %184 = tpu.matmul %181, %183, %cst_195 {dimension_numbers = #tpu.dot_dimension_numbers<[1], [0], [0], [1], [0, 0, 1, 1], [], []>} : vector<5x128xf32>, vector<128x256xf32>, vector<5x256xf32> -> vector<5x256xf32>
    %185 = arith.addf %173, %184 : vector<5x256xf32>
    %c0_196 = arith.constant 0 : index
    %c2_197 = arith.constant 2 : index
    %c0_198 = arith.constant 0 : index
    %186 = vector.load %arg13[%c0_196, %c2_197, %c0_198] : memref<2x7x128xf32, #tpu.memory_space<vmem>>, vector<1x5x128xf32>
    %187 = vector.shape_cast %186 : vector<1x5x128xf32> to vector<5x128xf32>
    %c4_199 = arith.constant 4 : index
    %c0_200 = arith.constant 0 : index
    %c0_201 = arith.constant 0 : index
    %188 = vector.load %arg4[%c4_199, %c0_200, %c0_201] : memref<5x128x256xf32, #tpu.memory_space<vmem>>, vector<1x128x256xf32>
    %189 = vector.shape_cast %188 : vector<1x128x256xf32> to vector<128x256xf32>
    %cst_202 = arith.constant dense<0.000000e+00> : vector<5x256xf32>
    %190 = tpu.matmul %187, %189, %cst_202 {dimension_numbers = #tpu.dot_dimension_numbers<[1], [0], [0], [1], [0, 0, 1, 1], [], []>} : vector<5x128xf32>, vector<128x256xf32>, vector<5x256xf32> -> vector<5x256xf32>
    %191 = arith.addf %179, %190 : vector<5x256xf32>
    %c1_203 = arith.constant 1 : index
    %c2_204 = arith.constant 2 : index
    %c0_205 = arith.constant 0 : index
    %192 = vector.load %arg13[%c1_203, %c2_204, %c0_205] : memref<2x7x128xf32, #tpu.memory_space<vmem>>, vector<1x5x128xf32>
    %193 = vector.shape_cast %192 : vector<1x5x128xf32> to vector<5x128xf32>
    %c4_206 = arith.constant 4 : index
    %c0_207 = arith.constant 0 : index
    %c0_208 = arith.constant 0 : index
    %194 = vector.load %arg4[%c4_206, %c0_207, %c0_208] : memref<5x128x256xf32, #tpu.memory_space<vmem>>, vector<1x128x256xf32>
    %195 = vector.shape_cast %194 : vector<1x128x256xf32> to vector<128x256xf32>
    %cst_209 = arith.constant dense<0.000000e+00> : vector<5x256xf32>
    %196 = tpu.matmul %193, %195, %cst_209 {dimension_numbers = #tpu.dot_dimension_numbers<[1], [0], [0], [1], [0, 0, 1, 1], [], []>} : vector<5x128xf32>, vector<128x256xf32>, vector<5x256xf32> -> vector<5x256xf32>
    %197 = arith.addf %185, %196 : vector<5x256xf32>
    %198 = arith.maximumf %191, %197 : vector<5x256xf32>
    %199 = vector.extract_strided_slice %198 {offsets = [0, 0], sizes = [5, 128], strides = [1, 1]} : vector<5x256xf32> to vector<5x128xf32>
    %200 = vector.extract_strided_slice %198 {offsets = [0, 128], sizes = [5, 128], strides = [1, 1]} : vector<5x256xf32> to vector<5x128xf32>
    %201 = arith.maximumf %199, %200 : vector<5x128xf32>
    %c0_210 = arith.constant 0 : index
    %c0_211 = arith.constant 0 : index
    %202 = vector.load %arg5[%c0_210, %c0_211] : memref<1x128xf32, #tpu.memory_space<vmem>>, vector<1x128xf32>
    %203 = vector.broadcast %202 : vector<1x128xf32> to vector<5x128xf32>
    %204 = arith.addf %201, %203 : vector<5x128xf32>
    %cst_212 = arith.constant 0.000000e+00 : f32
    %205 = vector.broadcast %cst_212 : f32 to vector<5x128xf32>
    %206 = arith.maximumf %204, %205 : vector<5x128xf32>
    %c0_213 = arith.constant 0 : index
    %c0_214 = arith.constant 0 : index
    %207 = vector.load %arg7[%c0_213, %c0_214] : memref<1x128xf32, #tpu.memory_space<vmem>>, vector<1x128xf32>
    %208 = vector.extract_strided_slice %206 {offsets = [0, 0], sizes = [1, 128], strides = [1, 1]} : vector<5x128xf32> to vector<1x128xf32>
    %c0_215 = arith.constant 0 : index
    %c0_216 = arith.constant 0 : index
    %c0_217 = arith.constant 0 : index
    %209 = vector.load %arg6[%c0_215, %c0_216, %c0_217] : memref<5x128x128xf32, #tpu.memory_space<vmem>>, vector<1x128x128xf32>
    %210 = vector.shape_cast %209 : vector<1x128x128xf32> to vector<128x128xf32>
    %cst_218 = arith.constant dense<0.000000e+00> : vector<1x128xf32>
    %211 = tpu.matmul %208, %210, %cst_218 {dimension_numbers = #tpu.dot_dimension_numbers<[1], [0], [0], [1], [0, 0, 1, 1], [], []>} : vector<1x128xf32>, vector<128x128xf32>, vector<1x128xf32> -> vector<1x128xf32>
    %212 = arith.addf %207, %211 : vector<1x128xf32>
    %213 = vector.extract_strided_slice %206 {offsets = [1, 0], sizes = [1, 128], strides = [1, 1]} : vector<5x128xf32> to vector<1x128xf32>
    %c1_219 = arith.constant 1 : index
    %c0_220 = arith.constant 0 : index
    %c0_221 = arith.constant 0 : index
    %214 = vector.load %arg6[%c1_219, %c0_220, %c0_221] : memref<5x128x128xf32, #tpu.memory_space<vmem>>, vector<1x128x128xf32>
    %215 = vector.shape_cast %214 : vector<1x128x128xf32> to vector<128x128xf32>
    %cst_222 = arith.constant dense<0.000000e+00> : vector<1x128xf32>
    %216 = tpu.matmul %213, %215, %cst_222 {dimension_numbers = #tpu.dot_dimension_numbers<[1], [0], [0], [1], [0, 0, 1, 1], [], []>} : vector<1x128xf32>, vector<128x128xf32>, vector<1x128xf32> -> vector<1x128xf32>
    %217 = arith.addf %212, %216 : vector<1x128xf32>
    %218 = vector.extract_strided_slice %206 {offsets = [2, 0], sizes = [1, 128], strides = [1, 1]} : vector<5x128xf32> to vector<1x128xf32>
    %c2_223 = arith.constant 2 : index
    %c0_224 = arith.constant 0 : index
    %c0_225 = arith.constant 0 : index
    %219 = vector.load %arg6[%c2_223, %c0_224, %c0_225] : memref<5x128x128xf32, #tpu.memory_space<vmem>>, vector<1x128x128xf32>
    %220 = vector.shape_cast %219 : vector<1x128x128xf32> to vector<128x128xf32>
    %cst_226 = arith.constant dense<0.000000e+00> : vector<1x128xf32>
    %221 = tpu.matmul %218, %220, %cst_226 {dimension_numbers = #tpu.dot_dimension_numbers<[1], [0], [0], [1], [0, 0, 1, 1], [], []>} : vector<1x128xf32>, vector<128x128xf32>, vector<1x128xf32> -> vector<1x128xf32>
    %222 = arith.addf %217, %221 : vector<1x128xf32>
    %223 = vector.extract_strided_slice %206 {offsets = [3, 0], sizes = [1, 128], strides = [1, 1]} : vector<5x128xf32> to vector<1x128xf32>
    %c3_227 = arith.constant 3 : index
    %c0_228 = arith.constant 0 : index
    %c0_229 = arith.constant 0 : index
    %224 = vector.load %arg6[%c3_227, %c0_228, %c0_229] : memref<5x128x128xf32, #tpu.memory_space<vmem>>, vector<1x128x128xf32>
    %225 = vector.shape_cast %224 : vector<1x128x128xf32> to vector<128x128xf32>
    %cst_230 = arith.constant dense<0.000000e+00> : vector<1x128xf32>
    %226 = tpu.matmul %223, %225, %cst_230 {dimension_numbers = #tpu.dot_dimension_numbers<[1], [0], [0], [1], [0, 0, 1, 1], [], []>} : vector<1x128xf32>, vector<128x128xf32>, vector<1x128xf32> -> vector<1x128xf32>
    %227 = arith.addf %222, %226 : vector<1x128xf32>
    %228 = vector.extract_strided_slice %206 {offsets = [4, 0], sizes = [1, 128], strides = [1, 1]} : vector<5x128xf32> to vector<1x128xf32>
    %c4_231 = arith.constant 4 : index
    %c0_232 = arith.constant 0 : index
    %c0_233 = arith.constant 0 : index
    %229 = vector.load %arg6[%c4_231, %c0_232, %c0_233] : memref<5x128x128xf32, #tpu.memory_space<vmem>>, vector<1x128x128xf32>
    %230 = vector.shape_cast %229 : vector<1x128x128xf32> to vector<128x128xf32>
    %cst_234 = arith.constant dense<0.000000e+00> : vector<1x128xf32>
    %231 = tpu.matmul %228, %230, %cst_234 {dimension_numbers = #tpu.dot_dimension_numbers<[1], [0], [0], [1], [0, 0, 1, 1], [], []>} : vector<1x128xf32>, vector<128x128xf32>, vector<1x128xf32> -> vector<1x128xf32>
    %232 = arith.addf %227, %231 : vector<1x128xf32>
    %cst_235 = arith.constant 0.000000e+00 : f32
    %233 = vector.broadcast %cst_235 : f32 to vector<1x128xf32>
    %234 = arith.maximumf %232, %233 : vector<1x128xf32>
    %c0_236 = arith.constant 0 : index
    %c0_237 = arith.constant 0 : index
    %235 = vector.load %arg8[%c0_236, %c0_237] : memref<128x128xf32, #tpu.memory_space<vmem>>, vector<128x128xf32>
    %cst_238 = arith.constant dense<0.000000e+00> : vector<1x128xf32>
    %236 = tpu.matmul %234, %235, %cst_238 {dimension_numbers = #tpu.dot_dimension_numbers<[1], [0], [0], [1], [0, 0, 1, 1], [], []>} : vector<1x128xf32>, vector<128x128xf32>, vector<1x128xf32> -> vector<1x128xf32>
    %c0_239 = arith.constant 0 : index
    %c0_240 = arith.constant 0 : index
    %237 = vector.load %arg9[%c0_239, %c0_240] : memref<1x128xf32, #tpu.memory_space<vmem>>, vector<1x128xf32>
    %238 = arith.addf %236, %237 : vector<1x128xf32>
    %cst_241 = arith.constant 0.000000e+00 : f32
    %239 = vector.broadcast %cst_241 : f32 to vector<1x128xf32>
    %240 = arith.maximumf %238, %239 : vector<1x128xf32>
    %c0_242 = arith.constant 0 : index
    %c0_243 = arith.constant 0 : index
    %241 = vector.load %arg10[%c0_242, %c0_243] : memref<128x128xf32, #tpu.memory_space<vmem>>, vector<128x128xf32>
    %cst_244 = arith.constant dense<0.000000e+00> : vector<1x128xf32>
    %242 = tpu.matmul %240, %241, %cst_244 {dimension_numbers = #tpu.dot_dimension_numbers<[1], [0], [0], [1], [0, 0, 1, 1], [], []>} : vector<1x128xf32>, vector<128x128xf32>, vector<1x128xf32> -> vector<1x128xf32>
    %c0_245 = arith.constant 0 : index
    %c0_246 = arith.constant 0 : index
    %243 = vector.load %arg11[%c0_245, %c0_246] : memref<1x128xf32, #tpu.memory_space<vmem>>, vector<1x128xf32>
    %244 = arith.addf %242, %243 : vector<1x128xf32>
    %c0_247 = arith.constant 0 : index
    %c0_248 = arith.constant 0 : index
    %c0_249 = arith.constant 0 : index
    %245 = vector.load %arg12[%c0_247, %c0_248, %c0_249] : memref<1x1x128xf32, #tpu.memory_space<vmem>>, vector<1x1x128xf32>
    %246 = vector.shape_cast %245 : vector<1x1x128xf32> to vector<1x128xf32>
    %247 = vector.shape_cast %244 : vector<1x128xf32> to vector<1x1x128xf32>
    tpu.vector_store %arg12[%c0_247, %c0_248, %c0_249], %247 {strides = array<i32>} : memref<1x1x128xf32, #tpu.memory_space<vmem>>, vector<1x1x128xf32>,
    return
  }
  func.func @transform_0(%arg0: i32) -> (i32, i32, i32) {
    %c0_i32 = arith.constant 0 : i32
    %c0_i32_0 = arith.constant 0 : i32
    %c0_i32_1 = arith.constant 0 : i32
    return %arg0, %c0_i32, %c0_i32_0 : i32, i32, i32
  }
  func.func @transform_1(%arg0: i32) -> (i32, i32, i32) {
    %c0_i32 = arith.constant 0 : i32
    %c0_i32_0 = arith.constant 0 : i32
    %c0_i32_1 = arith.constant 0 : i32
    %c0_i32_2 = arith.constant 0 : i32
    return %c0_i32, %c0_i32_0, %c0_i32_1 : i32, i32, i32
  }
  func.func @transform_2(%arg0: i32) -> (i32, i32) {
    %c0_i32 = arith.constant 0 : i32
    %c0_i32_0 = arith.constant 0 : i32
    %c0_i32_1 = arith.constant 0 : i32
    return %c0_i32, %c0_i32_0 : i32, i32
  }
  func.func @transform_3(%arg0: i32) -> (i32, i32, i32) {
    %c0_i32 = arith.constant 0 : i32
    %c0_i32_0 = arith.constant 0 : i32
    %c0_i32_1 = arith.constant 0 : i32
    %c0_i32_2 = arith.constant 0 : i32
    return %c0_i32, %c0_i32_0, %c0_i32_1 : i32, i32, i32
  }
  func.func @transform_4(%arg0: i32) -> (i32, i32) {
    %c0_i32 = arith.constant 0 : i32
    %c0_i32_0 = arith.constant 0 : i32
    %c0_i32_1 = arith.constant 0 : i32
    return %c0_i32, %c0_i32_0 : i32, i32
  }
  func.func @transform_5(%arg0: i32) -> (i32, i32, i32) {
    %c0_i32 = arith.constant 0 : i32
    %c0_i32_0 = arith.constant 0 : i32
    %c0_i32_1 = arith.constant 0 : i32
    %c0_i32_2 = arith.constant 0 : i32
    return %c0_i32, %c0_i32_0, %c0_i32_1 : i32, i32, i32
  }
  func.func @transform_6(%arg0: i32) -> (i32, i32) {
    %c0_i32 = arith.constant 0 : i32
    %c0_i32_0 = arith.constant 0 : i32
    %c0_i32_1 = arith.constant 0 : i32
    return %c0_i32, %c0_i32_0 : i32, i32
  }
  func.func @transform_7(%arg0: i32) -> (i32, i32) {
    %c0_i32 = arith.constant 0 : i32
    %c0_i32_0 = arith.constant 0 : i32
    %c0_i32_1 = arith.constant 0 : i32
    return %c0_i32, %c0_i32_0 : i32, i32
  }
  func.func @transform_8(%arg0: i32) -> (i32, i32) {
    %c0_i32 = arith.constant 0 : i32
    %c0_i32_0 = arith.constant 0 : i32
    %c0_i32_1 = arith.constant 0 : i32
    return %c0_i32, %c0_i32_0 : i32, i32
  }
  func.func @transform_9(%arg0: i32) -> (i32, i32) {
    %c0_i32 = arith.constant 0 : i32
    %c0_i32_0 = arith.constant 0 : i32
    %c0_i32_1 = arith.constant 0 : i32
    return %c0_i32, %c0_i32_0 : i32, i32
  }
  func.func @transform_10(%arg0: i32) -> (i32, i32) {
    %c0_i32 = arith.constant 0 : i32
    %c0_i32_0 = arith.constant 0 : i32
    %c0_i32_1 = arith.constant 0 : i32
    return %c0_i32, %c0_i32_0 : i32, i32
  }
  func.func @transform_11(%arg0: i32) -> (i32, i32, i32) {
    %c0_i32 = arith.constant 0 : i32
    %c0_i32_0 = arith.constant 0 : i32
    %c0_i32_1 = arith.constant 0 : i32
    return %arg0, %c0_i32, %c0_i32_0 : i32, i32, i32
  }
}

</mosaic_0001>

<bundles_post_ra>
// kernel: net_forward.1
= control target key start
LH: loop header
LB: loop body
LE: loop exit
PB: predicated region body
PF: predicated region fallthrough
CT: control target
= control target key end

     0   :  { %16 = vsyncpa [#allocation4], 0  ;;  %s6811_s0 = inlined_call_operand.vmem [shape: f32[2,32,96], index: 0, kind: input, shape index: {}]   ;;  %s6812_s1 = inlined_call_operand.hbm [shape: f32[5,96,256], index: 1, kind: input, shape index: {}]   ;;  %s6813_s2 = inlined_call_operand.vmem [shape: f32[1,128], index: 2, kind: input, shape index: {}]   ;;  %s6814_s3 = inlined_call_operand.hbm [shape: f32[5,128,256], index: 3, kind: input, shape index: {}]   ;;  %s6815_s4 = inlined_call_operand.vmem [shape: f32[1,128], index: 4, kind: input, shape index: {}]   ;;  %s6816_s5 = inlined_call_operand.vmem [shape: f32[5,128,128], index: 5, kind: input, shape index: {}]   ;;  %s6817_s6 = inlined_call_operand.vmem [shape: f32[1,128], index: 6, kind: input, shape index: {}]   ;;  %s6818_s7 = inlined_call_operand.vmem [shape: f32[128,128], index: 7, kind: input, shape index: {}]   ;;  %s6819_s8 = inlined_call_operand.vmem [shape: f32[1,128], index: 8, kind: input, shape index: {}]   ;;  %s6820_s9 = inlined_call_operand.vmem [shape: f32[128,128], index: 9, kind: input, shape index: {}]   ;;  %s6821_s10 = inlined_call_operand.vmem [shape: f32[1,128], index: 10, kind: input, shape index: {}]   ;;  %s6822_s11 = inlined_call_operand.hbm [shape: f32[2,1,128], index: 11, kind: output, shape index: {}]  }
   0x1   :  { %17 = vsyncpa [#allocation7], 0 }
   0x2   :  { %18 = vsyncpa [#allocation5], 0 }
   0x3   :  { %20 = vsyncpa [#allocation5 + $0x1], 0  ;;  %s5413_s17 = smov 0   ;;  %s5415_s18 = smov 0  }
   0x4   :  { %s5417_s19 = smov 0   ;;  %s5419_s20 = smov 0  }
   0x5 LB: > { %6863 = sst [smem:[#allocation12_spill]] %s5331_s17  ;;  %s5434_s21 = sadd.s32 4294967295, %s5343_s20   ;;  %s5343_s20 = sphi %s5419_s20, %s6934_s20   ;;  %s5339_s19 = sphi %s5417_s19, %s6936_s19   ;;  %s5335_s18 = sphi %s5415_s18, %s6938_s18   ;;  %s5331_s17 = sphi %s5413_s17, %s6937_s17  }
   0x6   : > { %6864 = sst [smem:[#allocation13_spill]] %s5339_s19  ;;  %s3662_s22 = sadd.s32 4294967294, %s5343_s20  }
   0x7   : > { %s5438_s23 = sadd.s32 1, %s5343_s20   ;;  %s269_s24 = sadd.s32 1, %s5339_s19 }
   0x8   : > { %6865 = sst [smem:[#allocation14_spill]] %s5438_s23  ;;  %s266_s25 = ssub.s32 %s5343_s20, %s5438_s23 }
   0x9   : > { %p279_p0 = scmp.ne.s32.totalorder %s5339_s19, %s5335_s18  ;;  %p267_p1 = scmp.eq.s32.totalorder %s266_s25, 0 }
   0xa   : > { %p280_p2 = scmp.eq.s32.totalorder %s5434_s21, 1  ;;  %p285_p3 = scmp.ne.s32.totalorder %s5335_s18, %s5331_s17 }
   0xb   : > { %p286_p4 = scmp.eq.s32.totalorder %s3662_s22, 1  ;;  %p3663_p7 = scmp.ge.s32.totalorder %s5343_s20, 1 }
   0xc   : > { %s5449_s26 = scalar_select %p267_p1, %s5339_s19, %s269_s24  }
   0xd   : > { %p5451_p5 = por %p280_p2, %p279_p0  ;;  %p5455_p6 = por %p286_p4, %p285_p3 }
   0xe   : > { %6866 = sst [smem:[#allocation15_spill]] %s5449_s26  ;;  %p293_p8 = scmp.lt.s32.totalorder %s5343_s20, 3 }
   0xf   : > { %s6867_s27 = scalar_select %p5451_p5, 1, 0 }
  0x10   : > { %s6868_s28 = scalar_select %p5455_p6, 1, 0 }
  0x11   : > { %p6824_p9 = scmp.eq.s32.totalorder %s5434_s21, 0  ;;  %p5462_p10 = pnand %p3663_p7, %p293_p8 }
  0x12   : > { %6869 = sst [smem:[#allocation16_spill]] %s6868_s28  ;;  %s5345_s30 = smov [#allocation3]  }
  0x13   : > { %s6870_s29 = scalar_select %p5462_p10, 1, 0 }
  0x14   : > { %s305_s12 = sshll.u32 %s5345_s30, 4  ;;  %p5162_p11 = pneg %p5462_p10  ;;  %s306_s12 = int_to_ptr.vmem [resolvable:$true] %s305_s12 }
  0x15   : > { %s5346_s14 = smov [#allocation6]   ;;  %s5217_s24 = scalar_lea.hbm %s6812_s1, 15360 }
  0x16   : > { %p5470_p12 = pnand %p6824_p9, %p5162_p11  ;;  %s321_s15 = sshll.u32 %s5346_s14, 4  ;;  %s5474_s15 = int_to_ptr.vmem [resolvable:$true] %s321_s15 }
  0x17   : > { %p5218_p13 = scmp.ne.s32.totalorder %s6812_s1, %s5217_s24  ;;  %p5224_p3 = scmp.lt.u32.totalorder %s5217_s24, %s6812_s1 }
  0x18   : > { %p5219_p0 = pneg %p5470_p12 }
  0x1a   : > { %p5220_p1 = pnand %p5219_p0, %p5218_p13 }
  0x1c   : > { %p5221_p2 = pneg %p5220_p1 }
  0x1e   : > { %p5226_p4 = pnand %p5224_p3, %p5221_p2 }
  0x20   : > { %5229 = shalt.err (!%p5226_p4)
}
  0x21   : > { %s5230_s14 = scalar_lea.vmem %s306_s12, 15360  ;;  %p5238_p9 = scmp.lt.s32.totalorder %s306_s12, %s306_s12 }
  0x22   : > { %p5231_p7 = scmp.ne.s32.totalorder %s306_s12, %s5230_s14  ;;  %p5239_p6 = scmp.lt.s32.totalorder %s5230_s14, %s5230_s14 }
  0x24   : > { %p5233_p8 = pnand %p5231_p7, %p5219_p0  ;;  %p5240_p5 = por %p5239_p6, %p5238_p9 }
  0x26   : > { %p5234_p11 = pneg %p5233_p8 }
  0x28   : > { %p5241_p10 = pnand %p5240_p5, %p5234_p11 }
  0x2a   : > { %5244 = shalt.err (!%p5241_p10)
}
  0x2b   : > { %s5347_s16 = smov 256   ;;  %s5348_s22 = smov 16  }
  0x2c   : > { %5165 = dma.hbm_to_vmem [thread:$0]  (!%p5470_p12), %s6812_s1, 15360, %s306_s12, [#allocation4], %s5347_s16, %s5347_s16, %s5348_s22  }
  0x2d   : > { %s5245_s30 = scalar_lea.hbm %s6814_s3, 20480 }
  0x2e   : > { %p5246_p13 = scmp.ne.s32.totalorder %s6814_s3, %s5245_s30  ;;  %p5252_p9 = scmp.lt.u32.totalorder %s5245_s30, %s6814_s3 }
  0x30   : > { %p5248_p5 = pnand %p5246_p13, %p5219_p0 }
  0x32   : > { %p5249_p6 = pneg %p5248_p5 }
  0x34   : > { %p5254_p10 = pnand %p5252_p9, %p5249_p6 }
  0x36   : > { %5257 = shalt.err (!%p5254_p10)
}
  0x37   : > { %s5258_s12 = scalar_lea.vmem %s5474_s15, 20480  ;;  %p5266_p4 = scmp.lt.s32.totalorder %s5474_s15, %s5474_s15 }
  0x38   : > { %p5259_p1 = scmp.ne.s32.totalorder %s5474_s15, %s5258_s12  ;;  %p5267_p7 = scmp.lt.s32.totalorder %s5258_s12, %s5258_s12 }
  0x3a   : > { %p5261_p2 = pnand %p5259_p1, %p5219_p0  ;;  %p5268_p8 = por %p5267_p7, %p5266_p4 }
  0x3c   : > { %p5262_p3 = pneg %p5261_p2 }
  0x3e   : > { %p5269_p11 = pnand %p5268_p8, %p5262_p3 }
  0x40   : > { %5272 = shalt.err (!%p5269_p11)
}
  0x41   : > { %5168 = dma.hbm_to_vmem [thread:$0]  (!%p5470_p12), %s6814_s3, 20480, %s5474_s15, [#allocation7], %s5347_s16, %s5347_s16, %s5348_s22  }
  0x42   : > { %p6872_p13 = scmp.ne.s32.totalorder %s6870_s29, 0 }
  0x44   : > { %366 = sbr.rel (%p6872_p13) target bundleno = 1748 (0x6d4), region = 64 }
  0x4b   : > { %p6873_p5 = scmp.eq.s32.totalorder %s5434_s21, 0 }
  0x4d   : > { %5318 = dma.done.wait (%p6873_p5), [#allocation4], 15360   ;;  %p6874_p0 = pmov %p6873_p5 }
  0x4f   : > { %5320 = vsyncadd (%p6874_p0), [#allocation4], 4294951936  ;;  %p6875_p6 = pmov %p6874_p0 }
  0x50   : > { %p6876_p9 = pmov %p6874_p0 }
  0x51   : > { %5322 = dma.done.wait (%p6875_p6), [#allocation7], 20480  }
  0x52   : > { %5324 = vsyncadd (%p6876_p9), [#allocation7], 4294946816  ;;  %v6835_v0 = vmov 0.0   ;;  %v442_v1 = vld [vmem:[#allocation3 + $0xc8] sm:$0xff]  ;;  %v444_v2 = vld [vmem:[#allocation3 + $0xd8] sm:$0xff]  ;;  %p409_p12 = scmp.lt.s32.totalorder %s5434_s21, 1 }
  0x53   : > { %533 = vmatprep.mubr.f32.mxu1 %v6835_v0  ;;  %607 = vmatprep.mubr.f32.mxu0 %v6835_v0  ;;  %v416_v3 = vld [vmem:[#allocation3 + $0x8] sm:$0xff]  ;;  %v5535_v4 = vpack.c.bf16 %v444_v2, %v442_v1  ;;  %v418_v5 = vld [vmem:[#allocation3 + $0x18] sm:$0xff]  ;;  %v441_v6 = vld [vmem:[#allocation3 + $0xc0] sm:$0xff]  ;;  %vm465_vm0 = vcmask 785408   ;;  %vm5351_vm1 = vmmov 0   ;;  %s407_s12 = sand.u32 1, %s5335_s18  }
  0x54   : > { %v443_v7 = vld [vmem:[#allocation3 + $0xd0] sm:$0xff]  ;;  %v5537_v8 = vpack.c.bf16 %v418_v5, %v416_v3  ;;  %v415_v10 = vld [vmem:[#allocation3] sm:$0xff]  ;;  %v446_v12 = vld [vmem:[#allocation3 + $0xe8] sm:$0xff]  ;;  %s410_s28 = scalar_select %p409_p12, %s5434_s21, 1 }
  0x55   : > { %v5539_v9 = vpack.c.bf16 %v443_v7, %v441_v6  ;;  %v417_v11 = vld [vmem:[#allocation3 + $0x10] sm:$0xff]  ;;  %4128 = vmatprep.subr.bf16.mxu1 %v5535_v4  ;;  %v448_v14 = vld [vmem:[#allocation3 + $0xf8] sm:$0xff]  ;;  %v420_v15 = vld [vmem:[#allocation3 + $0x28] sm:$0xff]  ;;  %s3573_s19 = scalar_lea.sflag [#allocation5], %s407_s12  ;;  %p6930_p1 = scmp.ne.s32.totalorder %s6867_s27, 0 }
  0x56   : > { %v5542_v13 = vpack.c.bf16 %v417_v11, %v415_v10  ;;  %v422_v16 = vld [vmem:[#allocation3 + $0x38] sm:$0xff]  ;;  %4152 = vmatprep.subr.bf16.mxu0 %v5537_v8  ;;  %v5546_v17 = vpack.c.bf16 %v448_v14, %v446_v12  ;;  %v445_v19 = vld [vmem:[#allocation3 + $0xe0] sm:$0xff]  ;;  %v447_v20 = vld [vmem:[#allocation3 + $0xf0] sm:$0xff]  ;;  %s3762_s29 = sshll.u32 %s410_s28, 5  ;;  %s3759_s28 = sshll.u32 %s5434_s21, 4 }
  0x57   : > { %4130 = vmatpush1.bf16.msra.mxu1 %v5539_v9  ;;  %v5548_v18 = vpack.c.bf16 %v422_v16, %v420_v15  ;;  %v419_v21 = vld [vmem:[#allocation3 + $0x20] sm:$0xff]  ;;  %v5551_v22 = vpack.c.bf16 %v447_v20, %v445_v19  ;;  %v421_v23 = vld [vmem:[#allocation3 + $0x30] sm:$0xff]  ;;  %v450_v24 = vld [vmem:[#allocation3 + $0x108] sm:$0xff]  ;;  %s5611_s16 = scalar_lea.vmem %s6811_s0, %s3762_s29  ;;  %s408_s29 = scalar_lea.vmem [#allocation8], %s407_s12 }
  0x58   : > { %4154 = vmatpush1.bf16.msra.mxu0 %v5542_v13  ;;  %v452_v25 = vld [vmem:[#allocation3 + $0x118] sm:$0xff]  ;;  %4132 = vmatprep.subr.bf16.mxu1 %v5546_v17  ;;  %v5555_v26 = vpack.c.bf16 %v421_v23, %v419_v21  ;;  %v424_v28 = vld [vmem:[#allocation3 + $0x48] sm:$0xff]  ;;  %v449_v30 = vld [vmem:[#allocation3 + $0x100] sm:$0xff]  ;;  %s3585_s13 = sshll.u32 %s408_s29, 4  ;;  %s6769_s22 = scalar_lea.hbm %s6822_s11, %s3759_s28  ;;  %s6771_s13 = int_to_ptr.vmem [resolvable:$true] %s3585_s13 }
  0x59   : > { %4156 = vmatprep.subr.bf16.mxu0 %v5548_v18  ;;  %v5557_v27 = vpack.c.bf16 %v452_v25, %v450_v24  ;;  %v426_v29 = vld [vmem:[#allocation3 + $0x58] sm:$0xff]  ;;  %v451_v32 = vld [vmem:[#allocation3 + $0x110] sm:$0xff]  ;;  %v423_v33 = vld [vmem:[#allocation3 + $0x40] sm:$0xff]  ;;  %s5273_s26 = scalar_lea.vmem %s6771_s13, 16  ;;  %s5352_s21 = smov [#allocation8]  }
  0x5a   : > { %v5559_v31 = vpack.c.bf16 %v426_v29, %v424_v28  ;;  %v425_v34 = vld [vmem:[#allocation3 + $0x50] sm:$0xff]  ;;  %v5562_v35 = vpack.c.bf16 %v451_v32, %v449_v30  ;;  %v454_v36 = vld [vmem:[#allocation3 + $0x128] sm:$0xff]  ;;  %v456_v37 = vld [vmem:[#allocation3 + $0x138] sm:$0xff]  ;;  %p5274_p10 = scmp.ne.s32.totalorder %s6771_s13, %s5273_s26  ;;  %s5277_s24 = sshll.u32 %s5352_s21, 4  ;;  %s5278_s24 = int_to_ptr.vmem [resolvable:$false] %s5277_s24 }
  0x5b   : > { %4134 = vmatpush1.bf16.msra.mxu1 %v5551_v22  ;;  %v428_v38 = vld [vmem:[#allocation3 + $0x68] sm:$0xff]  ;;  %v5566_v39 = vpack.c.bf16 %v425_v34, %v423_v33  ;;  %v5568_v40 = vpack.c.bf16 %v456_v37, %v454_v36  ;;  %v430_v41 = vld [vmem:[#allocation3 + $0x78] sm:$0xff]  ;;  %v453_v42 = vld [vmem:[#allocation3 + $0x120] sm:$0xff]  ;;  %s5279_s25 = scalar_lea.vmem %s5278_s24, 32  ;;  %p5280_p4 = scmp.lt.s32.totalorder %s6771_s13, %s5278_s24 }
  0x5c   : > { %4158 = vmatpush1.bf16.msra.mxu0 %v5555_v26  ;;  %4136 = vmatprep.subr.bf16.mxu1 %v5557_v27  ;;  %v455_v43 = vld [vmem:[#allocation3 + $0x130] sm:$0xff]  ;;  %v5571_v44 = vpack.c.bf16 %v430_v41, %v428_v38  ;;  %v427_v45 = vld [vmem:[#allocation3 + $0x60] sm:$0xff]  ;;  %v458_v47 = vld [vmem:[#allocation3 + $0x148] sm:$0xff]  ;;  %p5275_p2 = pnand %p5274_p10, %p6930_p1  ;;  %p5281_p7 = scmp.lt.s32.totalorder %s5279_s25, %s5273_s26 }
  0x5d   : > { %4160 = vmatprep.subr.bf16.mxu0 %v5559_v31  ;;  %v429_v46 = vld [vmem:[#allocation3 + $0x70] sm:$0xff]  ;;  %v460_v48 = vld [vmem:[#allocation3 + $0x158] sm:$0xff]  ;;  %v432_v49 = vld [vmem:[#allocation3 + $0x88] sm:$0xff]  ;;  %v5575_v51 = vpack.c.bf16 %v455_v43, %v453_v42 }
  0x5e   : > { %v434_v50 = vld [vmem:[#allocation3 + $0x98] sm:$0xff]  ;;  %v5579_v52 = vpack.c.bf16 %v429_v46, %v427_v45  ;;  %v5581_v53 = vpack.c.bf16 %v460_v48, %v458_v47  ;;  %v457_v54 = vld [vmem:[#allocation3 + $0x140] sm:$0xff]  ;;  %v459_v55 = vld [vmem:[#allocation3 + $0x150] sm:$0xff]  ;;  %p5276_p3 = pneg %p5275_p2  ;;  %p5282_p8 = por %p5281_p7, %p5280_p4 }
  0x5f   : > { %4138 = vmatpush1.bf16.msra.mxu1 %v5562_v35  ;;  %v431_v56 = vld [vmem:[#allocation3 + $0x80] sm:$0xff]  ;;  %v5584_v57 = vpack.c.bf16 %v434_v50, %v432_v49  ;;  %v433_v58 = vld [vmem:[#allocation3 + $0x90] sm:$0xff]  ;;  %v462_v59 = vld [vmem:[#allocation3 + $0x168] sm:$0xff]  ;;  %v5590_v63 = vpack.c.bf16 %v459_v55, %v457_v54 }
  0x60   : > { %4162 = vmatpush1.bf16.msra.mxu0 %v5566_v39  ;;  %4140 = vmatprep.subr.bf16.mxu1 %v5568_v40  ;;  %v464_v60 = vld [vmem:[#allocation3 + $0x178] sm:$0xff]  ;;  %v436_v61 = vld [vmem:[#allocation3 + $0xa8] sm:$0xff]  ;;  %v5594_v1 = vpack.c.bf16 %v433_v58, %v431_v56  ;;  %v461_v3 = vld [vmem:[#allocation3 + $0x160] sm:$0xff]  ;;  %p5283_p11 = pnand %p5282_p8, %p5276_p3 }
  0x61   : > { %4164 = vmatprep.subr.bf16.mxu0 %v5571_v44  ;;  %v438_v62 = vld [vmem:[#allocation3 + $0xb8] sm:$0xff]  ;;  %v5596_v2 = vpack.c.bf16 %v464_v60, %v462_v59  ;;  %v463_v5 = vld [vmem:[#allocation3 + $0x170] sm:$0xff]  ;;  %v435_v7 = vld [vmem:[#allocation3 + $0xa0] sm:$0xff] }
  0x62   : > { %v5599_v6 = vpack.c.bf16 %v438_v62, %v436_v61  ;;  %v437_v10 = vld [vmem:[#allocation3 + $0xb0] sm:$0xff]  ;;  %v617_v11 = vld [vmem:[#allocation3 + $0x188] sm:$0xff]  ;;  %v619_v12 = vld [vmem:[#allocation3 + $0x198] sm:$0xff]  ;;  %v5602_v14 = vpack.c.bf16 %v463_v5, %v461_v3 }
  0x63   : > { %4142 = vmatpush1.bf16.msra.mxu1 %v5575_v51  ;;  %v5606_v15 = vpack.c.bf16 %v437_v10, %v435_v7  ;;  %v5614_v16 = vpack.c.bf16 %v619_v12, %v617_v11  ;;  %v616_v19 = vld [vmem:[#allocation3 + $0x180] sm:$0xff]  ;;  %v618_v20 = vld [vmem:[#allocation3 + $0x190] sm:$0xff]  ;;  %v621_v21 = vld [vmem:[#allocation3 + $0x1a8] sm:$0xff] }
  0x64   : > { %4166 = vmatpush1.bf16.msra.mxu0 %v5579_v52  ;;  %4144 = vmatprep.subr.bf16.mxu1 %v5581_v53  ;;  %v623_v23 = vld [vmem:[#allocation3 + $0x1b8] sm:$0xff]  ;;  %v414_v25 = vld [vmem:[%s5611_s16] sm:$0x7f]  ;;  %v5623_v28 = vpack.c.bf16 %v618_v20, %v616_v19  ;;  %v620_v30 = vld [vmem:[#allocation3 + $0x1a0] sm:$0xff] }
  0x65   : > { %4168 = vmatprep.subr.bf16.mxu0 %v5584_v57  ;;  %v5618_v24 = vld [vmem:[%s5611_s16 + $0x8] sm:$0x7f]  ;;  %v5626_v29 = vpack.c.bf16 %v623_v23, %v621_v21  ;;  %v622_v32 = vld [vmem:[#allocation3 + $0x1b0] sm:$0xff]  ;;  %v625_v33 = vld [vmem:[#allocation3 + $0x1c8] sm:$0xff] }
  0x66   : > { %6877 = vst [vmem:[#allocation17_spill] sm:$0xff] %v5623_v28  ;;  %v627_v34 = vld [vmem:[#allocation3 + $0x1d8] sm:$0xff]  ;;  %v5634_v36 = vpack.c.bf16 %v622_v32, %v620_v30  ;;  %v624_v38 = vld [vmem:[#allocation3 + $0x1c0] sm:$0xff]  ;;  %v626_v41 = vld [vmem:[#allocation3 + $0x1d0] sm:$0xff] }
  0x67   : > { %4146 = vmatpush1.bf16.msra.mxu1 %v5590_v63  ;;  %6878 = vst [vmem:[#allocation18_spill] sm:$0xff] %v5626_v29  ;;  %v5637_v37 = vpack.c.bf16 %v627_v34, %v625_v33  ;;  %v629_v42 = vld [vmem:[#allocation3 + $0x1e8] sm:$0xff]  ;;  %v631_v43 = vld [vmem:[#allocation3 + $0x1f8] sm:$0xff]  ;;  %v5644_v45 = vpack.c.bf16 %v626_v41, %v624_v38  ;;  %v628_v47 = vld [vmem:[#allocation3 + $0x1e0] sm:$0xff] }
  0x68   : > { %4170 = vmatpush1.bf16.msra.mxu0 %v5594_v1  ;;  %4148 = vmatprep.subr.bf16.mxu1 %v5596_v2  ;;  %v5647_v46 = vpack.c.bf16 %v631_v43, %v629_v42  ;;  %v630_v48 = vld [vmem:[#allocation3 + $0x1f0] sm:$0xff]  ;;  %v633_v49 = vld [vmem:[#allocation3 + $0x208] sm:$0xff]  ;;  %v635_v50 = vld [vmem:[#allocation3 + $0x218] sm:$0xff] }
  0x69   : > { %4172 = vmatprep.subr.bf16.mxu0 %v5599_v6  ;;  %6879 = vst [vmem:[#allocation19_spill] sm:$0xff] %v5637_v37  ;;  %6880 = vst [vmem:[#allocation20_spill] sm:$0xff] %v5644_v45  ;;  %v5652_v54 = vpack.c.bf16 %v630_v48, %v628_v47  ;;  %v5655_v55 = vpack.c.bf16 %v635_v50, %v633_v49  ;;  %v632_v56 = vld [vmem:[#allocation3 + $0x200] sm:$0xff]  ;;  %v634_v58 = vld [vmem:[#allocation3 + $0x210] sm:$0xff] }
  0x6a   : > { %v637_v59 = vld [vmem:[#allocation3 + $0x228] sm:$0xff]  ;;  %v639_v60 = vld [vmem:[#allocation3 + $0x238] sm:$0xff]  ;;  %v5660_v61 = vpack.c.bf16 %v634_v58, %v632_v56  ;;  %v636_v3 = vld [vmem:[#allocation3 + $0x220] sm:$0xff] }
  0x6b   : > { %4150 = vmatpush1.bf16.msra.mxu1 %v5602_v14  ;;  %v5663_v62 = vpack.c.bf16 %v639_v60, %v637_v59  ;;  %v638_v5 = vld [vmem:[#allocation3 + $0x230] sm:$0xff]  ;;  %v719_v7 = vld [vmem:[#allocation3 + $0x248] sm:$0xff]  ;;  %v721_v10 = vld [vmem:[#allocation3 + $0x258] sm:$0xff] }
  0x6c   : > { %4174 = vmatpush1.bf16.msra.mxu0 %v5606_v15  ;;  %4248 = vmatprep.subr.bf16.mxu1 %v5535_v4  ;;  %v5668_v11 = vpack.c.bf16 %v638_v5, %v636_v3  ;;  %v5671_v12 = vpack.c.bf16 %v721_v10, %v719_v7  ;;  %v718_v19 = vld [vmem:[#allocation3 + $0x240] sm:$0xff]  ;;  %v720_v20 = vld [vmem:[#allocation3 + $0x250] sm:$0xff]  ;;  %v723_v21 = vld [vmem:[#allocation3 + $0x268] sm:$0xff] }
  0x6d   : > { %4176 = vmatprep.subr.bf16.mxu0 %v5614_v16  ;;  %v725_v23 = vld [vmem:[#allocation3 + $0x278] sm:$0xff]  ;;  %v5679_v30 = vpack.c.bf16 %v720_v20, %v718_v19  ;;  %v722_v33 = vld [vmem:[#allocation3 + $0x260] sm:$0xff]  ;;  %v724_v34 = vld [vmem:[#allocation3 + $0x270] sm:$0xff] }
  0x6e   : > { %3672 = vmatmul.mubr.msk.f32.vlgmr.msra.gmra.mrb[0].mxu1 %vm465_vm0, %v5618_v24  ;;  %v5682_v32 = vpack.c.bf16 %v725_v23, %v723_v21  ;;  %v727_v38 = vld [vmem:[#allocation3 + $0x288] sm:$0xff]  ;;  %v729_v41 = vld [vmem:[#allocation3 + $0x298] sm:$0xff]  ;;  %v5691_v42 = vpack.c.bf16 %v724_v34, %v722_v33  ;;  %v726_v47 = vld [vmem:[#allocation3 + $0x280] sm:$0xff] }
  0x6f   : > { %3673 = vmatmul.mubr.msk.f32.vlgmr.msra.gmra.mrb[0].mxu0 %vm465_vm0, %v414_v25  ;;  %4250 = vmatpush1.bf16.msra.mxu1 %v5539_v9  ;;  %v5675_v25 = vld [vmem:[%s5611_s16 + $0x10] sm:$0x7f]  ;;  %v5694_v43 = vpack.c.bf16 %v729_v41, %v727_v38  ;;  %v728_v48 = vld [vmem:[#allocation3 + $0x290] sm:$0xff]  ;;  %v731_v49 = vld [vmem:[#allocation3 + $0x2a8] sm:$0xff] }
  0x70   : > { %4178 = vmatpush1.bf16.msra.mxu0 %v5623_v28  ;;  %4252 = vmatprep.subr.bf16.mxu1 %v5546_v17  ;;  %v733_v50 = vld [vmem:[#allocation3 + $0x2b8] sm:$0xff]  ;;  %v5701_v56 = vpack.c.bf16 %v728_v48, %v726_v47  ;;  %v730_v59 = vld [vmem:[#allocation3 + $0x2a0] sm:$0xff]  ;;  %v732_v60 = vld [vmem:[#allocation3 + $0x2b0] sm:$0xff] }
  0x71   : > { %4180 = vmatprep.subr.bf16.mxu0 %v5626_v29  ;;  %707 = vmatprep.mubr.f32.mxu0 %v6835_v0  ;;  %v5704_v58 = vpack.c.bf16 %v733_v50, %v731_v49  ;;  %v735_v3 = vld [vmem:[#allocation3 + $0x2c8] sm:$0xff]  ;;  %v737_v5 = vld [vmem:[#allocation3 + $0x2d8] sm:$0xff]  ;;  %v5709_v7 = vpack.c.bf16 %v732_v60, %v730_v59  ;;  %v734_v19 = vld [vmem:[#allocation3 + $0x2c0] sm:$0xff] }
  0x72   : > { %984 = vmatprep.mubr.f32.mxu1 %v6835_v0  ;;  %v5712_v10 = vpack.c.bf16 %v737_v5, %v735_v3  ;;  %v736_v20 = vld [vmem:[#allocation3 + $0x2d0] sm:$0xff]  ;;  %v739_v21 = vld [vmem:[#allocation3 + $0x2e8] sm:$0xff]  ;;  %v741_v23 = vld [vmem:[#allocation3 + $0x2f8] sm:$0xff] }
  0x73   : > { %4254 = vmatpush1.bf16.msra.mxu1 %v5551_v22  ;;  %v5717_v33 = vpack.c.bf16 %v736_v20, %v734_v19  ;;  %v5720_v34 = vpack.c.bf16 %v741_v23, %v739_v21  ;;  %v738_v38 = vld [vmem:[#allocation3 + $0x2e0] sm:$0xff]  ;;  %v740_v41 = vld [vmem:[#allocation3 + $0x2f0] sm:$0xff]  ;;  %v821_v47 = vld [vmem:[#allocation3 + $0x308] sm:$0xff] }
  0x74   : > { %4182 = vmatpush1.bf16.msra.mxu0 %v5634_v36  ;;  %4256 = vmatprep.subr.bf16.mxu1 %v5557_v27  ;;  %v823_v48 = vld [vmem:[#allocation3 + $0x318] sm:$0xff]  ;;  %v5725_v49 = vpack.c.bf16 %v740_v41, %v738_v38  ;;  %v820_v59 = vld [vmem:[#allocation3 + $0x300] sm:$0xff]  ;;  %v822_v60 = vld [vmem:[#allocation3 + $0x310] sm:$0xff] }
  0x75   : > { %4184 = vmatprep.subr.bf16.mxu0 %v5637_v37  ;;  %v5728_v50 = vpack.c.bf16 %v823_v48, %v821_v47  ;;  %v825_v3 = vld [vmem:[#allocation3 + $0x328] sm:$0xff]  ;;  %v827_v5 = vld [vmem:[#allocation3 + $0x338] sm:$0xff]  ;;  %v5736_v20 = vpack.c.bf16 %v822_v60, %v820_v59  ;;  %v824_v23 = vld [vmem:[#allocation3 + $0x320] sm:$0xff] }
  0x76   : > { %v5734_v19 = vld [vmem:[%s5611_s16 + $0x18] sm:$0x7f]  ;;  %v5739_v21 = vpack.c.bf16 %v827_v5, %v825_v3  ;;  %v826_v38 = vld [vmem:[#allocation3 + $0x330] sm:$0xff]  ;;  %v831_v47 = vld [vmem:[#allocation3 + $0x358] sm:$0xff] }
  0x77   : > { %4258 = vmatpush1.bf16.msra.mxu1 %v5562_v35  ;;  %v829_v41 = vld [vmem:[#allocation3 + $0x348] sm:$0xff]  ;;  %v5748_v48 = vpack.c.bf16 %v826_v38, %v824_v23  ;;  %v828_v60 = vld [vmem:[#allocation3 + $0x340] sm:$0xff]  ;;  %v830_v3 = vld [vmem:[#allocation3 + $0x350] sm:$0xff] }
  0x78   : > { %4186 = vmatpush1.bf16.msra.mxu0 %v5644_v45  ;;  %4260 = vmatprep.subr.bf16.mxu1 %v5568_v40  ;;  %v5751_v59 = vpack.c.bf16 %v831_v47, %v829_v41  ;;  %v835_v5 = vld [vmem:[#allocation3 + $0x378] sm:$0xff]  ;;  %v5758_v23 = vpack.c.bf16 %v830_v3, %v828_v60  ;;  %v832_v41 = vld [vmem:[#allocation3 + $0x360] sm:$0xff]  ;;  %v834_v47 = vld [vmem:[#allocation3 + $0x370] sm:$0xff] }
  0x79   : > { %4188 = vmatprep.subr.bf16.mxu0 %v5647_v46  ;;  %v836_v3 = vld [vmem:[#allocation3 + $0x380] sm:$0xff] }
  0x7b   : > { %4262 = vmatpush1.bf16.msra.mxu1 %v5575_v51 }
  0x7c   : > { %4190 = vmatpush1.bf16.msra.mxu0 %v5652_v54  ;;  %4264 = vmatprep.subr.bf16.mxu1 %v5581_v53 }
  0x7d   : > { %4192 = vmatprep.subr.bf16.mxu0 %v5655_v55 }
  0x7f   : > { %4266 = vmatpush1.bf16.msra.mxu1 %v5590_v63 }
  0x80   : > { %4194 = vmatpush1.bf16.msra.mxu0 %v5660_v61  ;;  %4268 = vmatprep.subr.bf16.mxu1 %v5596_v2 }
  0x81   : > { %4196 = vmatprep.subr.bf16.mxu0 %v5663_v62 }
  0x83   : > { %4270 = vmatpush1.bf16.msra.mxu1 %v5602_v14 }
  0x84   : > { %4198 = vmatpush1.bf16.msra.mxu0 %v5668_v11  ;;  %4272 = vmatprep.subr.bf16.mxu1 %v5537_v8 }
  0x85   : > { %4200 = vmatprep.subr.bf16.mxu0 %v5671_v12 }
  0x86   : > { %3677 = vmatmul.mubr.msk.f32.vlgmr.msra.gmra.mrb[2].mxu1 %vm465_vm0, %v5675_v25 }
  0x87   : > { %3674 = vmatmul.mubr.msk.f32.vlgmr.msra.gmra.mrb[0].mxu0 %vm465_vm0, %v5675_v25  ;;  %4274 = vmatpush1.bf16.msra.mxu1 %v5542_v13 }
  0x88   : > { %4202 = vmatpush1.bf16.msra.mxu0 %v5679_v30  ;;  %4276 = vmatprep.subr.bf16.mxu1 %v5548_v18 }
  0x89   : > { %4204 = vmatprep.subr.bf16.mxu0 %v5682_v32  ;;  %809 = vmatprep.mubr.f32.mxu0 %v6835_v0 }
  0x8a   : > { %1055 = vmatprep.mubr.f32.mxu1 %v6835_v0 }
  0x8b   : > { %4278 = vmatpush1.bf16.msra.mxu1 %v5555_v26 }
  0x8c   : > { %4206 = vmatpush1.bf16.msra.mxu0 %v5691_v42  ;;  %4280 = vmatprep.subr.bf16.mxu1 %v5559_v31 }
  0x8d   : > { %4208 = vmatprep.subr.bf16.mxu0 %v5694_v43 }
  0x8f   : > { %4282 = vmatpush1.bf16.msra.mxu1 %v5566_v39 }
  0x90   : > { %4210 = vmatpush1.bf16.msra.mxu0 %v5701_v56  ;;  %4284 = vmatprep.subr.bf16.mxu1 %v5571_v44 }
  0x91   : > { %4212 = vmatprep.subr.bf16.mxu0 %v5704_v58 }
  0x93   : > { %4286 = vmatpush1.bf16.msra.mxu1 %v5579_v52 }
  0x94   : > { %4214 = vmatpush1.bf16.msra.mxu0 %v5709_v7  ;;  %4288 = vmatprep.subr.bf16.mxu1 %v5584_v57 }
  0x95   : > { %4216 = vmatprep.subr.bf16.mxu0 %v5712_v10 }
  0x97   : > { %4290 = vmatpush1.bf16.msra.mxu1 %v5594_v1 }
  0x98   : > { %4218 = vmatpush1.bf16.msra.mxu0 %v5717_v33  ;;  %4292 = vmatprep.subr.bf16.mxu1 %v5599_v6 }
  0x99   : > { %4220 = vmatprep.subr.bf16.mxu0 %v5720_v34 }
  0x9b   : > { %4294 = vmatpush1.bf16.msra.mxu1 %v5606_v15 }
  0x9c   : > { %4222 = vmatpush1.bf16.msra.mxu0 %v5725_v49  ;;  %4296 = vmatprep.subr.bf16.mxu1 %v5614_v16 }
  0x9d   : > { %4224 = vmatprep.subr.bf16.mxu0 %v5728_v50 }
  0x9e   : > { %3678 = vmatmul.mubr.msk.f32.vlgmr.msra.gmra.mrb[2].mxu1 %vm465_vm0, %v5618_v24  ;;  %v833_v24 = vld [vmem:[#allocation3 + $0x368] sm:$0xff] }
  0x9f   : > { %3675 = vmatmul.mubr.msk.f32.vlgmr.msra.gmra.mrb[0].mxu0 %vm465_vm0, %v5734_v19  ;;  %4298 = vmatpush1.bf16.msra.mxu1 %v5623_v28  ;;  %v5761_v38 = vpack.c.bf16 %v835_v5, %v833_v24  ;;  %v839_v28 = vld [vmem:[#allocation3 + $0x398] sm:$0xff]  ;;  %v841_v24 = vld [vmem:[#allocation3 + $0x3a8] sm:$0xff] }
  0xa0   : > { %4226 = vmatpush1.bf16.msra.mxu0 %v5736_v20  ;;  %4300 = vmatprep.subr.bf16.mxu1 %v5626_v29  ;;  %v837_v29 = vld [vmem:[#allocation3 + $0x388] sm:$0xff]  ;;  %v843_v5 = vld [vmem:[#allocation3 + $0x3b8] sm:$0xff] }
  0xa1   : > { %4228 = vmatprep.subr.bf16.mxu0 %v5739_v21  ;;  %911 = vmatprep.mubr.f32.mxu0 %v6835_v0  ;;  %v5769_v60 = vpack.c.bf16 %v839_v28, %v837_v29  ;;  %v842_v28 = vld [vmem:[#allocation3 + $0x3b0] sm:$0xff] }
  0xa2   : > { %1126 = vmatprep.mubr.f32.mxu1 %v6835_v0  ;;  %v5766_v0 = vpack.c.bf16 %v834_v47, %v832_v41  ;;  %v5777_v41 = vpack.c.bf16 %v843_v5, %v841_v24  ;;  %v840_v47 = vld [vmem:[#allocation3 + $0x3a0] sm:$0xff]  ;;  %v5850_v24 = vld [vmem:[%s5611_s16 + $0x9] sm:$0x7f] }
  0xa3   : > { %4302 = vmatpush1.bf16.msra.mxu1 %v5634_v36  ;;  %v5782_v29 = vpack.c.bf16 %v842_v28, %v840_v47  ;;  %v6882_v5 = vld [vmem:[#allocation17_spill] sm:$0xff]  ;;  %v6883_v47 = vld [vmem:[#allocation18_spill] sm:$0xff] }
  0xa4   : > { %4230 = vmatpush1.bf16.msra.mxu0 %v5748_v48  ;;  %4304 = vmatprep.subr.bf16.mxu1 %v5637_v37  ;;  %v838_v37 = vld [vmem:[#allocation3 + $0x390] sm:$0xff] }
  0xa5   : > { %4232 = vmatprep.subr.bf16.mxu0 %v5751_v59 }
  0xa7   : > { %4306 = vmatpush1.bf16.msra.mxu1 %v5644_v45  ;;  %v5774_v45 = vpack.c.bf16 %v838_v37, %v836_v3  ;;  %v5788_v37 = vld [vmem:[%s5611_s16 + $0x1] sm:$0x7f]  ;;  %v6881_v3 = vmov 0.0  }
  0xa8   : > { %4234 = vmatpush1.bf16.msra.mxu0 %v5758_v23  ;;  %4308 = vmatprep.subr.bf16.mxu1 %v5647_v46 }
  0xa9   : > { %4236 = vmatprep.subr.bf16.mxu0 %v5761_v38 }
  0xab   : > { %4310 = vmatpush1.bf16.msra.mxu1 %v5652_v54 }
  0xac   : > { %4238 = vmatpush1.bf16.msra.mxu0 %v5766_v0  ;;  %4312 = vmatprep.subr.bf16.mxu1 %v5655_v55 }
  0xad   : > { %4240 = vmatprep.subr.bf16.mxu0 %v5769_v60 }
  0xaf   : > { %4314 = vmatpush1.bf16.msra.mxu1 %v5660_v61 }
  0xb0   : > { %4242 = vmatpush1.bf16.msra.mxu0 %v5774_v45  ;;  %4316 = vmatprep.subr.bf16.mxu1 %v5663_v62 }
  0xb1   : > { %4244 = vmatprep.subr.bf16.mxu0 %v5777_v41 }
  0xb3   : > { %4318 = vmatpush1.bf16.msra.mxu1 %v5668_v11 }
  0xb4   : > { %4246 = vmatpush1.bf16.msra.mxu0 %v5782_v29  ;;  %4320 = vmatprep.subr.bf16.mxu1 %v5671_v12 }
  0xb5   : > { %4368 = vmatprep.subr.bf16.mxu0 %v5535_v4 }
  0xb6   : > { %3679 = vmatmul.mubr.msk.f32.vlgmr.msra.gmra.mrb[2].mxu1 %vm465_vm0, %v5734_v19 }
  0xb7   : > { %3676 = vmatmul.mubr.msk.f32.vlgmr.msra.gmra.mrb[0].mxu0 %vm465_vm0, %v5788_v37  ;;  %4322 = vmatpush1.bf16.msra.mxu1 %v5679_v30 }
  0xb8   : > { %4370 = vmatpush1.bf16.msra.mxu0 %v5539_v9  ;;  %4324 = vmatprep.subr.bf16.mxu1 %v5682_v32 }
  0xb9   : > { %4372 = vmatprep.subr.bf16.mxu0 %v5546_v17  ;;  %1199 = vmatprep.mubr.f32.mxu1 %v6881_v3 }
  0xba   : > { %1349 = vmatprep.mubr.f32.mxu0 %v6881_v3 }
  0xbb   : > { %4326 = vmatpush1.bf16.msra.mxu1 %v5691_v42 }
  0xbc   : > { %4374 = vmatpush1.bf16.msra.mxu0 %v5551_v22  ;;  %4328 = vmatprep.subr.bf16.mxu1 %v5694_v43 }
  0xbd   : > { %4376 = vmatprep.subr.bf16.mxu0 %v5557_v27 }
  0xbf   : > { %4330 = vmatpush1.bf16.msra.mxu1 %v5701_v56 }
  0xc0   : > { %4378 = vmatpush1.bf16.msra.mxu0 %v5562_v35  ;;  %4332 = vmatprep.subr.bf16.mxu1 %v5704_v58 }
  0xc1   : > { %4380 = vmatprep.subr.bf16.mxu0 %v5568_v40 }
  0xc3   : > { %4334 = vmatpush1.bf16.msra.mxu1 %v5709_v7 }
  0xc4   : > { %4382 = vmatpush1.bf16.msra.mxu0 %v5575_v51  ;;  %4336 = vmatprep.subr.bf16.mxu1 %v5712_v10 }
  0xc5   : > { %4384 = vmatprep.subr.bf16.mxu0 %v5581_v53 }
  0xc7   : > { %4338 = vmatpush1.bf16.msra.mxu1 %v5717_v33 }
  0xc8   : > { %4386 = vmatpush1.bf16.msra.mxu0 %v5590_v63  ;;  %4340 = vmatprep.subr.bf16.mxu1 %v5720_v34 }
  0xc9   : > { %4388 = vmatprep.subr.bf16.mxu0 %v5596_v2 }
  0xcb   : > { %4342 = vmatpush1.bf16.msra.mxu1 %v5725_v49 }
  0xcc   : > { %4390 = vmatpush1.bf16.msra.mxu0 %v5602_v14  ;;  %4344 = vmatprep.subr.bf16.mxu1 %v5728_v50 }
  0xcd   : > { %4392 = vmatprep.subr.bf16.mxu0 %v5537_v8 }
  0xce   : > { %3680 = vmatmul.mubr.msk.f32.vlgmr.msra.gmra.mrb[2].mxu1 %vm465_vm0, %v5788_v37 }
  0xcf   : > { %4346 = vmatpush1.bf16.msra.mxu1 %v5736_v20  ;;  %3682 = vmatmul.mubr.msk.f32.vlgmr.msra.gmra.mrb[2].mxu0 %vm465_vm0, %v5734_v19 }
  0xd0   : > { %4394 = vmatpush1.bf16.msra.mxu0 %v5542_v13  ;;  %4348 = vmatprep.subr.bf16.mxu1 %v5739_v21 }
  0xd1   : > { %4396 = vmatprep.subr.bf16.mxu0 %v5548_v18  ;;  %1276 = vmatprep.mubr.f32.mxu1 %v6881_v3 }
  0xd2   : > { %1420 = vmatprep.mubr.f32.mxu0 %v6881_v3 }
  0xd3   : > { %4350 = vmatpush1.bf16.msra.mxu1 %v5748_v48 }
  0xd4   : > { %4398 = vmatpush1.bf16.msra.mxu0 %v5555_v26  ;;  %4352 = vmatprep.subr.bf16.mxu1 %v5751_v59 }
  0xd5   : > { %4400 = vmatprep.subr.bf16.mxu0 %v5559_v31 }
  0xd7   : > { %4354 = vmatpush1.bf16.msra.mxu1 %v5758_v23 }
  0xd8   : > { %4402 = vmatpush1.bf16.msra.mxu0 %v5566_v39  ;;  %4356 = vmatprep.subr.bf16.mxu1 %v5761_v38 }
  0xd9   : > { %4404 = vmatprep.subr.bf16.mxu0 %v5571_v44 }
  0xdb   : > { %4358 = vmatpush1.bf16.msra.mxu1 %v5766_v0 }
  0xdc   : > { %4406 = vmatpush1.bf16.msra.mxu0 %v5579_v52  ;;  %4360 = vmatprep.subr.bf16.mxu1 %v5769_v60 }
  0xdd   : > { %4408 = vmatprep.subr.bf16.mxu0 %v5584_v57 }
  0xdf   : > { %4362 = vmatpush1.bf16.msra.mxu1 %v5774_v45 }
  0xe0   : > { %4410 = vmatpush1.bf16.msra.mxu0 %v5594_v1  ;;  %4364 = vmatprep.subr.bf16.mxu1 %v5777_v41 }
  0xe1   : > { %4412 = vmatprep.subr.bf16.mxu0 %v5599_v6 }
  0xe3   : > { %4366 = vmatpush1.bf16.msra.mxu1 %v5782_v29 }
  0xe4   : > { %4414 = vmatpush1.bf16.msra.mxu0 %v5606_v15  ;;  %4488 = vmatprep.subr.bf16.mxu1 %v5535_v4  ;;  %v6884_v4 = vld [vmem:[#allocation19_spill] sm:$0xff] }
  0xe5   : > { %4416 = vmatprep.subr.bf16.mxu0 %v5614_v16 }
  0xe6   : > { %3681 = vmatmul.mubr.msk.f32.vlgmr.msra.gmra.mrb[2].mxu1 %vm465_vm0, %v5850_v24 }
  0xe7   : > { %3683 = vmatmul.mubr.msk.f32.vlgmr.msra.gmra.mrb[2].mxu0 %vm465_vm0, %v5675_v25  ;;  %4490 = vmatpush1.bf16.msra.mxu1 %v5539_v9  ;;  %v6885_v9 = vld [vmem:[#allocation20_spill] sm:$0xff] }
  0xe8   : > { %4418 = vmatpush1.bf16.msra.mxu0 %v6882_v5  ;;  %4492 = vmatprep.subr.bf16.mxu1 %v5546_v17  ;;  %v2066_v25 = vld [vmem:[#allocation6 + $0xb8] sm:$0xff] }
  0xe9   : > { %4420 = vmatprep.subr.bf16.mxu0 %v6883_v47  ;;  %1491 = vmatprep.mubr.f32.mxu0 %v6881_v3 }
  0xea   : > { %1714 = vmatprep.mubr.f32.mxu1 %v6881_v3 }
  0xeb   : > { %4494 = vmatpush1.bf16.msra.mxu1 %v5551_v22  ;;  %v2045_v22 = vld [vmem:[#allocation6 + $0x10] sm:$0xff] }
  0xec   : > { %4422 = vmatpush1.bf16.msra.mxu0 %v5634_v36  ;;  %4496 = vmatprep.subr.bf16.mxu1 %v5557_v27  ;;  %v2050_v27 = vld [vmem:[#allocation6 + $0x38] sm:$0xff] }
  0xed   : > { %4424 = vmatprep.subr.bf16.mxu0 %v6884_v4 }
  0xef   : > { %4498 = vmatpush1.bf16.msra.mxu1 %v5562_v35 }
  0xf0   : > { %4426 = vmatpush1.bf16.msra.mxu0 %v6885_v9  ;;  %4500 = vmatprep.subr.bf16.mxu1 %v5568_v40  ;;  %v2047_v40 = vld [vmem:[#allocation6 + $0x20] sm:$0xff] }
  0xf1   : > { %4428 = vmatprep.subr.bf16.mxu0 %v5647_v46 }
  0xf3   : > { %4502 = vmatpush1.bf16.msra.mxu1 %v5575_v51  ;;  %v2052_v51 = vld [vmem:[#allocation6 + $0x48] sm:$0xff] }
  0xf4   : > { %4430 = vmatpush1.bf16.msra.mxu0 %v5652_v54  ;;  %4504 = vmatprep.subr.bf16.mxu1 %v5581_v53 }
  0xf5   : > { %4432 = vmatprep.subr.bf16.mxu0 %v5655_v55 }
  0xf7   : > { %4506 = vmatpush1.bf16.msra.mxu1 %v5590_v63  ;;  %v2051_v63 = vld [vmem:[#allocation6 + $0x40] sm:$0xff] }
  0xf8   : > { %4434 = vmatpush1.bf16.msra.mxu0 %v5660_v61  ;;  %4508 = vmatprep.subr.bf16.mxu1 %v5596_v2  ;;  %v2056_v2 = vld [vmem:[#allocation6 + $0x68] sm:$0xff] }
  0xf9   : > { %4436 = vmatprep.subr.bf16.mxu0 %v5663_v62 }
  0xfb   : > { %4510 = vmatpush1.bf16.msra.mxu1 %v5602_v14 }
  0xfc   : > { %4438 = vmatpush1.bf16.msra.mxu0 %v5668_v11  ;;  %4512 = vmatprep.subr.bf16.mxu1 %v5537_v8  ;;  %v2044_v8 = vld [vmem:[#allocation6 + $0x8] sm:$0xff] }
  0xfd   : > { %4440 = vmatprep.subr.bf16.mxu0 %v5671_v12 }
  0xfe   : > { %3687 = vmatmul.mubr.msk.f32.vlgmr.msra.gmra.mrb[4].mxu1 %vm465_vm0, %v5788_v37 }
  0xff   : > { %3684 = vmatmul.mubr.msk.f32.vlgmr.msra.gmra.mrb[2].mxu0 %vm465_vm0, %v5788_v37  ;;  %4514 = vmatpush1.bf16.msra.mxu1 %v5542_v13  ;;  %v2046_v13 = vld [vmem:[#allocation6 + $0x18] sm:$0xff]  ;;  %v2067_v37 = vld [vmem:[#allocation6 + $0xc0] sm:$0xff] }
 0x100   : > { %4442 = vmatpush1.bf16.msra.mxu0 %v5679_v30  ;;  %4516 = vmatprep.subr.bf16.mxu1 %v5548_v18  ;;  %v5941_v17 = vpack.c.bf16 %v2046_v13, %v2044_v8  ;;  %v2043_v18 = vld [vmem:[#allocation6] sm:$0xff]  ;;  %v2398_v8 = vld [vmem:[#allocation6 + $0x218] sm:$0xff] }
 0x101   : > { %4444 = vmatprep.subr.bf16.mxu0 %v5682_v32  ;;  %1564 = vmatprep.mubr.f32.mxu0 %v6881_v3  ;;  %v5950_v35 = vpack.c.bf16 %v2045_v22, %v2043_v18  ;;  %v2083_v18 = vld [vmem:[#allocation6 + $0x130] sm:$0xff] }
 0x102   : > { %1785 = vmatprep.mubr.f32.mxu1 %v6881_v3 }
 0x103   : > { %4518 = vmatpush1.bf16.msra.mxu1 %v5555_v26  ;;  %v2048_v26 = vld [vmem:[#allocation6 + $0x28] sm:$0xff] }
 0x104   : > { %4446 = vmatpush1.bf16.msra.mxu0 %v5691_v42  ;;  %4520 = vmatprep.subr.bf16.mxu1 %v5559_v31  ;;  %v5946_v31 = vld [vmem:[%s5611_s16 + $0x11] sm:$0x7f] }
 0x105   : > { %4448 = vmatprep.subr.bf16.mxu0 %v5694_v43 }
 0x107   : > { %4522 = vmatpush1.bf16.msra.mxu1 %v5566_v39  ;;  %v5954_v39 = vpack.c.bf16 %v2050_v27, %v2048_v26  ;;  %v2086_v26 = vld [vmem:[#allocation6 + $0x148] sm:$0xff]  ;;  %v2088_v27 = vld [vmem:[#allocation6 + $0x158] sm:$0xff] }
 0x108   : > { %4450 = vmatpush1.bf16.msra.mxu0 %v5701_v56  ;;  %4524 = vmatprep.subr.bf16.mxu1 %v5571_v44  ;;  %v2049_v44 = vld [vmem:[#allocation6 + $0x30] sm:$0xff] }
 0x109   : > { %4452 = vmatprep.subr.bf16.mxu0 %v5704_v58  ;;  %v5962_v53 = vpack.c.bf16 %v2049_v44, %v2047_v40  ;;  %v2085_v40 = vld [vmem:[#allocation6 + $0x140] sm:$0xff] }
 0x10b   : > { %4526 = vmatpush1.bf16.msra.mxu1 %v5579_v52  ;;  %v2054_v52 = vld [vmem:[#allocation6 + $0x58] sm:$0xff] }
 0x10c   : > { %4454 = vmatpush1.bf16.msra.mxu0 %v5709_v7  ;;  %4528 = vmatprep.subr.bf16.mxu1 %v5584_v57  ;;  %v5966_v57 = vpack.c.bf16 %v2054_v52, %v2052_v51  ;;  %v2087_v51 = vld [vmem:[#allocation6 + $0x150] sm:$0xff] }
 0x10d   : > { %4456 = vmatprep.subr.bf16.mxu0 %v5712_v10 }
 0x10f   : > { %4530 = vmatpush1.bf16.msra.mxu1 %v5594_v1  ;;  %v2053_v1 = vld [vmem:[#allocation6 + $0x50] sm:$0xff] }
 0x110   : > { %4458 = vmatpush1.bf16.msra.mxu0 %v5717_v33  ;;  %4532 = vmatprep.subr.bf16.mxu1 %v5599_v6  ;;  %v2058_v6 = vld [vmem:[#allocation6 + $0x78] sm:$0xff]  ;;  %v5971_v14 = vpack.c.bf16 %v2053_v1, %v2051_v63  ;;  %v6052_v1 = vpack.c.bf16 %v2087_v51, %v2085_v40 }
 0x111   : > { %4460 = vmatprep.subr.bf16.mxu0 %v5720_v34 }
 0x113   : > { %4534 = vmatpush1.bf16.msra.mxu1 %v5606_v15  ;;  %v5974_v15 = vpack.c.bf16 %v2058_v6, %v2056_v2  ;;  %v2090_v2 = vld [vmem:[#allocation6 + $0x168] sm:$0xff]  ;;  %v2092_v6 = vld [vmem:[#allocation6 + $0x178] sm:$0xff] }
 0x114   : > { %4462 = vmatpush1.bf16.msra.mxu0 %v5725_v49  ;;  %4536 = vmatprep.subr.bf16.mxu1 %v5614_v16  ;;  %v2055_v16 = vld [vmem:[#allocation6 + $0x60] sm:$0xff] }
 0x115   : > { %4464 = vmatprep.subr.bf16.mxu0 %v5728_v50 }
 0x116   : > { %3688 = vmatmul.mubr.msk.f32.vlgmr.msra.gmra.mrb[4].mxu1 %vm465_vm0, %v5734_v19 }
 0x117   : > { %3685 = vmatmul.mubr.msk.f32.vlgmr.msra.gmra.mrb[2].mxu0 %vm465_vm0, %v5850_v24  ;;  %4538 = vmatpush1.bf16.msra.mxu1 %v6882_v5 }
 0x118   : > { %4466 = vmatpush1.bf16.msra.mxu0 %v5736_v20  ;;  %4540 = vmatprep.subr.bf16.mxu1 %v6883_v47 }
 0x119   : > { %4468 = vmatprep.subr.bf16.mxu0 %v5739_v21  ;;  %1641 = vmatprep.mubr.f32.mxu0 %v6881_v3 }
 0x11a   : > { %1856 = vmatprep.mubr.f32.mxu1 %v6881_v3 }
 0x11b   : > { %4542 = vmatpush1.bf16.msra.mxu1 %v5634_v36  ;;  %v2057_v36 = vld [vmem:[#allocation6 + $0x70] sm:$0xff] }
 0x11c   : > { %4470 = vmatpush1.bf16.msra.mxu0 %v5748_v48  ;;  %4544 = vmatprep.subr.bf16.mxu1 %v6884_v4  ;;  %v2071_v4 = vld [vmem:[#allocation6 + $0xe0] sm:$0xff] }
 0x11d   : > { %4472 = vmatprep.subr.bf16.mxu0 %v5751_v59 }
 0x11f   : > { %4546 = vmatpush1.bf16.msra.mxu1 %v6885_v9  ;;  %v2073_v9 = vld [vmem:[#allocation6 + $0xf0] sm:$0xff] }
 0x120   : > { %4474 = vmatpush1.bf16.msra.mxu0 %v5758_v23  ;;  %4548 = vmatprep.subr.bf16.mxu1 %v5647_v46  ;;  %v2060_v46 = vld [vmem:[#allocation6 + $0x88] sm:$0xff] }
 0x121   : > { %4476 = vmatprep.subr.bf16.mxu0 %v5761_v38 }
 0x123   : > { %4550 = vmatpush1.bf16.msra.mxu1 %v5652_v54  ;;  %v2062_v54 = vld [vmem:[#allocation6 + $0x98] sm:$0xff] }
 0x124   : > { %4478 = vmatpush1.bf16.msra.mxu0 %v5766_v0  ;;  %4552 = vmatprep.subr.bf16.mxu1 %v5655_v55  ;;  %v5979_v55 = vpack.c.bf16 %v2057_v36, %v2055_v16  ;;  %v6056_v36 = vpack.c.bf16 %v2092_v6, %v2090_v2  ;;  %v2397_v2 = vld [vmem:[#allocation6 + $0x210] sm:$0xff]  ;;  %v2400_v6 = vld [vmem:[#allocation6 + $0x228] sm:$0xff] }
 0x125   : > { %4480 = vmatprep.subr.bf16.mxu0 %v5769_v60 }
 0x127   : > { %4554 = vmatpush1.bf16.msra.mxu1 %v5660_v61  ;;  %v5982_v61 = vpack.c.bf16 %v2062_v54, %v2060_v46  ;;  %v2089_v46 = vld [vmem:[#allocation6 + $0x160] sm:$0xff]  ;;  %v2091_v54 = vld [vmem:[#allocation6 + $0x170] sm:$0xff] }
 0x128   : > { %4482 = vmatpush1.bf16.msra.mxu0 %v5774_v45  ;;  %4556 = vmatprep.subr.bf16.mxu1 %v5663_v62  ;;  %v2059_v62 = vld [vmem:[#allocation6 + $0x80] sm:$0xff] }
 0x129   : > { %4484 = vmatprep.subr.bf16.mxu0 %v5777_v41 }
 0x12b   : > { %4558 = vmatpush1.bf16.msra.mxu1 %v5668_v11  ;;  %v2061_v11 = vld [vmem:[#allocation6 + $0x90] sm:$0xff] }
 0x12c   : > { %4486 = vmatpush1.bf16.msra.mxu0 %v5782_v29  ;;  %4560 = vmatprep.subr.bf16.mxu1 %v5671_v12  ;;  %v2064_v12 = vld [vmem:[#allocation6 + $0xa8] sm:$0xff] }
 0x12d   : > { %4640 = vmatprep.subr.bf16.mxu0 %v5941_v17 }
 0x12e   : > { %3689 = vmatmul.mubr.msk.f32.vlgmr.msra.gmra.mrb[4].mxu1 %vm465_vm0, %v5850_v24  ;;  %v2069_v24 = vld [vmem:[#allocation6 + $0xd0] sm:$0xff] }
 0x12f   : > { %3686 = vmatmul.mubr.msk.f32.vlgmr.msra.gmra.mrb[2].mxu0 %vm465_vm0, %v5946_v31  ;;  %4562 = vmatpush1.bf16.msra.mxu1 %v5679_v30  ;;  %v5987_v30 = vpack.c.bf16 %v2061_v11, %v2059_v62  ;;  %v6007_v5 = vpack.c.bf16 %v2069_v24, %v2067_v37  ;;  %v6059_v62 = vpack.c.bf16 %v2091_v54, %v2089_v46  ;;  %v2094_v11 = vld [vmem:[#allocation6 + $0x188] sm:$0xff]  ;;  %v2097_v37 = vld [vmem:[#allocation6 + $0x1a0] sm:$0xff]  ;;  %v2099_v24 = vld [vmem:[#allocation6 + $0x1b0] sm:$0xff] }
 0x130   : > { %4564 = vmatprep.subr.bf16.mxu1 %v5682_v32  ;;  %1929 = vmatprep.mubr.f32.mxu1 %v6881_v3  ;;  %v5990_v32 = vpack.c.bf16 %v2066_v25, %v2064_v12  ;;  %v2096_v12 = vld [vmem:[#allocation6 + $0x198] sm:$0xff] }
 0x131   : > { %4642 = vmatpush1.bf16.msra.mxu0 %v5950_v35  ;;  %2244 = vmatprep.mubr.f32.mxu0 %v6881_v3  ;;  %v6063_v25 = vpack.c.bf16 %v2096_v12, %v2094_v11  ;;  %v2399_v11 = vld [vmem:[#allocation6 + $0x220] sm:$0xff]  ;;  %v2401_v12 = vld [vmem:[#allocation6 + $0x230] sm:$0xff] }
 0x132   : > { %4644 = vmatprep.subr.bf16.mxu0 %v5954_v39 }
 0x133   : > { %4566 = vmatpush1.bf16.msra.mxu1 %v5691_v42  ;;  %v2063_v42 = vld [vmem:[#allocation6 + $0xa0] sm:$0xff] }
 0x134   : > { %4568 = vmatprep.subr.bf16.mxu1 %v5694_v43  ;;  %v2065_v43 = vld [vmem:[#allocation6 + $0xb0] sm:$0xff] }
 0x135   : > { %4646 = vmatpush1.bf16.msra.mxu0 %v5962_v53 }
 0x136   : > { %4648 = vmatprep.subr.bf16.mxu0 %v5966_v57 }
 0x137   : > { %4570 = vmatpush1.bf16.msra.mxu1 %v5701_v56  ;;  %v2068_v56 = vld [vmem:[#allocation6 + $0xc8] sm:$0xff] }
 0x138   : > { %4572 = vmatprep.subr.bf16.mxu1 %v5704_v58  ;;  %v2070_v58 = vld [vmem:[#allocation6 + $0xd8] sm:$0xff] }
 0x139   : > { %4650 = vmatpush1.bf16.msra.mxu0 %v5971_v14  ;;  %v6002_v28 = vpack.c.bf16 %v2070_v58, %v2068_v56  ;;  %v2098_v58 = vld [vmem:[#allocation6 + $0x1a8] sm:$0xff] }
 0x13a   : > { %4652 = vmatprep.subr.bf16.mxu0 %v5974_v15 }
 0x13b   : > { %4574 = vmatpush1.bf16.msra.mxu1 %v5709_v7 }
 0x13c   : > { %4576 = vmatprep.subr.bf16.mxu1 %v5712_v10  ;;  %v5997_v10 = vpack.c.bf16 %v2065_v43, %v2063_v42  ;;  %v2093_v42 = vld [vmem:[#allocation6 + $0x180] sm:$0xff]  ;;  %v2095_v43 = vld [vmem:[#allocation6 + $0x190] sm:$0xff] }
 0x13d   : > { %4654 = vmatpush1.bf16.msra.mxu0 %v5979_v55  ;;  %v6065_v56 = vpack.c.bf16 %v2095_v43, %v2093_v42  ;;  %v2404_v43 = vld [vmem:[#allocation6 + $0x248] sm:$0xff] }
 0x13e   : > { %4656 = vmatprep.subr.bf16.mxu0 %v5982_v61 }
 0x13f   : > { %4578 = vmatpush1.bf16.msra.mxu1 %v5717_v33  ;;  %v2072_v33 = vld [vmem:[#allocation6 + $0xe8] sm:$0xff] }
 0x140   : > { %4580 = vmatprep.subr.bf16.mxu1 %v5720_v34  ;;  %v2074_v34 = vld [vmem:[#allocation6 + $0xf8] sm:$0xff] }
 0x141   : > { %v5994_v7 = vpop.f32.mrb[0].mxu1  ;;  %4658 = vmatpush1.bf16.msra.mxu0 %v5987_v30  ;;  %v6012_v47 = vpack.c.bf16 %v2074_v34, %v2072_v33  ;;  %v6071_v33 = vpack.c.bf16 %v2099_v24, %v2097_v37  ;;  %v2102_v34 = vld [vmem:[#allocation6 + $0x1c8] sm:$0xff]  ;;  %v2403_v37 = vld [vmem:[#allocation6 + $0x240] sm:$0xff]  ;;  %v2405_v24 = vld [vmem:[#allocation6 + $0x250] sm:$0xff] }
 0x142   : > { %v5999_v19 = vpop.f32.mrb[1].mxu1  ;;  %4660 = vmatprep.subr.bf16.mxu0 %v5990_v32 }
 0x143   : > { %4582 = vmatpush1.bf16.msra.mxu1 %v5725_v49  ;;  %v2396_v49 = vld [vmem:[#allocation6 + $0x208] sm:$0xff] }
 0x144   : > { %4584 = vmatprep.subr.bf16.mxu1 %v5728_v50  ;;  %v6018_v50 = vpack.c.bf16 %v2073_v9, %v2071_v4  ;;  %v6021_v13 = vpack.c.bf16 %v2398_v8, %v2396_v49  ;;  %v2104_v4 = vld [vmem:[#allocation6 + $0x1d8] sm:$0xff]  ;;  %v2101_v8 = vld [vmem:[#allocation6 + $0x1c0] sm:$0xff] }
 0x145   : > { %4662 = vmatpush1.bf16.msra.mxu0 %v5997_v10  ;;  %v6075_v49 = vpack.c.bf16 %v2104_v4, %v2102_v34  ;;  %v2408_v34 = vld [vmem:[#allocation6 + $0x268] sm:$0xff]  ;;  %v2410_v4 = vld [vmem:[#allocation6 + $0x278] sm:$0xff] }
 0x146   : > { %3690 = vmatmul.mubr.msk.f32.vlgmr.msra.gmra.mrb[4].mxu1 %vm465_vm0, %v5946_v31  ;;  %4664 = vmatprep.subr.bf16.mxu0 %v6002_v28  ;;  %v6048_v31 = vpack.c.bf16 %v2088_v27, %v2086_v26  ;;  %v2105_v26 = vld [vmem:[#allocation6 + $0x1e0] sm:$0xff]  ;;  %v2107_v27 = vld [vmem:[#allocation6 + $0x1f0] sm:$0xff] }
 0x147   : > { %4586 = vmatpush1.bf16.msra.mxu1 %v5736_v20  ;;  %2006 = vmatprep.mubr.f32.mxu1 %v6881_v3  ;;  %v1938_v20 = vld [vmem:[%s5611_s16 + $0x19] sm:$0x7f] }
 0x148   : > { %4588 = vmatprep.subr.bf16.mxu1 %v5739_v21  ;;  %v2078_v21 = vld [vmem:[#allocation6 + $0x108] sm:$0xff] }
 0x149   : > { %4666 = vmatpush1.bf16.msra.mxu0 %v6007_v5 }
 0x14a   : > { %4668 = vmatprep.subr.bf16.mxu0 %v6012_v47 }
 0x14b   : > { %4590 = vmatpush1.bf16.msra.mxu1 %v5748_v48  ;;  %v2080_v48 = vld [vmem:[#allocation6 + $0x118] sm:$0xff] }
 0x14c   : > { %4592 = vmatprep.subr.bf16.mxu1 %v5751_v59  ;;  %v6037_v59 = vpack.c.bf16 %v2080_v48, %v2078_v21 }
 0x14d   : > { %4670 = vmatpush1.bf16.msra.mxu0 %v6018_v50 }
 0x14e   : > { %4736 = vmatprep.subr.bf16.mxu0 %v6021_v13 }
 0x14f   : > { %4594 = vmatpush1.bf16.msra.mxu1 %v5758_v23  ;;  %v2077_v23 = vld [vmem:[#allocation6 + $0x100] sm:$0xff] }
 0x150   : > { %4596 = vmatprep.subr.bf16.mxu1 %v5761_v38  ;;  %v2079_v38 = vld [vmem:[#allocation6 + $0x110] sm:$0xff] }
 0x153   : > { %4598 = vmatpush1.bf16.msra.mxu1 %v5766_v0  ;;  %v6039_v0 = vpack.c.bf16 %v2079_v38, %v2077_v23 }
 0x154   : > { %4600 = vmatprep.subr.bf16.mxu1 %v5769_v60  ;;  %v2082_v60 = vld [vmem:[#allocation6 + $0x128] sm:$0xff] }
 0x157   : > { %4602 = vmatpush1.bf16.msra.mxu1 %v5774_v45  ;;  %v2084_v45 = vld [vmem:[#allocation6 + $0x138] sm:$0xff] }
 0x158   : > { %4604 = vmatprep.subr.bf16.mxu1 %v5777_v41  ;;  %v6043_v41 = vpack.c.bf16 %v2084_v45, %v2082_v60  ;;  %v2106_v60 = vld [vmem:[#allocation6 + $0x1e8] sm:$0xff]  ;;  %v2108_v45 = vld [vmem:[#allocation6 + $0x1f8] sm:$0xff] }
 0x15b   : > { %4606 = vmatpush1.bf16.msra.mxu1 %v5782_v29  ;;  %v2081_v29 = vld [vmem:[#allocation6 + $0x120] sm:$0xff] }
 0x15c   : > { %4608 = vmatprep.subr.bf16.mxu1 %v6037_v59  ;;  %v6045_v22 = vpack.c.bf16 %v2083_v18, %v2081_v29  ;;  %v6083_v29 = vld [vmem:[%s6813_s2] ss:$0 sm:$0xff]  ;;  %v6086_v18 = vpack.c.bf16 %v2108_v45, %v2106_v60 }
 0x15e   : > { %3691 = vmatmul.mubr.msk.f32.vlgmr.msra.gmra.mrb[4].mxu1 %vm465_vm0, %v1938_v20  ;;  %v2103_v20 = vld [vmem:[#allocation6 + $0x1d0] sm:$0xff] }
 0x15f   : > { %2173 = vmatprep.mubr.f32.mxu1 %v6881_v3  ;;  %4610 = vmatpush1.bf16.msra.mxu1 %v6039_v0  ;;  %v6077_v23 = vpack.c.bf16 %v2103_v20, %v2101_v8  ;;  %v6109_v8 = vpack.c.bf16 %v2410_v4, %v2408_v34  ;;  %v2407_v20 = vld [vmem:[#allocation6 + $0x260] sm:$0xff] }
 0x160   : > { %4612 = vmatprep.subr.bf16.mxu1 %v6043_v41 }
 0x163   : > { %4614 = vmatpush1.bf16.msra.mxu1 %v6045_v22 }
 0x164   : > { %4616 = vmatprep.subr.bf16.mxu1 %v6048_v31 }
 0x167   : > { %4618 = vmatpush1.bf16.msra.mxu1 %v6052_v1 }
 0x168   : > { %4620 = vmatprep.subr.bf16.mxu1 %v6056_v36 }
 0x16b   : > { %4622 = vmatpush1.bf16.msra.mxu1 %v6059_v62 }
 0x16c   : > { %4624 = vmatprep.subr.bf16.mxu1 %v6063_v25 }
 0x16f   : > { %4626 = vmatpush1.bf16.msra.mxu1 %v6065_v56 }
 0x18a   : > { %v913_v44 = vpop.f32.mrb[0].mxu0 }
 0x18b   : > { %v5095_v52 = vadd.f32 %v913_v44, %v5994_v7  ;;  %v915_v63 = vpop.f32.mrb[1].mxu0  ;;  %v2100_v7 = vld [vmem:[#allocation6 + $0x1b8] sm:$0xff]  ;;  %v6088_v44 = vpack.c.bf16 %v2107_v27, %v2105_v26  ;;  %v2411_v26 = vld [vmem:[#allocation6 + $0x280] sm:$0xff]  ;;  %v2413_v27 = vld [vmem:[#allocation6 + $0x290] sm:$0xff] }
 0x18c   : > { %v5096_v16 = vadd.f32 %v915_v63, %v5999_v19  ;;  %v6069_v19 = vpack.c.bf16 %v2100_v7, %v2098_v58  ;;  %v2395_v63 = vld [vmem:[#allocation6 + $0x200] sm:$0xff]  ;;  %v2406_v58 = vld [vmem:[#allocation6 + $0x258] sm:$0xff]  ;;  %v6099_v7 = vpack.c.bf16 %v2401_v12, %v2399_v11 }
 0x18d   : > { %v6094_v46 = vpack.c.bf16 %v2397_v2, %v2395_v63  ;;  %v2415_v2 = vld [vmem:[#allocation6 + $0x2a0] sm:$0xff]  ;;  %v2422_v11 = vld [vmem:[#allocation6 + $0x2d8] sm:$0xff] }
 0x18e   : > { %4628 = vmatprep.subr.bf16.mxu1 %v6069_v19 }
 0x18f   : > { %4630 = vmatpush1.bf16.msra.mxu1 %v6071_v33 }
 0x190   : > { %4632 = vmatprep.subr.bf16.mxu1 %v6075_v49 }
 0x193   : > { %4634 = vmatpush1.bf16.msra.mxu1 %v6077_v23 }
 0x194   : > { %4636 = vmatprep.subr.bf16.mxu1 %v6086_v18 }
 0x197   : > { %4638 = vmatpush1.bf16.msra.mxu1 %v6088_v44 }
 0x198   : > { %4672 = vmatprep.subr.bf16.mxu1 %v6037_v59  ;;  %v6103_v59 = vpack.c.bf16 %v2406_v58, %v2404_v43  ;;  %v2419_v43 = vld [vmem:[#allocation6 + $0x2c0] sm:$0xff]  ;;  %v2421_v58 = vld [vmem:[#allocation6 + $0x2d0] sm:$0xff] }
 0x199   : > { %v6130_v34 = vpack.c.bf16 %v2421_v58, %v2419_v43  ;;  %v2579_v43 = vld [vmem:[#allocation6 + $0x320] sm:$0xff]  ;;  %v2581_v58 = vld [vmem:[#allocation6 + $0x330] sm:$0xff] }
 0x19b   : > { %6888 = vst [vmem:[#allocation19_spill] sm:$0xff] %v6130_v34 }
 0x1b9   : > { %v1278_v9 = vpop.f32.mrb[2].mxu1 }
 0x1ba   : > { %v2015_v21 = vmax.f32 %v5095_v52, %v1278_v9  ;;  %v1280_v48 = vpop.f32.mrb[3].mxu1  ;;  %v6106_v9 = vpack.c.bf16 %v2405_v24, %v2403_v37  ;;  %v2424_v37 = vld [vmem:[#allocation6 + $0x2e8] sm:$0xff]  ;;  %v2426_v24 = vld [vmem:[#allocation6 + $0x2f8] sm:$0xff] }
 0x1bb   : > { %v2016_v38 = vmax.f32 %v5096_v16, %v1280_v48  ;;  %v2402_v16 = vld [vmem:[#allocation6 + $0x238] sm:$0xff]  ;;  %v2412_v48 = vld [vmem:[#allocation6 + $0x288] sm:$0xff]  ;;  %v6133_v4 = vpack.c.bf16 %v2426_v24, %v2424_v37 }
 0x1bc   : > { %v6096_v54 = vpack.c.bf16 %v2402_v16, %v2400_v6  ;;  %v2417_v6 = vld [vmem:[#allocation6 + $0x2b0] sm:$0xff]  ;;  %v2420_v16 = vld [vmem:[#allocation6 + $0x2c8] sm:$0xff] }
 0x1bd   : > { %v2019_v40 = vmax.f32 %v2015_v21, %v2016_v38  ;;  %v2409_v21 = vld [vmem:[#allocation6 + $0x270] sm:$0xff]  ;;  %v2414_v38 = vld [vmem:[#allocation6 + $0x298] sm:$0xff]  ;;  %v6124_v12 = vpack.c.bf16 %v2417_v6, %v2415_v2  ;;  %6889 = vst [vmem:[#allocation20_spill] sm:$0xff] %v6133_v4  ;;  %v2580_v2 = vld [vmem:[#allocation6 + $0x328] sm:$0xff] }
 0x1be   : > { %v6112_v60 = vpack.c.bf16 %v2409_v21, %v2407_v20  ;;  %v6115_v45 = vpack.c.bf16 %v2414_v38, %v2412_v48  ;;  %v2423_v20 = vld [vmem:[#allocation6 + $0x2e0] sm:$0xff]  ;;  %v2425_v21 = vld [vmem:[#allocation6 + $0x2f0] sm:$0xff]  ;;  %v2576_v48 = vld [vmem:[#allocation6 + $0x308] sm:$0xff] }
 0x1bf   : > { %v2027_v51 = vadd.f32 %v6083_v29, %v2019_v40  ;;  %v2416_v40 = vld [vmem:[#allocation6 + $0x2a8] sm:$0xff]  ;;  %6886 = vst [vmem:[#allocation17_spill] sm:$0xff] %v6124_v12  ;;  %v2578_v38 = vld [vmem:[#allocation6 + $0x318] sm:$0xff] }
 0x1c0   : > { %v2582_v6 = vld [vmem:[#allocation6 + $0x338] sm:$0xff]  ;;  %v2584_v24 = vld [vmem:[#allocation6 + $0x348] sm:$0xff] }
 0x1c1   : > { %v2028_v52 = vmax.f32 %v2027_v51, 0.0  ;;  %v2418_v51 = vld [vmem:[#allocation6 + $0x2b8] sm:$0xff] }
 0x1c2   : > { %v6121_v63 = vpack.c.bf16 %v2418_v51, %v2416_v40  ;;  %v2575_v40 = vld [vmem:[#allocation6 + $0x300] sm:$0xff]  ;;  %v2577_v51 = vld [vmem:[#allocation6 + $0x310] sm:$0xff] }
 0x1c3   : > { %2029 = vst [vmem:[#allocation2] sm:$0x7f] %v2028_v52  ;;  %v6118_v52 = vpack.c.bf16 %v2413_v27, %v2411_v26  ;;  %v6136_v26 = vpack.c.bf16 %v2425_v21, %v2423_v20  ;;  %v6139_v27 = vpack.c.bf16 %v2578_v38, %v2576_v48  ;;  %v2586_v20 = vld [vmem:[#allocation6 + $0x358] sm:$0xff]  ;;  %v6151_v21 = vpack.c.bf16 %v2581_v58, %v2579_v43  ;;  %v2583_v38 = vld [vmem:[#allocation6 + $0x340] sm:$0xff]  ;;  %v2589_v58 = vld [vmem:[#allocation6 + $0x370] sm:$0xff] }
 0x1c4   : > { %v6155_v48 = vpack.c.bf16 %v2586_v20, %v2584_v24  ;;  %v2587_v43 = vld [vmem:[#allocation6 + $0x360] sm:$0xff] }
 0x1c5   : > { %6890 = vst [vmem:[#allocation21_spill] sm:$0xff] %v6136_v26  ;;  %6891 = vst [vmem:[#allocation22_spill] sm:$0xff] %v6139_v27  ;;  %v6164_v24 = vpack.c.bf16 %v2589_v58, %v2587_v43  ;;  %v2600_v43 = vld [vmem:[#allocation6 + $0x3c8] sm:$0xff]  ;;  %v2602_v58 = vld [vmem:[#allocation6 + $0x3d8] sm:$0xff] }
 0x1c6   : > { %6894 = vst [vmem:[#allocation25_spill] sm:$0xff] %v6151_v21  ;;  %6895 = vst [vmem:[#allocation26_spill] sm:$0xff] %v6155_v48 }
 0x1c7   : > { %6898 = vst [vmem:[#allocation29_spill] sm:$0xff] %v6164_v24 }
 0x1ca   : > { %v2042_v42 = vld [vmem:[#allocation2] sm:$0x1f] }
 0x1cb   : > { %2245 = vmatmul.mubr.f32.vlgmr.msra.gmra.mrb[4].mxu0 %v2042_v42  ;;  %v6127_v42 = vpack.c.bf16 %v2422_v11, %v2420_v16  ;;  %v6142_v16 = vpack.c.bf16 %v2577_v51, %v2575_v40  ;;  %v6145_v11 = vpack.c.bf16 %v2582_v6, %v2580_v2  ;;  %v6147_v37 = vld [vmem:[#allocation2 + $0x1] sm:$0x1f]  ;;  %v2588_v51 = vld [vmem:[#allocation6 + $0x368] sm:$0xff]  ;;  %v2590_v2 = vld [vmem:[#allocation6 + $0x378] sm:$0xff] }
 0x1cc   : > { %4738 = vmatpush1.bf16.msra.mxu0 %v6094_v46  ;;  %2491 = vmatprep.mubr.f32.mxu0 %v6881_v3  ;;  %v2585_v40 = vld [vmem:[#allocation6 + $0x350] sm:$0xff] }
 0x1cd   : > { %4740 = vmatprep.subr.bf16.mxu0 %v6096_v54  ;;  %6887 = vst [vmem:[#allocation18_spill] sm:$0xff] %v6127_v42  ;;  %6892 = vst [vmem:[#allocation23_spill] sm:$0xff] %v6142_v16  ;;  %v6158_v6 = vpack.c.bf16 %v2585_v40, %v2583_v38  ;;  %v2596_v38 = vld [vmem:[#allocation6 + $0x3a8] sm:$0xff]  ;;  %v2598_v40 = vld [vmem:[#allocation6 + $0x3b8] sm:$0xff] }
 0x1ce   : > { %6893 = vst [vmem:[#allocation24_spill] sm:$0xff] %v6145_v11 }
 0x1cf   : > { %6896 = vst [vmem:[#allocation27_spill] sm:$0xff] %v6158_v6 }
 0x1d0   : > { %4742 = vmatpush1.bf16.msra.mxu0 %v6099_v7 }
 0x1d1   : > { %4744 = vmatprep.subr.bf16.mxu0 %v6103_v59 }
 0x1d4   : > { %4746 = vmatpush1.bf16.msra.mxu0 %v6106_v9 }
 0x1d5   : > { %4748 = vmatprep.subr.bf16.mxu0 %v6109_v8 }
 0x1d8   : > { %4750 = vmatpush1.bf16.msra.mxu0 %v6112_v60 }
 0x1d9   : > { %4752 = vmatprep.subr.bf16.mxu0 %v6115_v45 }
 0x1dc   : > { %4754 = vmatpush1.bf16.msra.mxu0 %v6118_v52 }
 0x1dd   : > { %4756 = vmatprep.subr.bf16.mxu0 %v6121_v63 }
 0x1e0   : > { %4758 = vmatpush1.bf16.msra.mxu0 %v6124_v12 }
 0x1e1   : > { %4760 = vmatprep.subr.bf16.mxu0 %v6127_v42  ;;  %v2762_v42 = vld [vmem:[#allocation6 + $0x438] sm:$0xff] }
 0x1e4   : > { %4762 = vmatpush1.bf16.msra.mxu0 %v6130_v34 }
 0x1e5   : > { %4764 = vmatprep.subr.bf16.mxu0 %v6133_v4  ;;  %v2758_v4 = vld [vmem:[#allocation6 + $0x418] sm:$0xff] }
 0x1e8   : > { %4766 = vmatpush1.bf16.msra.mxu0 %v6136_v26  ;;  %v2594_v26 = vld [vmem:[#allocation6 + $0x398] sm:$0xff] }
 0x1e9   : > { %4800 = vmatprep.subr.bf16.mxu0 %v6139_v27  ;;  %v6161_v27 = vpack.c.bf16 %v2590_v2, %v2588_v51  ;;  %v6173_v2 = vpack.c.bf16 %v2598_v40, %v2596_v38 }
 0x1eb   : > { %2492 = vmatmul.mubr.f32.vlgmr.msra.gmra.mrb[4].mxu0 %v6147_v37  ;;  %6897 = vst [vmem:[#allocation28_spill] sm:$0xff] %v6161_v27  ;;  %6901 = vst [vmem:[#allocation32_spill] sm:$0xff] %v6173_v2 }
 0x1ec   : > { %4802 = vmatpush1.bf16.msra.mxu0 %v6142_v16  ;;  %2671 = vmatprep.mubr.f32.mxu0 %v6881_v3  ;;  %v2592_v16 = vld [vmem:[#allocation6 + $0x388] sm:$0xff] }
 0x1ed   : > { %4804 = vmatprep.subr.bf16.mxu0 %v6145_v11  ;;  %v6167_v20 = vpack.c.bf16 %v2594_v26, %v2592_v16  ;;  %v2591_v11 = vld [vmem:[#allocation6 + $0x380] sm:$0xff]  ;;  %v6179_v16 = vpack.c.bf16 %v2602_v58, %v2600_v43 }
 0x1ef   : > { %6899 = vst [vmem:[#allocation30_spill] sm:$0xff] %v6167_v20  ;;  %6903 = vst [vmem:[#allocation34_spill] sm:$0xff] %v6179_v16 }
 0x1f0   : > { %4806 = vmatpush1.bf16.msra.mxu0 %v6151_v21  ;;  %v2593_v21 = vld [vmem:[#allocation6 + $0x390] sm:$0xff] }
 0x1f1   : > { %4808 = vmatprep.subr.bf16.mxu0 %v6155_v48  ;;  %v6170_v51 = vpack.c.bf16 %v2593_v21, %v2591_v11  ;;  %v2595_v48 = vld [vmem:[#allocation6 + $0x3a0] sm:$0xff]  ;;  %v2604_v11 = vld [vmem:[#allocation6 + $0x3e8] sm:$0xff]  ;;  %v2606_v21 = vld [vmem:[#allocation6 + $0x3f8] sm:$0xff] }
 0x1f2   : > { %v6185_v40 = vpack.c.bf16 %v2606_v21, %v2604_v11 }
 0x1f3   : > { %6900 = vst [vmem:[#allocation31_spill] sm:$0xff] %v6170_v51 }
 0x1f4   : > { %4810 = vmatpush1.bf16.msra.mxu0 %v6158_v6  ;;  %v2597_v6 = vld [vmem:[#allocation6 + $0x3b0] sm:$0xff]  ;;  %6905 = vst [vmem:[#allocation36_spill] sm:$0xff] %v6185_v40 }
 0x1f5   : > { %4812 = vmatprep.subr.bf16.mxu0 %v6161_v27  ;;  %v6176_v26 = vpack.c.bf16 %v2597_v6, %v2595_v48  ;;  %v2599_v27 = vld [vmem:[#allocation6 + $0x3c0] sm:$0xff]  ;;  %v2756_v6 = vld [vmem:[#allocation6 + $0x408] sm:$0xff] }
 0x1f6   : > { %v6191_v58 = vpack.c.bf16 %v2758_v4, %v2756_v6  ;;  %v2759_v6 = vld [vmem:[#allocation6 + $0x420] sm:$0xff] }
 0x1f7   : > { %6902 = vst [vmem:[#allocation33_spill] sm:$0xff] %v6176_v26 }
 0x1f8   : > { %4814 = vmatpush1.bf16.msra.mxu0 %v6164_v24  ;;  %v2601_v24 = vld [vmem:[#allocation6 + $0x3d0] sm:$0xff]  ;;  %6907 = vst [vmem:[#allocation38_spill] sm:$0xff] %v6191_v58 }
 0x1f9   : > { %4816 = vmatprep.subr.bf16.mxu0 %v6167_v20  ;;  %v6182_v38 = vpack.c.bf16 %v2601_v24, %v2599_v27  ;;  %v2603_v20 = vld [vmem:[#allocation6 + $0x3e0] sm:$0xff] }
 0x1fb   : > { %6904 = vst [vmem:[#allocation35_spill] sm:$0xff] %v6182_v38 }
 0x1fc   : > { %4818 = vmatpush1.bf16.msra.mxu0 %v6170_v51  ;;  %v2605_v51 = vld [vmem:[#allocation6 + $0x3f0] sm:$0xff] }
 0x1fd   : > { %4820 = vmatprep.subr.bf16.mxu0 %v6173_v2  ;;  %v6188_v43 = vpack.c.bf16 %v2605_v51, %v2603_v20  ;;  %v2757_v20 = vld [vmem:[#allocation6 + $0x410] sm:$0xff]  ;;  %v2760_v51 = vld [vmem:[#allocation6 + $0x428] sm:$0xff] }
 0x1fe   : > { %v6198_v4 = vpack.c.bf16 %v2762_v42, %v2760_v51  ;;  %v2778_v51 = vld [vmem:[#allocation6 + $0x4b8] sm:$0xff] }
 0x1ff   : > { %6906 = vst [vmem:[#allocation37_spill] sm:$0xff] %v6188_v43 }
 0x200   : > { %4822 = vmatpush1.bf16.msra.mxu0 %v6176_v26 }
 0x201   : > { %4824 = vmatprep.subr.bf16.mxu0 %v6179_v16 }
 0x202   : > { %v1643_v48 = vpop.f32.mrb[2].mxu0 }
 0x203   : > { %v1645_v2 = vpop.f32.mrb[3].mxu0 }
 0x204   : > { %4826 = vmatpush1.bf16.msra.mxu0 %v6182_v38  ;;  %v2755_v38 = vld [vmem:[#allocation6 + $0x400] sm:$0xff] }
 0x205   : > { %4828 = vmatprep.subr.bf16.mxu0 %v6185_v40  ;;  %v6196_v40 = vpack.c.bf16 %v2757_v20, %v2755_v38  ;;  %v2770_v38 = vld [vmem:[#allocation6 + $0x478] sm:$0xff]  ;;  %v2776_v20 = vld [vmem:[#allocation6 + $0x4a8] sm:$0xff] }
 0x208   : > { %4830 = vmatpush1.bf16.msra.mxu0 %v6188_v43  ;;  %v2761_v43 = vld [vmem:[#allocation6 + $0x430] sm:$0xff] }
 0x209   : > { %4864 = vmatprep.subr.bf16.mxu0 %v6191_v58  ;;  %v2764_v58 = vld [vmem:[#allocation6 + $0x448] sm:$0xff] }
 0x231   : > { %v2008_v27 = vpop.f32.mrb[4].mxu1 }
 0x232   : > { %v2017_v24 = vmax.f32 %v1643_v48, %v2008_v27  ;;  %v2010_v11 = vpop.f32.mrb[5].mxu1  ;;  %v2772_v27 = vld [vmem:[#allocation6 + $0x488] sm:$0xff] }
 0x233   : > { %v2018_v21 = vmax.f32 %v1645_v2, %v2010_v11  ;;  %v2766_v2 = vld [vmem:[#allocation6 + $0x458] sm:$0xff] }
 0x234   : > { %v6212_v42 = vpack.c.bf16 %v2766_v2, %v2764_v58  ;;  %v2769_v58 = vld [vmem:[#allocation6 + $0x470] sm:$0xff] }
 0x235   : > { %v2030_v16 = vmax.f32 %v2017_v24, %v2018_v21  ;;  %v2774_v24 = vld [vmem:[#allocation6 + $0x498] sm:$0xff]  ;;  %v2773_v21 = vld [vmem:[#allocation6 + $0x490] sm:$0xff] }
 0x236   : > { %v2777_v2 = vld [vmem:[#allocation6 + $0x4b0] sm:$0xff] }
 0x237   : > { %v2038_v26 = vadd.f32 %v6083_v29, %v2030_v16  ;;  %v6208_v29 = vpack.c.bf16 %v2761_v43, %v2759_v6  ;;  %v2768_v16 = vld [vmem:[#allocation6 + $0x468] sm:$0xff]  ;;  %v2767_v43 = vld [vmem:[#allocation6 + $0x460] sm:$0xff] }
 0x238   : > { %v6226_v11 = vpack.c.bf16 %v2769_v58, %v2767_v43  ;;  %v2784_v43 = vld [vmem:[#allocation6 + $0x4e8] sm:$0xff]  ;;  %v2786_v58 = vld [vmem:[#allocation6 + $0x4f8] sm:$0xff] }
 0x239   : > { %v2039_v34 = vmax.f32 %v2038_v26, 0.0  ;;  %v2765_v26 = vld [vmem:[#allocation6 + $0x450] sm:$0xff] }
 0x23b   : > { %2041 = vst [vmem:[#allocation2 + $0x8] sm:$0x7f] %v2039_v34  ;;  %v2763_v34 = vld [vmem:[#allocation6 + $0x440] sm:$0xff] }
 0x242   : > { %v6200_v12 = vld [vmem:[#allocation2 + $0x8] sm:$0x1f] }
 0x243   : > { %v6202_v48 = vld [vmem:[#allocation2 + $0x9] sm:$0x1f]  ;;  %2174 = vmatmul.mubr.f32.vlgmr.msra.gmra.mrb[6].mxu1 %v6200_v12 }
 0x244   : > { %2672 = vmatmul.mubr.f32.vlgmr.msra.gmra.mrb[4].mxu0 %v6202_v48  ;;  %4674 = vmatpush1.bf16.msra.mxu1 %v6039_v0  ;;  %v6218_v0 = vpack.c.bf16 %v2765_v26, %v2763_v34  ;;  %v2780_v34 = vld [vmem:[#allocation6 + $0x4c8] sm:$0xff]  ;;  %v2782_v26 = vld [vmem:[#allocation6 + $0x4d8] sm:$0xff] }
 0x245   : > { %4866 = vmatpush1.bf16.msra.mxu0 %v6196_v40  ;;  %4676 = vmatprep.subr.bf16.mxu1 %v6043_v41  ;;  %v6222_v41 = vpack.c.bf16 %v2770_v38, %v2768_v16  ;;  %v2781_v38 = vld [vmem:[#allocation6 + $0x4d0] sm:$0xff] }
 0x246   : > { %4868 = vmatprep.subr.bf16.mxu0 %v6198_v4  ;;  %2316 = vmatprep.mubr.f32.mxu1 %v6881_v3 }
 0x247   : > { %2851 = vmatprep.mubr.f32.mxu0 %v6881_v3 }
 0x248   : > { %4678 = vmatpush1.bf16.msra.mxu1 %v6045_v22  ;;  %v6230_v22 = vpack.c.bf16 %v2774_v24, %v2772_v27  ;;  %v2785_v24 = vld [vmem:[#allocation6 + $0x4f0] sm:$0xff] }
 0x249   : > { %4870 = vmatpush1.bf16.msra.mxu0 %v6208_v29  ;;  %4680 = vmatprep.subr.bf16.mxu1 %v6048_v31  ;;  %v2771_v31 = vld [vmem:[#allocation6 + $0x480] sm:$0xff] }
 0x24a   : > { %4872 = vmatprep.subr.bf16.mxu0 %v6212_v42  ;;  %v6234_v6 = vpack.c.bf16 %v2773_v21, %v2771_v31 }
 0x24c   : > { %4682 = vmatpush1.bf16.msra.mxu1 %v6052_v1  ;;  %v6238_v1 = vpack.c.bf16 %v2778_v51, %v2776_v20  ;;  %v2955_v20 = vld [vmem:[%s6816_s5 + $0x40] sm:$0xff]  ;;  %v2956_v51 = vld [vmem:[%s6816_s5 + $0x48] sm:$0xff] }
 0x24d   : > { %4874 = vmatpush1.bf16.msra.mxu0 %v6218_v0  ;;  %4684 = vmatprep.subr.bf16.mxu1 %v6056_v36  ;;  %v2775_v36 = vld [vmem:[#allocation6 + $0x4a0] sm:$0xff] }
 0x24e   : > { %4876 = vmatprep.subr.bf16.mxu0 %v6222_v41  ;;  %v6242_v16 = vpack.c.bf16 %v2777_v2, %v2775_v36  ;;  %v4940_v36 = vpack.c.bf16 %v2956_v51, %v2955_v20  ;;  %v2958_v2 = vld [vmem:[%s6816_s5 + $0x58] sm:$0xff]  ;;  %v3707_v20 = vld [vmem:[%s6816_s5 + $0xe0] sm:$0xff]  ;;  %v3708_v51 = vld [vmem:[%s6816_s5 + $0xe8] sm:$0xff] }
 0x250   : > { %4686 = vmatpush1.bf16.msra.mxu1 %v6059_v62  ;;  %v6246_v62 = vpack.c.bf16 %v2782_v26, %v2780_v34 }
 0x251   : > { %4878 = vmatpush1.bf16.msra.mxu0 %v6226_v11  ;;  %4688 = vmatprep.subr.bf16.mxu1 %v6063_v25  ;;  %v2779_v25 = vld [vmem:[#allocation6 + $0x4c0] sm:$0xff] }
 0x252   : > { %4880 = vmatprep.subr.bf16.mxu0 %v6230_v22  ;;  %v6250_v27 = vpack.c.bf16 %v2781_v38, %v2779_v25 }
 0x254   : > { %4690 = vmatpush1.bf16.msra.mxu1 %v6065_v56  ;;  %v6254_v56 = vpack.c.bf16 %v2786_v58, %v2784_v43 }
 0x255   : > { %4882 = vmatpush1.bf16.msra.mxu0 %v6234_v6  ;;  %4692 = vmatprep.subr.bf16.mxu1 %v6069_v19  ;;  %v2783_v19 = vld [vmem:[#allocation6 + $0x4e0] sm:$0xff] }
 0x256   : > { %4884 = vmatprep.subr.bf16.mxu0 %v6238_v1  ;;  %v6258_v31 = vpack.c.bf16 %v2785_v24, %v2783_v19  ;;  %v3695_v24 = vld [vmem:[%s6816_s5 + $0x80] sm:$0xff] }
 0x258   : > { %4694 = vmatpush1.bf16.msra.mxu1 %v6071_v33  ;;  %v6265_v33 = vld [vmem:[#allocation2 + $0x2] sm:$0x1f] }
 0x259   : > { %4886 = vmatpush1.bf16.msra.mxu0 %v6242_v16  ;;  %4696 = vmatprep.subr.bf16.mxu1 %v6075_v49  ;;  %v2947_v49 = vld [vmem:[%s6816_s5] sm:$0xff] }
 0x25a   : > { %4888 = vmatprep.subr.bf16.mxu0 %v6246_v62 }
 0x25c   : > { %4698 = vmatpush1.bf16.msra.mxu1 %v6077_v23  ;;  %v2948_v23 = vld [vmem:[%s6816_s5 + $0x8] sm:$0xff] }
 0x25d   : > { %4890 = vmatpush1.bf16.msra.mxu0 %v6250_v27  ;;  %4700 = vmatprep.subr.bf16.mxu1 %v6086_v18  ;;  %v2949_v18 = vld [vmem:[%s6816_s5 + $0x10] sm:$0xff] }
 0x25e   : > { %4892 = vmatprep.subr.bf16.mxu0 %v6254_v56 }
 0x260   : > { %4702 = vmatpush1.bf16.msra.mxu1 %v6088_v44  ;;  %v6925_v44 = vld [vmem:[#allocation34_spill] sm:$0xff] }
 0x261   : > { %4894 = vmatpush1.bf16.msra.mxu0 %v6258_v31  ;;  %4704 = vmatprep.subr.bf16.mxu1 %v5941_v17  ;;  %v6908_v17 = vld [vmem:[#allocation17_spill] sm:$0xff] }
 0x263   : > { %2317 = vmatmul.mubr.f32.vlgmr.msra.gmra.mrb[8].mxu1 %v6147_v37  ;;  %v2954_v37 = vld [vmem:[%s6816_s5 + $0x38] sm:$0xff] }
 0x264   : > { %2852 = vmatmul.mubr.f32.vlgmr.msra.gmra.mrb[4].mxu0 %v6265_v33  ;;  %4706 = vmatpush1.bf16.msra.mxu1 %v5950_v35  ;;  %v6909_v35 = vld [vmem:[#allocation18_spill] sm:$0xff] }
 0x265   : > { %2387 = vmatprep.mubr.f32.mxu1 %v6881_v3  ;;  %4708 = vmatprep.subr.bf16.mxu1 %v5954_v39  ;;  %v6910_v39 = vld [vmem:[#allocation19_spill] sm:$0xff] }
 0x266   : > { %3914 = vmatprep.mubr.msk.f32.mxu0 %vm5351_vm1, %v6881_v3 }
 0x268   : > { %4710 = vmatpush1.bf16.msra.mxu1 %v5962_v53  ;;  %v6911_v53 = vld [vmem:[#allocation20_spill] sm:$0xff] }
 0x269   : > { %4712 = vmatprep.subr.bf16.mxu1 %v5966_v57  ;;  %v6912_v57 = vld [vmem:[#allocation21_spill] sm:$0xff] }
 0x26c   : > { %4714 = vmatpush1.bf16.msra.mxu1 %v5971_v14  ;;  %v6913_v14 = vld [vmem:[#allocation22_spill] sm:$0xff] }
 0x26d   : > { %4716 = vmatprep.subr.bf16.mxu1 %v5974_v15  ;;  %v6914_v15 = vld [vmem:[#allocation23_spill] sm:$0xff] }
 0x270   : > { %4718 = vmatpush1.bf16.msra.mxu1 %v5979_v55  ;;  %v6915_v55 = vld [vmem:[#allocation24_spill] sm:$0xff] }
 0x271   : > { %4720 = vmatprep.subr.bf16.mxu1 %v5982_v61  ;;  %v6916_v61 = vld [vmem:[#allocation25_spill] sm:$0xff] }
 0x274   : > { %4722 = vmatpush1.bf16.msra.mxu1 %v5987_v30  ;;  %v6917_v30 = vld [vmem:[#allocation26_spill] sm:$0xff] }
 0x275   : > { %4724 = vmatprep.subr.bf16.mxu1 %v5990_v32  ;;  %v6918_v32 = vld [vmem:[#allocation27_spill] sm:$0xff] }
 0x278   : > { %4726 = vmatpush1.bf16.msra.mxu1 %v5997_v10  ;;  %v6919_v10 = vld [vmem:[#allocation28_spill] sm:$0xff] }
 0x279   : > { %4728 = vmatprep.subr.bf16.mxu1 %v6002_v28  ;;  %v6920_v28 = vld [vmem:[#allocation29_spill] sm:$0xff] }
 0x27c   : > { %4730 = vmatpush1.bf16.msra.mxu1 %v6007_v5  ;;  %v6921_v5 = vld [vmem:[#allocation30_spill] sm:$0xff] }
 0x27d   : > { %4732 = vmatprep.subr.bf16.mxu1 %v6012_v47  ;;  %v6922_v47 = vld [vmem:[#allocation31_spill] sm:$0xff] }
 0x280   : > { %4734 = vmatpush1.bf16.msra.mxu1 %v6018_v50  ;;  %v6923_v50 = vld [vmem:[#allocation32_spill] sm:$0xff] }
 0x281   : > { %4768 = vmatprep.subr.bf16.mxu1 %v6021_v13  ;;  %v6924_v13 = vld [vmem:[#allocation33_spill] sm:$0xff] }
 0x283   : > { %2388 = vmatmul.mubr.f32.vlgmr.msra.gmra.mrb[8].mxu1 %v6200_v12  ;;  %v2953_v12 = vld [vmem:[%s6816_s5 + $0x30] sm:$0xff] }
 0x284   : > { %4770 = vmatpush1.bf16.msra.mxu1 %v6094_v46  ;;  %2565 = vmatprep.mubr.f32.mxu1 %v6881_v3  ;;  %v5350_v46 = vmov 0.0|0.0   ;;  %v4937_v21 = vpack.c.bf16 %v2954_v37, %v2953_v12  ;;  %v3406_v37 = vld [vmem:[%s6818_s7 + $0x50] sm:$0xff] }
 0x285   : > { %4772 = vmatprep.subr.bf16.mxu1 %v6096_v54  ;;  %4927 = vmatprep.subr.bf16.mxu0 %v5350_v46  ;;  %v4928_v54 = vpack.c.bf16 %v2948_v23, %v2947_v49  ;;  %v3702_v49 = vld [vmem:[%s6816_s5 + $0xb8] sm:$0xff] }
 0x287   : > { %4929 = vmatpush3.bf16.msra.mxu0 %v4928_v54 }
 0x288   : > { %4774 = vmatpush1.bf16.msra.mxu1 %v6099_v7  ;;  %v2950_v7 = vld [vmem:[%s6816_s5 + $0x18] sm:$0xff]  ;;  %4930 = vmatprep.subr.bf16.mxu0 %v5350_v46 }
 0x289   : > { %4776 = vmatprep.subr.bf16.mxu1 %v6103_v59  ;;  %v4931_v59 = vpack.c.bf16 %v2950_v7, %v2949_v18  ;;  %v3402_v18 = vld [vmem:[%s6818_s7 + $0x30] sm:$0xff]  ;;  %v3703_v7 = vld [vmem:[%s6816_s5 + $0xc0] sm:$0xff] }
 0x28b   : > { %4932 = vmatpush3.bf16.msra.mxu0 %v4931_v59  ;;  %v3704_v59 = vld [vmem:[%s6816_s5 + $0xc8] sm:$0xff] }
 0x28c   : > { %4778 = vmatpush1.bf16.msra.mxu1 %v6106_v9  ;;  %v6926_v9 = vld [vmem:[#allocation35_spill] sm:$0xff]  ;;  %4933 = vmatprep.subr.bf16.mxu0 %v5350_v46 }
 0x28d   : > { %4780 = vmatprep.subr.bf16.mxu1 %v6109_v8  ;;  %v2951_v8 = vld [vmem:[%s6816_s5 + $0x20] sm:$0xff] }
 0x290   : > { %4782 = vmatpush1.bf16.msra.mxu1 %v6112_v60  ;;  %v2952_v60 = vld [vmem:[%s6816_s5 + $0x28] sm:$0xff] }
 0x291   : > { %4784 = vmatprep.subr.bf16.mxu1 %v6115_v45  ;;  %v6927_v45 = vld [vmem:[#allocation36_spill] sm:$0xff] }
 0x294   : > { %4786 = vmatpush1.bf16.msra.mxu1 %v6118_v52  ;;  %v4934_v52 = vpack.c.bf16 %v2952_v60, %v2951_v8  ;;  %v3404_v8 = vld [vmem:[%s6818_s7 + $0x40] sm:$0xff]  ;;  %v3405_v60 = vld [vmem:[%s6818_s7 + $0x48] sm:$0xff] }
 0x295   : > { %4788 = vmatprep.subr.bf16.mxu1 %v6121_v63  ;;  %v6928_v63 = vld [vmem:[#allocation37_spill] sm:$0xff]  ;;  %v5060_v12 = vpack.c.bf16 %v3405_v60, %v3404_v8 }
 0x296   : > { %4935 = vmatpush3.bf16.msra.mxu0 %v4934_v52  ;;  %v3705_v52 = vld [vmem:[%s6816_s5 + $0xd0] sm:$0xff]  ;;  %v3738_v8 = vld [vmem:[%s6816_s5 + $0x1d8] sm:$0xff] }
 0x297   : > { %4936 = vmatprep.subr.bf16.mxu0 %v5350_v46 }
 0x298   : > { %4790 = vmatpush1.bf16.msra.mxu1 %v6908_v17 }
 0x299   : > { %4792 = vmatprep.subr.bf16.mxu1 %v6909_v35 }
 0x29a   : > { %4938 = vmatpush3.bf16.msra.mxu0 %v4937_v21 }
 0x29b   : > { %4939 = vmatprep.subr.bf16.mxu0 %v5350_v46 }
 0x29c   : > { %4794 = vmatpush1.bf16.msra.mxu1 %v6910_v39  ;;  %v3697_v39 = vld [vmem:[%s6816_s5 + $0x90] sm:$0xff] }
 0x29d   : > { %4796 = vmatprep.subr.bf16.mxu1 %v6911_v53  ;;  %v3698_v53 = vld [vmem:[%s6816_s5 + $0x98] sm:$0xff] }
 0x29e   : > { %4941 = vmatpush3.bf16.msra.mxu0 %v4940_v36 }
 0x29f   : > { %4942 = vmatprep.subr.bf16.mxu0 %v5350_v46 }
 0x2a0   : > { %4798 = vmatpush1.bf16.msra.mxu1 %v6912_v57  ;;  %v3396_v57 = vld [vmem:[%s6818_s7] sm:$0xff] }
 0x2a1   : > { %4832 = vmatprep.subr.bf16.mxu1 %v6913_v14  ;;  %v3397_v14 = vld [vmem:[%s6818_s7 + $0x8] sm:$0xff] }
 0x2a3   : > { %2566 = vmatmul.mubr.f32.vlgmr.msra.gmra.mrb[8].mxu1 %v6202_v48  ;;  %v6929_v48 = vld [vmem:[#allocation38_spill] sm:$0xff] }
 0x2a4   : > { %4834 = vmatpush1.bf16.msra.mxu1 %v6914_v15  ;;  %2745 = vmatprep.mubr.f32.mxu1 %v6881_v3  ;;  %v4955_v15 = vpack.c.bf16 %v3698_v53, %v3697_v39  ;;  %v3723_v39 = vld [vmem:[%s6816_s5 + $0x160] sm:$0xff]  ;;  %v3724_v53 = vld [vmem:[%s6816_s5 + $0x168] sm:$0xff] }
 0x2a5   : > { %4836 = vmatprep.subr.bf16.mxu1 %v6915_v55  ;;  %v5048_v55 = vpack.c.bf16 %v3397_v14, %v3396_v57  ;;  %v4994_v57 = vpack.c.bf16 %v3724_v53, %v3723_v39  ;;  %v3725_v14 = vld [vmem:[%s6816_s5 + $0x170] sm:$0xff]  ;;  %v3485_v39 = vld [vmem:[%s6820_s9 + $0x8] sm:$0xff] }
 0x2a8   : > { %4838 = vmatpush1.bf16.msra.mxu1 %v6916_v61  ;;  %v3398_v61 = vld [vmem:[%s6818_s7 + $0x10] sm:$0xff] }
 0x2a9   : > { %4840 = vmatprep.subr.bf16.mxu1 %v6917_v30  ;;  %v3399_v30 = vld [vmem:[%s6818_s7 + $0x18] sm:$0xff] }
 0x2ac   : > { %4842 = vmatpush1.bf16.msra.mxu1 %v6918_v32  ;;  %v3699_v32 = vld [vmem:[%s6816_s5 + $0xa0] sm:$0xff] }
 0x2ad   : > { %4844 = vmatprep.subr.bf16.mxu1 %v6919_v10  ;;  %v3700_v10 = vld [vmem:[%s6816_s5 + $0xa8] sm:$0xff] }
 0x2b0   : > { %4846 = vmatpush1.bf16.msra.mxu1 %v6920_v28  ;;  %v5051_v28 = vpack.c.bf16 %v3399_v30, %v3398_v61  ;;  %v3727_v61 = vld [vmem:[%s6816_s5 + $0x180] sm:$0xff]  ;;  %v3728_v30 = vld [vmem:[%s6816_s5 + $0x188] sm:$0xff] }
 0x2b1   : > { %4848 = vmatprep.subr.bf16.mxu1 %v6921_v5  ;;  %v3400_v5 = vld [vmem:[%s6818_s7 + $0x20] sm:$0xff] }
 0x2b4   : > { %4850 = vmatpush1.bf16.msra.mxu1 %v6922_v47  ;;  %v3401_v47 = vld [vmem:[%s6818_s7 + $0x28] sm:$0xff] }
 0x2b5   : > { %4852 = vmatprep.subr.bf16.mxu1 %v6923_v50  ;;  %v4958_v50 = vpack.c.bf16 %v3700_v10, %v3699_v32  ;;  %v5054_v23 = vpack.c.bf16 %v3401_v47, %v3400_v5  ;;  %v5000_v32 = vpack.c.bf16 %v3728_v30, %v3727_v61  ;;  %v3730_v5 = vld [vmem:[%s6816_s5 + $0x198] sm:$0xff]  ;;  %v3486_v61 = vld [vmem:[%s6820_s9 + $0x10] sm:$0xff] }
 0x2b6   : > { %v3487_v30 = vld [vmem:[%s6820_s9 + $0x18] sm:$0xff] }
 0x2b8   : > { %4854 = vmatpush1.bf16.msra.mxu1 %v6924_v13  ;;  %v3701_v13 = vld [vmem:[%s6816_s5 + $0xb0] sm:$0xff] }
 0x2b9   : > { %4856 = vmatprep.subr.bf16.mxu1 %v6925_v44  ;;  %v3403_v44 = vld [vmem:[%s6818_s7 + $0x38] sm:$0xff]  ;;  %v4961_v54 = vpack.c.bf16 %v3702_v49, %v3701_v13  ;;  %v3732_v13 = vld [vmem:[%s6816_s5 + $0x1a8] sm:$0xff] }
 0x2bc   : > { %4858 = vmatpush1.bf16.msra.mxu1 %v6926_v9  ;;  %v5057_v9 = vpack.c.bf16 %v3403_v44, %v3402_v18  ;;  %v3734_v18 = vld [vmem:[%s6816_s5 + $0x1b8] sm:$0xff] }
 0x2bd   : > { %4860 = vmatprep.subr.bf16.mxu1 %v6927_v45  ;;  %v4964_v45 = vpack.c.bf16 %v3704_v59, %v3703_v7  ;;  %v3736_v7 = vld [vmem:[%s6816_s5 + $0x1c8] sm:$0xff] }
 0x2c0   : > { %4862 = vmatpush1.bf16.msra.mxu1 %v6928_v63  ;;  %v3706_v63 = vld [vmem:[%s6816_s5 + $0xd8] sm:$0xff] }
 0x2c1   : > { %4896 = vmatprep.subr.bf16.mxu1 %v6929_v48  ;;  %v3407_v48 = vld [vmem:[%s6818_s7 + $0x58] sm:$0xff]  ;;  %v4967_v21 = vpack.c.bf16 %v3706_v63, %v3705_v52  ;;  %v3740_v52 = vld [vmem:[%s6816_s5 + $0x1e8] sm:$0xff] }
 0x2c2   : > { %v5063_v36 = vpack.c.bf16 %v3407_v48, %v3406_v37  ;;  %v3742_v37 = vld [vmem:[%s6816_s5 + $0x1f8] sm:$0xff] }
 0x2c3   : > { %2746 = vmatmul.mubr.f32.vlgmr.msra.gmra.mrb[8].mxu1 %v6265_v33 }
 0x2c4   : > { %4898 = vmatpush1.bf16.msra.mxu1 %v6196_v40  ;;  %2925 = vmatprep.mubr.f32.mxu1 %v6881_v3  ;;  %v2957_v40 = vld [vmem:[%s6816_s5 + $0x50] sm:$0xff] }
 0x2c5   : > { %4900 = vmatprep.subr.bf16.mxu1 %v6198_v4  ;;  %v4943_v4 = vpack.c.bf16 %v2958_v2, %v2957_v40  ;;  %v3408_v40 = vld [vmem:[%s6818_s7 + $0x60] sm:$0xff]  ;;  %v3409_v2 = vld [vmem:[%s6818_s7 + $0x68] sm:$0xff] }
 0x2c7   : > { %4944 = vmatpush3.bf16.msra.mxu0 %v4943_v4  ;;  %v4970_v4 = vpack.c.bf16 %v3708_v51, %v3707_v20  ;;  %v3744_v20 = vld [vmem:[%s6816_s5 + $0x208] sm:$0xff] }
 0x2c8   : > { %4902 = vmatpush1.bf16.msra.mxu1 %v6208_v29  ;;  %4945 = vmatprep.subr.bf16.mxu0 %v5350_v46  ;;  %v2860_v29 = vld [vmem:[#allocation2 + $0xa] sm:$0x1f] }
 0x2c9   : > { %4904 = vmatprep.subr.bf16.mxu1 %v6212_v42 }
 0x2cc   : > { %4906 = vmatpush1.bf16.msra.mxu1 %v6218_v0 }
 0x2cd   : > { %4908 = vmatprep.subr.bf16.mxu1 %v6222_v41  ;;  %v2959_v41 = vld [vmem:[%s6816_s5 + $0x60] sm:$0xff] }
 0x2d0   : > { %4910 = vmatpush1.bf16.msra.mxu1 %v6226_v11  ;;  %v2960_v11 = vld [vmem:[%s6816_s5 + $0x68] sm:$0xff] }
 0x2d1   : > { %4912 = vmatprep.subr.bf16.mxu1 %v6230_v22 }
 0x2d4   : > { %4914 = vmatpush1.bf16.msra.mxu1 %v6234_v6  ;;  %v4946_v6 = vpack.c.bf16 %v2960_v11, %v2959_v41  ;;  %v3711_v11 = vld [vmem:[%s6816_s5 + $0x100] sm:$0xff] }
 0x2d5   : > { %4916 = vmatprep.subr.bf16.mxu1 %v6238_v1 }
 0x2d6   : > { %4947 = vmatpush3.bf16.msra.mxu0 %v4946_v6 }
 0x2d7   : > { %4948 = vmatprep.subr.bf16.mxu0 %v5350_v46 }
 0x2d8   : > { %4918 = vmatpush1.bf16.msra.mxu1 %v6242_v16  ;;  %v2961_v16 = vld [vmem:[%s6816_s5 + $0x70] sm:$0xff] }
 0x2d9   : > { %4920 = vmatprep.subr.bf16.mxu1 %v6246_v62  ;;  %v2962_v62 = vld [vmem:[%s6816_s5 + $0x78] sm:$0xff] }
 0x2da   : > { %v4949_v25 = vpack.c.bf16 %v2962_v62, %v2961_v16  ;;  %v3715_v62 = vld [vmem:[%s6816_s5 + $0x120] sm:$0xff] }
 0x2dc   : > { %4922 = vmatpush1.bf16.msra.mxu1 %v6250_v27  ;;  %4950 = vmatpush3.bf16.msra.mxu0 %v4949_v25  ;;  %v3716_v25 = vld [vmem:[%s6816_s5 + $0x128] sm:$0xff] }
 0x2dd   : > { %4924 = vmatprep.subr.bf16.mxu1 %v6254_v56  ;;  %4951 = vmatprep.subr.bf16.mxu0 %v5350_v46  ;;  %v3694_v56 = vld [vmem:[%s6815_s4] ss:$0 sm:$0xff] }
 0x2e0   : > { %4926 = vmatpush1.bf16.msra.mxu1 %v6258_v31  ;;  %v3696_v31 = vld [vmem:[%s6816_s5 + $0x88] sm:$0xff] }
 0x2e1   : > { %5047 = vmatprep.subr.bf16.mxu1 %v5350_v46  ;;  %v4952_v17 = vpack.c.bf16 %v3696_v31, %v3695_v24  ;;  %v3721_v31 = vld [vmem:[%s6816_s5 + $0x150] sm:$0xff] }
 0x2e3   : > { %2926 = vmatmul.mubr.f32.vlgmr.msra.gmra.mrb[8].mxu1 %v2860_v29  ;;  %v3709_v29 = vld [vmem:[%s6816_s5 + $0xf0] sm:$0xff] }
 0x2e4   : > { %4089 = vmatprep.mubr.msk.f32.mxu1 %vm5351_vm1, %v6881_v3  ;;  %5049 = vmatpush3.bf16.msra.mxu1 %v5048_v55 }
 0x2e5   : > { %5050 = vmatprep.subr.bf16.mxu1 %v5350_v46 }
 0x2e8   : > { %5052 = vmatpush3.bf16.msra.mxu1 %v5051_v28  ;;  %v3729_v28 = vld [vmem:[%s6816_s5 + $0x190] sm:$0xff] }
 0x2e9   : > { %5053 = vmatprep.subr.bf16.mxu1 %v5350_v46  ;;  %v5003_v47 = vpack.c.bf16 %v3730_v5, %v3729_v28  ;;  %v3489_v28 = vld [vmem:[%s6820_s9 + $0x28] sm:$0xff] }
 0x2ec   : > { %5055 = vmatpush3.bf16.msra.mxu1 %v5054_v23  ;;  %v3733_v23 = vld [vmem:[%s6816_s5 + $0x1b0] sm:$0xff] }
 0x2ed   : > { %5056 = vmatprep.subr.bf16.mxu1 %v5350_v46  ;;  %v5009_v44 = vpack.c.bf16 %v3734_v18, %v3733_v23  ;;  %v3494_v18 = vld [vmem:[%s6820_s9 + $0x50] sm:$0xff] }
 0x2f0   : > { %5058 = vmatpush3.bf16.msra.mxu1 %v5057_v9  ;;  %v3737_v9 = vld [vmem:[%s6816_s5 + $0x1d0] sm:$0xff] }
 0x2f1   : > { %5059 = vmatprep.subr.bf16.mxu1 %v5350_v46  ;;  %v5015_v60 = vpack.c.bf16 %v3738_v8, %v3737_v9  ;;  %v3498_v8 = vld [vmem:[%s6820_s9 + $0x70] sm:$0xff] }
 0x2f4   : > { %5061 = vmatpush3.bf16.msra.mxu1 %v5060_v12  ;;  %v3741_v12 = vld [vmem:[%s6816_s5 + $0x1f0] sm:$0xff] }
 0x2f5   : > { %5062 = vmatprep.subr.bf16.mxu1 %v5350_v46  ;;  %v5021_v48 = vpack.c.bf16 %v3742_v37, %v3741_v12 }
 0x2f8   : > { %5064 = vmatpush3.bf16.msra.mxu1 %v5063_v36 }
 0x2f9   : > { %5065 = vmatprep.subr.bf16.mxu1 %v5350_v46 }
 0x316   : > { %v2175_v42 = vpop.f32.mrb[6].mxu1 }
 0x317   : > { %v2177_v0 = vpop.f32.mrb[7].mxu1 }
 0x337   : > { %v2853_v22 = vpop.f32.mrb[4].mxu0 }
 0x338   : > { %v5097_v1 = vadd.f32 %v2853_v22, %v2175_v42  ;;  %v2855_v34 = vpop.f32.mrb[5].mxu0  ;;  %v3710_v42 = vld [vmem:[%s6816_s5 + $0xf8] sm:$0xff]  ;;  %v3712_v22 = vld [vmem:[%s6816_s5 + $0x108] sm:$0xff] }
 0x339   : > { %v5098_v26 = vadd.f32 %v2855_v34, %v2177_v0  ;;  %v5066_v0 = vpack.c.bf16 %v3409_v2, %v3408_v40  ;;  %v4973_v41 = vpack.c.bf16 %v3710_v42, %v3709_v29  ;;  %v4976_v6 = vpack.c.bf16 %v3712_v22, %v3711_v11  ;;  %v3713_v34 = vld [vmem:[%s6816_s5 + $0x110] sm:$0xff]  ;;  %v3746_v2 = vld [vmem:[%s6816_s5 + $0x218] sm:$0xff]  ;;  %v3747_v29 = vld [vmem:[%s6816_s5 + $0x220] sm:$0xff] }
 0x33a   : > { %v3745_v40 = vld [vmem:[%s6816_s5 + $0x210] sm:$0xff]  ;;  %v3748_v42 = vld [vmem:[%s6816_s5 + $0x228] sm:$0xff]  ;;  %v3750_v11 = vld [vmem:[%s6816_s5 + $0x238] sm:$0xff] }
 0x33b   : > { %5067 = vmatpush3.bf16.msra.mxu1 %v5066_v0  ;;  %v5030_v0 = vpack.c.bf16 %v3748_v42, %v3747_v29 }
 0x33c   : > { %5068 = vmatprep.subr.bf16.mxu1 %v5350_v46 }
 0x3b6   : > { %v2927_v38 = vpop.f32.mrb[8].mxu1 }
 0x3b7   : > { %v2934_v43 = vmax.f32 %v5097_v1, %v2927_v38  ;;  %v2929_v58 = vpop.f32.mrb[9].mxu1  ;;  %v4982_v38 = vpack.c.bf16 %v3716_v25, %v3715_v62  ;;  %v3755_v25 = vld [vmem:[%s6816_s5 + $0x260] sm:$0xff] }
 0x3b8   : > { %v2935_v27 = vmax.f32 %v5098_v26, %v2929_v58  ;;  %v3714_v26 = vld [vmem:[%s6816_s5 + $0x118] sm:$0xff] }
 0x3b9   : > { %v4979_v16 = vpack.c.bf16 %v3714_v26, %v3713_v34  ;;  %v3718_v58 = vld [vmem:[%s6816_s5 + $0x138] sm:$0xff]  ;;  %v3753_v26 = vld [vmem:[%s6816_s5 + $0x250] sm:$0xff] }
 0x3ba   : > { %v2936_v19 = vmax.f32 %v2934_v43, %v2935_v27  ;;  %v3717_v43 = vld [vmem:[%s6816_s5 + $0x130] sm:$0xff] }
 0x3bb   : > { %v4985_v27 = vpack.c.bf16 %v3718_v58, %v3717_v43  ;;  %v3757_v58 = vld [vmem:[%s6816_s5 + $0x270] sm:$0xff] }
 0x3bc   : > { %v2944_v33 = vadd.f32 %v3694_v56, %v2936_v19  ;;  %v3719_v56 = vld [vmem:[%s6816_s5 + $0x140] sm:$0xff]  ;;  %v3720_v19 = vld [vmem:[%s6816_s5 + $0x148] sm:$0xff] }
 0x3bd   : > { %v4988_v24 = vpack.c.bf16 %v3720_v19, %v3719_v56 }
 0x3be   : > { %v6410_v35 = vmax.f32 %v2944_v33, 0.0  ;;  %v3722_v33 = vld [vmem:[%s6816_s5 + $0x158] sm:$0xff] }
 0x3c0   : > { %3915 = vmatmul.mubr.f32.vlgmr.msra.gmra.mrb[6].mxu0 %v6410_v35  ;;  %v3052_v1 = vrot.slane %v6410_v35, 1  ;;  %v3142_v10 = vrot.slane %v6410_v35, 2  ;;  %v3232_v36 = vrot.slane %v6410_v35, 3  ;;  %v3322_v19 = vrot.slane %v6410_v35, 4  ;;  %v3484_v35 = vld [vmem:[%s6820_s9] sm:$0xff] }
 0x3c1   : > { %4953 = vmatpush3.bf16.msra.mxu0 %v4952_v17  ;;  %3949 = vmatprep.mubr.msk.f32.mxu0 %vm5351_vm1, %v6881_v3  ;;  %v4991_v17 = vpack.c.bf16 %v3722_v33, %v3721_v31  ;;  %v3411_v31 = vld [vmem:[%s6818_s7 + $0x78] sm:$0xff] }
 0x3c2   : > { %4954 = vmatprep.subr.bf16.mxu0 %v5350_v46 }
 0x3c5   : > { %4956 = vmatpush3.bf16.msra.mxu0 %v4955_v15  ;;  %v3726_v15 = vld [vmem:[%s6816_s5 + $0x178] sm:$0xff] }
 0x3c6   : > { %4957 = vmatprep.subr.bf16.mxu0 %v5350_v46  ;;  %v4997_v55 = vpack.c.bf16 %v3726_v15, %v3725_v14  ;;  %v5072_v15 = vpack.c.bf16 %v3485_v39, %v3484_v35 }
 0x3c9   : > { %4959 = vmatpush3.bf16.msra.mxu0 %v4958_v50  ;;  %v3731_v50 = vld [vmem:[%s6816_s5 + $0x1a0] sm:$0xff] }
 0x3ca   : > { %4960 = vmatprep.subr.bf16.mxu0 %v5350_v46  ;;  %v5006_v49 = vpack.c.bf16 %v3732_v13, %v3731_v50  ;;  %v3492_v13 = vld [vmem:[%s6820_s9 + $0x40] sm:$0xff] }
 0x3cd   : > { %4962 = vmatpush3.bf16.msra.mxu0 %v4961_v54  ;;  %v3735_v54 = vld [vmem:[%s6816_s5 + $0x1c0] sm:$0xff] }
 0x3ce   : > { %4963 = vmatprep.subr.bf16.mxu0 %v5350_v46  ;;  %v5012_v59 = vpack.c.bf16 %v3736_v7, %v3735_v54  ;;  %v3496_v7 = vld [vmem:[%s6820_s9 + $0x60] sm:$0xff] }
 0x3d1   : > { %4965 = vmatpush3.bf16.msra.mxu0 %v4964_v45  ;;  %v3739_v45 = vld [vmem:[%s6816_s5 + $0x1e0] sm:$0xff] }
 0x3d2   : > { %4966 = vmatprep.subr.bf16.mxu0 %v5350_v46  ;;  %v5018_v63 = vpack.c.bf16 %v3740_v52, %v3739_v45  ;;  %v3412_v52 = vld [vmem:[%s6819_s8] sm:$0x1] }
 0x3d5   : > { %4968 = vmatpush3.bf16.msra.mxu0 %v4967_v21  ;;  %v3743_v21 = vld [vmem:[%s6816_s5 + $0x200] sm:$0xff] }
 0x3d6   : > { %4969 = vmatprep.subr.bf16.mxu0 %v5350_v46  ;;  %v5024_v51 = vpack.c.bf16 %v3744_v20, %v3743_v21 }
 0x3d9   : > { %4971 = vmatpush3.bf16.msra.mxu0 %v4970_v4  ;;  %v5027_v4 = vpack.c.bf16 %v3746_v2, %v3745_v40 }
 0x3da   : > { %4972 = vmatprep.subr.bf16.mxu0 %v5350_v46 }
 0x3dd   : > { %4974 = vmatpush3.bf16.msra.mxu0 %v4973_v41  ;;  %v3749_v41 = vld [vmem:[%s6816_s5 + $0x230] sm:$0xff] }
 0x3de   : > { %4975 = vmatprep.subr.bf16.mxu0 %v5350_v46  ;;  %v5033_v22 = vpack.c.bf16 %v3750_v11, %v3749_v41 }
 0x3e0   : > { %3950 = vmatmul.mubr.f32.vlgmr.msra.gmra.mrb[6].mxu0 %v3052_v1  ;;  %v3752_v1 = vld [vmem:[%s6816_s5 + $0x248] sm:$0xff] }
 0x3e1   : > { %4977 = vmatpush3.bf16.msra.mxu0 %v4976_v6  ;;  %3984 = vmatprep.mubr.msk.f32.mxu0 %vm5351_vm1, %v6881_v3  ;;  %v3751_v6 = vld [vmem:[%s6816_s5 + $0x240] sm:$0xff] }
 0x3e2   : > { %4978 = vmatprep.subr.bf16.mxu0 %v5350_v46  ;;  %v5036_v34 = vpack.c.bf16 %v3752_v1, %v3751_v6 }
 0x3e5   : > { %4980 = vmatpush3.bf16.msra.mxu0 %v4979_v16  ;;  %v3754_v16 = vld [vmem:[%s6816_s5 + $0x258] sm:$0xff] }
 0x3e6   : > { %4981 = vmatprep.subr.bf16.mxu0 %v5350_v46  ;;  %v5039_v62 = vpack.c.bf16 %v3754_v16, %v3753_v26 }
 0x3e9   : > { %4983 = vmatpush3.bf16.msra.mxu0 %v4982_v38  ;;  %v3756_v38 = vld [vmem:[%s6816_s5 + $0x268] sm:$0xff] }
 0x3ea   : > { %4984 = vmatprep.subr.bf16.mxu0 %v5350_v46  ;;  %v5042_v43 = vpack.c.bf16 %v3756_v38, %v3755_v25 }
 0x3ed   : > { %4986 = vmatpush3.bf16.msra.mxu0 %v4985_v27  ;;  %v3758_v27 = vld [vmem:[%s6816_s5 + $0x278] sm:$0xff] }
 0x3ee   : > { %4987 = vmatprep.subr.bf16.mxu0 %v5350_v46  ;;  %v5045_v56 = vpack.c.bf16 %v3758_v27, %v3757_v58 }
 0x3f1   : > { %4989 = vmatpush3.bf16.msra.mxu0 %v4988_v24  ;;  %v3410_v24 = vld [vmem:[%s6818_s7 + $0x70] sm:$0xff] }
 0x3f2   : > { %4990 = vmatprep.subr.bf16.mxu0 %v5350_v46  ;;  %v5069_v33 = vpack.c.bf16 %v3411_v31, %v3410_v24 }
 0x3f4   : > { %5070 = vmatpush3.bf16.msra.mxu1 %v5069_v33 }
 0x3f5   : > { %4992 = vmatpush3.bf16.msra.mxu0 %v4991_v17  ;;  %5071 = vmatprep.subr.bf16.mxu1 %v5350_v46  ;;  %v2946_v17 = vld [vmem:[%s6817_s6] sm:$0x1] }
 0x3f6   : > { %4993 = vmatprep.subr.bf16.mxu0 %v5350_v46 }
 0x3f9   : > { %4995 = vmatpush3.bf16.msra.mxu0 %v4994_v57 }
 0x3fa   : > { %4996 = vmatprep.subr.bf16.mxu0 %v5350_v46 }
 0x3fd   : > { %4998 = vmatpush3.bf16.msra.mxu0 %v4997_v55 }
 0x3fe   : > { %4999 = vmatprep.subr.bf16.mxu0 %v5350_v46 }
 0x400   : > { %3985 = vmatmul.mubr.f32.vlgmr.msra.gmra.mrb[6].mxu0 %v3142_v10  ;;  %v3488_v10 = vld [vmem:[%s6820_s9 + $0x20] sm:$0xff] }
 0x401   : > { %5001 = vmatpush3.bf16.msra.mxu0 %v5000_v32  ;;  %4019 = vmatprep.mubr.msk.f32.mxu0 %vm5351_vm1, %v6881_v3  ;;  %v5075_v32 = vpack.c.bf16 %v3487_v30, %v3486_v61  ;;  %v5078_v5 = vpack.c.bf16 %v3489_v28, %v3488_v10 }
 0x402   : > { %5002 = vmatprep.subr.bf16.mxu0 %v5350_v46 }
 0x405   : > { %5004 = vmatpush3.bf16.msra.mxu0 %v5003_v47  ;;  %v3490_v47 = vld [vmem:[%s6820_s9 + $0x30] sm:$0xff] }
 0x406   : > { %5005 = vmatprep.subr.bf16.mxu0 %v5350_v46 }
 0x409   : > { %5007 = vmatpush3.bf16.msra.mxu0 %v5006_v49  ;;  %v3493_v49 = vld [vmem:[%s6820_s9 + $0x48] sm:$0xff] }
 0x40a   : > { %5008 = vmatprep.subr.bf16.mxu0 %v5350_v46  ;;  %v5084_v23 = vpack.c.bf16 %v3493_v49, %v3492_v13 }
 0x40d   : > { %5010 = vmatpush3.bf16.msra.mxu0 %v5009_v44  ;;  %v3495_v44 = vld [vmem:[%s6820_s9 + $0x58] sm:$0xff] }
 0x40e   : > { %5011 = vmatprep.subr.bf16.mxu0 %v5350_v46  ;;  %v5087_v54 = vpack.c.bf16 %v3495_v44, %v3494_v18 }
 0x411   : > { %5013 = vmatpush3.bf16.msra.mxu0 %v5012_v59  ;;  %v3497_v59 = vld [vmem:[%s6820_s9 + $0x68] sm:$0xff] }
 0x412   : > { %5014 = vmatprep.subr.bf16.mxu0 %v5350_v46  ;;  %v5090_v9 = vpack.c.bf16 %v3497_v59, %v3496_v7 }
 0x415   : > { %5016 = vmatpush3.bf16.msra.mxu0 %v5015_v60  ;;  %v3499_v60 = vld [vmem:[%s6820_s9 + $0x78] sm:$0xff] }
 0x416   : > { %5017 = vmatprep.subr.bf16.mxu0 %v5350_v46  ;;  %v5093_v45 = vpack.c.bf16 %v3499_v60, %v3498_v8 }
 0x419   : > { %5019 = vmatpush3.bf16.msra.mxu0 %v5018_v63 }
 0x41a   : > { %5020 = vmatprep.subr.bf16.mxu0 %v5350_v46 }
 0x41d   : > { %5022 = vmatpush3.bf16.msra.mxu0 %v5021_v48 }
 0x41e   : > { %5023 = vmatprep.subr.bf16.mxu0 %v5350_v46 }
 0x420   : > { %4020 = vmatmul.mubr.f32.vlgmr.msra.gmra.mrb[6].mxu0 %v3232_v36 }
 0x421   : > { %5025 = vmatpush3.bf16.msra.mxu0 %v5024_v51  ;;  %4054 = vmatprep.mubr.msk.f32.mxu0 %vm5351_vm1, %v6881_v3 }
 0x422   : > { %5026 = vmatprep.subr.bf16.mxu0 %v5350_v46 }
 0x425   : > { %5028 = vmatpush3.bf16.msra.mxu0 %v5027_v4 }
 0x426   : > { %5029 = vmatprep.subr.bf16.mxu0 %v5350_v46 }
 0x429   : > { %5031 = vmatpush3.bf16.msra.mxu0 %v5030_v0 }
 0x42a   : > { %5032 = vmatprep.subr.bf16.mxu0 %v5350_v46 }
 0x42d   : > { %5034 = vmatpush3.bf16.msra.mxu0 %v5033_v22 }
 0x42e   : > { %5035 = vmatprep.subr.bf16.mxu0 %v5350_v46 }
 0x431   : > { %5037 = vmatpush3.bf16.msra.mxu0 %v5036_v34 }
 0x432   : > { %5038 = vmatprep.subr.bf16.mxu0 %v5350_v46 }
 0x435   : > { %5040 = vmatpush3.bf16.msra.mxu0 %v5039_v62 }
 0x436   : > { %5041 = vmatprep.subr.bf16.mxu0 %v5350_v46 }
 0x439   : > { %5043 = vmatpush3.bf16.msra.mxu0 %v5042_v43 }
 0x43a   : > { %5044 = vmatprep.subr.bf16.mxu0 %v5350_v46 }
 0x43d   : > { %5046 = vmatpush3.bf16.msra.mxu0 %v5045_v56 }
 0x440   : > { %4055 = vmatmul.mubr.f32.vlgmr.msra.gmra.mrb[6].mxu0 %v3322_v19 }
 0x513   : > { %v3390_v53 = vpop.f32.mrb[6].mxu0 }
 0x514   : > { %v5099_v57 = vadd.f32 %v3390_v53, %v2946_v17  ;;  %v4056_v14 = vpop.f32.mrb[7].mxu0 }
 0x516   : > { %v3395_v55 = vmax.f32 %v5099_v57, 0.0 }
 0x518   : > { %4090 = vmatmul.mubr.f32.vlgmr.msra.gmra.mrb[10].mxu1 %v3395_v55 }
 0x519   : > { %5073 = vmatpush3.bf16.msra.mxu1 %v5072_v15  ;;  %4124 = vmatprep.mubr.msk.f32.mxu1 %vm5351_vm1, %v6881_v3  ;;  %v3491_v3 = vld [vmem:[%s6820_s9 + $0x38] sm:$0xff] }
 0x51a   : > { %5074 = vmatprep.subr.bf16.mxu1 %v5350_v46  ;;  %v5081_v50 = vpack.c.bf16 %v3491_v3, %v3490_v47 }
 0x51d   : > { %5076 = vmatpush3.bf16.msra.mxu1 %v5075_v32 }
 0x51e   : > { %5077 = vmatprep.subr.bf16.mxu1 %v5350_v46 }
 0x521   : > { %5079 = vmatpush3.bf16.msra.mxu1 %v5078_v5 }
 0x522   : > { %5080 = vmatprep.subr.bf16.mxu1 %v5350_v46 }
 0x525   : > { %5082 = vmatpush3.bf16.msra.mxu1 %v5081_v50 }
 0x526   : > { %5083 = vmatprep.subr.bf16.mxu1 %v5350_v46 }
 0x529   : > { %5085 = vmatpush3.bf16.msra.mxu1 %v5084_v23 }
 0x52a   : > { %5086 = vmatprep.subr.bf16.mxu1 %v5350_v46 }
 0x52d   : > { %5088 = vmatpush3.bf16.msra.mxu1 %v5087_v54 }
 0x52e   : > { %5089 = vmatprep.subr.bf16.mxu1 %v5350_v46 }
 0x531   : > { %5091 = vmatpush3.bf16.msra.mxu1 %v5090_v9 }
 0x532   : > { %5092 = vmatprep.subr.bf16.mxu1 %v5350_v46  ;;  %v3500_v46 = vld [vmem:[%s6821_s10] sm:$0x1] }
 0x535   : > { %5094 = vmatpush3.bf16.msra.mxu1 %v5093_v45 }
 0x5eb   : > { %v3479_v63 = vpop.f32.mrb[10].mxu1 }
 0x5ec   : > { %v3480_v12 = vadd.f32 %v3479_v63, %v3412_v52  ;;  %v4091_v37 = vpop.f32.mrb[11].mxu1 }
 0x5ee   : > { %v3483_v48 = vmax.f32 %v3480_v12, 0.0 }
 0x5f0   : > { %4125 = vmatmul.mubr.f32.vlgmr.msra.gmra.mrb[12].mxu1 %v3483_v48 }
 0x6c3   : > { %v3567_v21 = vpop.f32.mrb[12].mxu1 }
 0x6c4   : > { %v3568_v20 = vadd.f32 %v3567_v21, %v3500_v46  ;;  %v4126_v51 = vpop.f32.mrb[13].mxu1 }
 0x6c6   : > { %3571 = vst [vmem:[%s408_s29] sm:$0x1] %v3568_v20 }
 0x6c7   : > { %5286 = shalt.err (!%p5283_p11)
}
 0x6c8   : > { %s5287_s30 = scalar_lea.hbm %s6769_s22, 16  ;;  %s5291_s17 = scalar_lea.hbm %s6822_s11, 32 }
 0x6c9   : > { %p5288_p13 = scmp.ne.s32.totalorder %s6769_s22, %s5287_s30  ;;  %p5292_p6 = scmp.lt.u32.totalorder %s6769_s22, %s6822_s11 }
 0x6ca   : > { %p5293_p9 = scmp.lt.u32.totalorder %s5291_s17, %s5287_s30  ;;  %p5295_p10 = scmp.lt.u32.totalorder %s5287_s30, %s6769_s22 }
 0x6cb   : > { %p5289_p5 = pnand %p5288_p13, %p6930_p1 }
 0x6cc   : > { %p5294_p12 = por %p5293_p9, %p5292_p6 }
 0x6cd   : > { %p5290_p0 = pneg %p5289_p5 }
 0x6ce   : > { %p5296_p2 = por %p5295_p10, %p5294_p12 }
 0x6d0   : > { %p5297_p3 = pnand %p5296_p2, %p5290_p0 }
 0x6d2   : > { %5300 = shalt.err (!%p5297_p3)
}
 0x6d3   : > { %5160 = dma.vmem_to_hbm [thread:$0]  (%p6930_p1), %s6771_s13, 16, %s6769_s22, %s3573_s19  }
 0x6d4 PF: > { %s6931_s29 = sld [smem:[#allocation12_spill]]  ;;  %s6932_s15 = sld [smem:[#allocation16_spill]] }
 0x6d5   : > { %p5177_p4 = scmp.ge.s32.totalorder %s5343_s20, 2 }
 0x6da   : > { %s3597_s16 = sand.u32 1, %s6931_s29   ;;  %p6933_p7 = scmp.ne.s32.totalorder %s6932_s15, 0 }
 0x6db   : > { %s3598_s26 = scalar_lea.sflag [#allocation5], %s3597_s16 }
 0x6dc   : > { %p5170_p8 = pnand %p5177_p4, %p6933_p7 }
 0x6de   : > { %5326 = dma.done.wait (!%p5170_p8), %s3598_s26, 16  }
 0x6df   : > { %5328 = vsyncadd (!%p5170_p8), %s3598_s26, 4294967280  ;;  %s6934_s20 = sld [smem:[#allocation14_spill]]  ;;  %s6935_s21 = sld [smem:[#allocation13_spill]] }
 0x6e0   : > { %s6936_s19 = sld [smem:[#allocation15_spill]]  ;;  %s6937_s17 = smov %s5335_s18 }
 0x6e5   : > { %p23_p11 = scmp.ge.s32.totalorder %s6934_s20, 4   ;;  %s6938_s18 = smov %s6935_s21 }
 0x6e7   :  { %25 = sbr.rel (!%p23_p11) target bundleno = 5 (0x5), region = 121 }
 0x6ee   :  { %3602 = vsyncpa [#allocation4], 1 }
 0x6ef   :  { %3604 = vsyncpa [#allocation4 + $0x1], 1 }
 0x6f0   :  { %3605 = vsyncpa [#allocation7], 1 }
 0x6f1   :  { %3606 = vsyncpa [#allocation5], 1 }
 0x6f2   :  { %3608 = vsyncpa [#allocation5 + $0x1], 1 }

</bundles_post_ra>
